<compile_context>
chip_gen: v7x
topology: tpu7x:2x2x1
jax: 0.10.0
libtpu: 0.0.40
codegen_flags: <defaults>
</compile_context>

<pallas_src>
import functools

import jax
import jax.numpy as jnp
from jax.experimental import pallas as pl
from jax.experimental.pallas import tpu as pltpu

LN_EPS = 1e-5        # nn.LayerNorm default eps
SLOT_EPS = 1e-8      # SlotAttention epsilon
LEAKY_SLOPE = 0.01   # nn.LeakyReLU default negative_slope

# Row layout of the packed `vecs` input (each row zero-padded to max(3D, MLP) lanes).
#   0: lns_g  1: lns_b  2: lnm_g  3: lnm_b
#   4: b_i (=b_ir|b_iz|b_in, 3D)  5: b_h (=b_hr|b_hz|b_hn, 3D)
#   6: mb1 (MLPH)  7: mb2 (D)  8: mu (D)  9: log_sigma (D)
# Row layout of the packed [4D, D] token-weight stack (pre-transposed, bf16):
#   0:D  eol_w1^T   D:2D eol_w2^T   2D:4D  wk^T|wv^T (fused)


def _layer_norm(x, g, b):
    """LayerNorm over the last axis; g/b broadcast as [1, D]."""
    mu = jnp.mean(x, axis=-1, keepdims=True)
    var = jnp.mean(jnp.square(x - mu), axis=-1, keepdims=True)
    return (x - mu) * jax.lax.rsqrt(var + LN_EPS) * g + b


def _encode_kernel(x_ref, init_ref, w_tok_ref, wq_ref, wi_ref, wh_ref,
                   mw1_ref, mw2_ref, vecs_ref, tok_vecs_ref,
                   out_ref, kv_ref, *, num_iterations, bt):
    f32 = jnp.float32
    bf16 = jnp.bfloat16
    _, D, NT = x_ref.shape          # NT = bt * N  (tokens of the whole batch tile)
    N = NT // bt
    BS = init_ref.shape[1]          # bt * S
    S = BS // bt
    MLPH = mw1_ref.shape[1]

    # ---- hoisted parameter loads (all fusions already done on the host) ----
    w1t = w_tok_ref[0:D, :]                       # [D, D]   bf16
    w2t = w_tok_ref[D:2 * D, :]                   # [D, D]   bf16
    wkv_t = w_tok_ref[2 * D:4 * D, :]             # [2D, D]  bf16 (k|v fused)

    # channel-major (per-feature, broadcast over token lanes) vectors: [D, 1] f32
    eol_b1 = tok_vecs_ref[:, 0:1]
    eol_b2 = tok_vecs_ref[:, 1:2]
    lni_g = tok_vecs_ref[:, 2:3]
    lni_b = tok_vecs_ref[:, 3:4]

    # slot-side row vectors: [1, *] f32
    lns_g = vecs_ref[0:1, :D]
    lns_b = vecs_ref[1:2, :D]
    lnm_g = vecs_ref[2:3, :D]
    lnm_b = vecs_ref[3:4, :D]
    b_i = vecs_ref[4:5, :3 * D]
    b_h = vecs_ref[5:6, :3 * D]
    mb1 = vecs_ref[6:7, :MLPH]
    mb2 = vecs_ref[7:8, :D]
    mu = vecs_ref[8:9, :D]
    log_sigma = vecs_ref[9:10, :D]

    wq = wq_ref[...]      # [D, D]  (attention scale folded in at pack time)
    w_i = wi_ref[...]     # [D, 3D]
    w_h = wh_ref[...]     # [D, 3D]
    mw1 = mw1_ref[...]    # [D, MLPH]
    mw2 = mw2_ref[...]    # [MLPH, D]

    # ---- token side, one fused [D, bt*N] matmul per stage (bf16 in, f32 acc) ----
    x = x_ref[0]                                                     # bf16 [D, NT]
    h = jnp.dot(w1t, x, preferred_element_type=f32) + eol_b1
    h = jnp.where(h > 0, h, LEAKY_SLOPE * h)                         # LeakyReLU
    feats = jnp.dot(w2t, h.astype(bf16), preferred_element_type=f32) + eol_b2
    cm = jnp.mean(feats, axis=0, keepdims=True)                      # LN over channels
    cv = jnp.mean(jnp.square(feats - cm), axis=0, keepdims=True)
    inp = (feats - cm) * jax.lax.rsqrt(cv + LN_EPS) * lni_g + lni_b
    # k|v for the whole batch tile, kept in explicit VMEM scratch (f32)
    kv_ref[...] = jnp.dot(wkv_t, inp.astype(bf16), preferred_element_type=f32)

    # ---- slot side, folded over the batch tile: [bt*S, D], f32 ----
    slots = mu + jnp.exp(log_sigma) * init_ref[0]                    # [bt*S, D]

    for _ in range(num_iterations):
        slots_prev = slots
        s_n = _layer_norm(slots, lns_g, lns_b)
        q = jnp.dot(s_n, wq, preferred_element_type=f32)             # [bt*S, D]

        upd = []
        for b in range(bt):
            qb = q[b * S:(b + 1) * S, :]                             # [S, D]
            k_b = kv_ref[0:D, b * N:(b + 1) * N]                     # [D, N]
            v_b = kv_ref[D:2 * D, b * N:(b + 1) * N]                 # [D, N]
            logits = jnp.dot(qb, k_b, preferred_element_type=f32)    # [S, N]
            logits = logits - jnp.max(logits, axis=0, keepdims=True)  # softmax over slots
            p = jnp.exp(logits)
            attn = p * pl.reciprocal(jnp.sum(p, axis=0, keepdims=True), approx=True)
            attn = attn + SLOT_EPS
            attn = attn * pl.reciprocal(jnp.sum(attn, axis=1, keepdims=True),
                                        approx=True)                  # weighted mean
            upd.append(jnp.einsum("sn,dn->sd", attn, v_b,
                                  preferred_element_type=f32))        # K = N contraction
        updates = jnp.concatenate(upd, axis=0) if bt > 1 else upd[0]  # [bt*S, D]

        # fused GRUCell (2 matmuls instead of 6)
        gi = jnp.dot(updates, w_i, preferred_element_type=f32) + b_i     # [bt*S, 3D]
        gh = jnp.dot(slots_prev, w_h, preferred_element_type=f32) + b_h  # [bt*S, 3D]
        r = jax.nn.sigmoid(gi[:, 0:D] + gh[:, 0:D])
        z = jax.nn.sigmoid(gi[:, D:2 * D] + gh[:, D:2 * D])
        n = jnp.tanh(gi[:, 2 * D:3 * D] + r * gh[:, 2 * D:3 * D])
        slots = (1.0 - z) * n + z * slots_prev

        # residual MLP: LayerNorm -> Linear -> ReLU -> Linear
        mm = _layer_norm(slots, lnm_g, lnm_b)
        mm = jnp.maximum(jnp.dot(mm, mw1, preferred_element_type=f32) + mb1, 0.0)
        mm = jnp.dot(mm, mw2, preferred_element_type=f32) + mb2
        slots = slots + mm

    # ---- direct store, no epilogue relayout: [bt*S, D] rows ----
    out_ref[0] = slots.astype(out_ref.dtype)


def _pack_params(params, D, MLPH):
    """Pack the ~30 tiny parameter arrays; all fusions/transposes happen here."""
    f32 = jnp.float32
    # token-side weights: pre-transposed (W^T @ x form), k|v fused, bf16 for MXU
    w_tok = jnp.concatenate(
        [params["eol_w1"].T, params["eol_w2"].T, params["wk"].T, params["wv"].T],
        axis=0).astype(jnp.bfloat16)                                   # [4D, D]
    # slot-side weights (f32); attention scale folded into wq
    wq = (params["wq"] * (float(D) ** -0.5)).astype(f32)               # [D, D]
    w_i = jnp.concatenate([params["w_ir"], params["w_iz"], params["w_in"]],
                          axis=1).astype(f32)                          # [D, 3D]
    w_h = jnp.concatenate([params["w_hr"], params["w_hz"], params["w_hn"]],
                          axis=1).astype(f32)                          # [D, 3D]
    b_i = jnp.concatenate([params["b_ir"], params["b_iz"], params["b_in"]], axis=1)
    b_h = jnp.concatenate([params["b_hr"], params["b_hz"], params["b_hn"]], axis=1)

    vec_w = max(3 * D, MLPH, D)

    def row(v):
        v = v.reshape(-1).astype(f32)
        return jnp.pad(v, (0, vec_w - v.shape[0]))

    vecs = jnp.stack([row(params["lns_g"]), row(params["lns_b"]),
                      row(params["lnm_g"]), row(params["lnm_b"]),
                      row(b_i), row(b_h),
                      row(params["mb1"]), row(params["mb2"]),
                      row(params["mu"]), row(params["log_sigma"])], axis=0)  # [10, vec_w]
    tok_vecs = jnp.stack([params["eol_b1"].reshape(-1), params["eol_b2"].reshape(-1),
                          params["lni_g"].reshape(-1), params["lni_b"].reshape(-1)],
                         axis=1).astype(f32)                           # [D, 4]
    return w_tok, wq, w_i, w_h, vecs, tok_vecs


def _default_batch_tile(B):
    """grid >= 2 only on 2-TensorCore v7x; grid = 1 on single-TC v5e/v6e."""
    try:
        kind = jax.devices()[0].device_kind.lower()
    except Exception:
        kind = ""
    if "v7" in kind and B >= 2:
        bt = max(B // 2, 1)
        while B % bt:
            bt -= 1
        return bt
    return B


def encode(feat, slots_init, params, num_iterations, *, batch_tile=None):
    """feat: [B, C, H, W] encoder feature map (NCHW). Returns slots [B, S, D]."""
    B, C, H, W = feat.shape
    N = H * W
    S, D = slots_init.shape[1], slots_init.shape[2]
    MLPH = params["mw1"].shape[1]
    assert C == D, "in_features must equal slot_size (as in the PyTorch module)"

    bt = _default_batch_tile(B) if batch_tile is None else batch_tile
    assert B % bt == 0, "batch must be divisible by the batch tile"
    G = B // bt
    assert D % 8 == 0 and (bt * N) % 128 == 0, "tile-friendly shapes expected"

    # channel-major tokens, batch tile folded along lanes: [G, D, bt*N], bf16
    tokens = feat.reshape(B, D, N).reshape(G, bt, D, N)
    tokens = jnp.transpose(tokens, (0, 2, 1, 3)).reshape(G, D, bt * N).astype(jnp.bfloat16)
    # slot init already in the kernel's [bt*S, D] layout (no in-kernel relayout)
    init = slots_init.reshape(G, bt * S, D).astype(jnp.float32)

    w_tok, wq, w_i, w_h, vecs, tok_vecs = _pack_params(params, D, MLPH)
    mw1 = params["mw1"].astype(jnp.float32)
    mw2 = params["mw2"].astype(jnp.float32)

    kernel = functools.partial(_encode_kernel, num_iterations=num_iterations, bt=bt)
    const2 = lambda i: (0, 0)

    out = pl.pallas_call(
        kernel,
        out_shape=jax.ShapeDtypeStruct((G, bt * S, D), jnp.float32),
        grid=(G,),
        in_specs=[
            pl.BlockSpec((1, D, bt * N), lambda i: (i, 0, 0)),   # tokens (bf16, lane-fused)
            pl.BlockSpec((1, bt * S, D), lambda i: (i, 0, 0)),   # slots_init
            pl.BlockSpec(w_tok.shape, const2),                   # fused token weights (bf16)
            pl.BlockSpec(wq.shape, const2),                      # wq (scale folded)
            pl.BlockSpec(w_i.shape, const2),                     # fused GRU input weights
            pl.BlockSpec(w_h.shape, const2),                     # fused GRU hidden weights
            pl.BlockSpec(mw1.shape, const2),                     # MLP weight 1
            pl.BlockSpec(mw2.shape, const2),                     # MLP weight 2
            pl.BlockSpec(vecs.shape, const2),                    # packed slot-side vectors
            pl.BlockSpec(tok_vecs.shape, const2),                # packed channel-side vectors
        ],
        out_specs=pl.BlockSpec((1, bt * S, D), lambda i: (i, 0, 0)),
        scratch_shapes=[pltpu.VMEM((2 * D, bt * N), jnp.float32)],   # k|v buffer
        compiler_params=pltpu.CompilerParams(dimension_semantics=("parallel",)),
    )(tokens, init, w_tok, wq, w_i, w_h, mw1, mw2, vecs, tok_vecs)
    return out.reshape(B, S, D)


def init_params(key, D, mlp_hidden):
    """Deterministic synthetic parameters (PyTorch-Linear-style uniform init)."""
    keys = iter(jax.random.split(key, 64))

    def lin(fan_in, shape):
        bound = 1.0 / float(fan_in) ** 0.5
        return jax.random.uniform(next(keys), shape, jnp.float32, -bound, bound)

    p = {}
    # encoder_out_layer
    p["eol_w1"], p["eol_b1"] = lin(D, (D, D)), lin(D, (1, D))
    p["eol_w2"], p["eol_b2"] = lin(D, (D, D)), lin(D, (1, D))
    # SlotAttention layernorms / projections
    p["lni_g"], p["lni_b"] = jnp.ones((1, D), jnp.float32), jnp.zeros((1, D), jnp.float32)
    p["wk"], p["wv"], p["wq"] = lin(D, (D, D)), lin(D, (D, D)), lin(D, (D, D))
    p["lns_g"], p["lns_b"] = jnp.ones((1, D), jnp.float32), jnp.zeros((1, D), jnp.float32)
    # GRUCell (weights stored as [in, out] so x @ W)
    for g in ("r", "z", "n"):
        p[f"w_i{g}"] = lin(D, (D, D))
        p[f"w_h{g}"] = lin(D, (D, D))
        p[f"b_i{g}"] = lin(D, (1, D))
        p[f"b_h{g}"] = lin(D, (1, D))
    # MLP
    p["lnm_g"], p["lnm_b"] = jnp.ones((1, D), jnp.float32), jnp.zeros((1, D), jnp.float32)
    p["mw1"], p["mb1"] = lin(D, (D, mlp_hidden)), lin(D, (1, mlp_hidden))
    p["mw2"], p["mb2"] = lin(mlp_hidden, (mlp_hidden, D)), lin(mlp_hidden, (1, D))
    # slots_mu / slots_log_sigma (xavier-uniform on (1,1,D) -> stored as (1,D))
    bound = (6.0 / (1.0 + D)) ** 0.5
    p["mu"] = jax.random.uniform(next(keys), (1, D), jnp.float32, -bound, bound)
    p["log_sigma"] = jax.random.uniform(next(keys), (1, D), jnp.float32, -bound, bound)
    return p


def reference_encode(feat, slots_init, p, num_iterations):
    """Pure-JAX reference mirroring the PyTorch forward semantics (all f32)."""
    B, C, H, W = feat.shape
    x = jnp.transpose(feat.reshape(B, C, H * W), (0, 2, 1))
    h = x @ p["eol_w1"] + p["eol_b1"]
    h = jnp.where(h > 0, h, LEAKY_SLOPE * h)
    feats = h @ p["eol_w2"] + p["eol_b2"]

    inp = _layer_norm(feats, p["lni_g"], p["lni_b"])
    k, v = inp @ p["wk"], inp @ p["wv"]
    slots = p["mu"] + jnp.exp(p["log_sigma"]) * slots_init
    scale = slots.shape[-1] ** -0.5
    for _ in range(num_iterations):
        slots_prev = slots
        q = _layer_norm(slots, p["lns_g"], p["lns_b"]) @ p["wq"]
        logits = scale * jnp.einsum("bnd,bsd->bns", k, q)
        attn = jax.nn.softmax(logits, axis=-1) + SLOT_EPS
        attn = attn / jnp.sum(attn, axis=1, keepdims=True)
        updates = jnp.einsum("bns,bnd->bsd", attn, v)
        r = jax.nn.sigmoid(updates @ p["w_ir"] + p["b_ir"] + slots_prev @ p["w_hr"] + p["b_hr"])
        z = jax.nn.sigmoid(updates @ p["w_iz"] + p["b_iz"] + slots_prev @ p["w_hz"] + p["b_hz"])
        n = jnp.tanh(updates @ p["w_in"] + p["b_in"] + r * (slots_prev @ p["w_hn"] + p["b_hn"]))
        slots = (1.0 - z) * n + z * slots_prev
        m = _layer_norm(slots, p["lnm_g"], p["lnm_b"])
        m = jnp.maximum(m @ p["mw1"] + p["mb1"], 0.0) @ p["mw2"] + p["mb2"]
        slots = slots + m
    return slots


if __name__ == "__main__":
    # Small shapes: out_features == slot_size == 32, 4 slots, 16x16 feature map.
    B, H, W = 4, 16, 16
    D = 32                 # hidden_dims[-1] == slot_size
    S = 4                  # num_slots
    MLP_HIDDEN = 128       # hardcoded in SlotAttention construction
    NUM_ITERATIONS = 3

    key = jax.random.PRNGKey(0)
    k_feat, k_init, k_par = jax.random.split(key, 3)

    # Encoder feature map (stands in for self.encoder(inputs)), NCHW layout.
    feat = (0.5 * jax.random.normal(k_feat, (B, D, H, W))).astype(jnp.float32)
    # Deterministic replacement for torch.randn slots_init inside forward.
    slots_init = jax.random.normal(k_init, (B, S, D)).astype(jnp.float32)

    params = init_params(k_par, D, MLP_HIDDEN)
    ref = reference_encode(feat, slots_init, params, NUM_ITERATIONS)

    # Device-default batch tile (grid>=2 on v7x, grid=1 on v5e/v6e).
    slots = jax.block_until_ready(encode(feat, slots_init, params, NUM_ITERATIONS))
    assert slots.shape == (B, S, D)
    assert bool(jnp.isfinite(slots).all())
    err = float(jnp.max(jnp.abs(slots - ref)))
    assert err < 5e-2, f"mismatch (default bt) vs reference: {err}"

    # One-batch-per-step path (grid = B) must also match.
    slots1 = jax.block_until_ready(
        encode(feat, slots_init, params, NUM_ITERATIONS, batch_tile=1))
    err1 = float(jnp.max(jnp.abs(slots1 - ref)))
    assert err1 < 5e-2, f"mismatch (bt=1) vs reference: {err1}"

    # Fully-folded path (grid = 1, the single-TensorCore default) must also match.
    slotsB = jax.block_until_ready(
        encode(feat, slots_init, params, NUM_ITERATIONS, batch_tile=B))
    errB = float(jnp.max(jnp.abs(slotsB - ref)))
    assert errB < 5e-2, f"mismatch (bt=B) vs reference: {errB}"

    print("KERNEL_OK")
</pallas_src>

<mosaic_0001>
module attributes {stable_mosaic.version = 11 : i64} {
  func.func @_encode_kernel(%arg0: i32, %arg1: memref<1x32x1024xbf16, #tpu.memory_space<vmem>>, %arg2: memref<1x16x32xf32, #tpu.memory_space<vmem>>, %arg3: memref<128x32xbf16, #tpu.memory_space<vmem>>, %arg4: memref<32x32xf32, #tpu.memory_space<vmem>>, %arg5: memref<32x96xf32, #tpu.memory_space<vmem>>, %arg6: memref<32x96xf32, #tpu.memory_space<vmem>>, %arg7: memref<32x128xf32, #tpu.memory_space<vmem>>, %arg8: memref<128x32xf32, #tpu.memory_space<vmem>>, %arg9: memref<10x128xf32, #tpu.memory_space<vmem>>, %arg10: memref<32x4xf32, #tpu.memory_space<vmem>>, %arg11: memref<1x16x32xf32, #tpu.memory_space<vmem>>, %arg12: memref<64x1024xf32, #tpu.memory_space<vmem>>) attributes {dimension_semantics = [#tpu.dimension_semantics<parallel>], iteration_bounds = array<i64: 1>, scalar_prefetch = 0 : i64, scratch_operands = 1 : i64, tpu.core_type = #tpu.core_type<tc>, window_params = [{transform_indices = @transform_0, window_bounds = array<i64: 1, 32, 1024>}, {transform_indices = @transform_1, window_bounds = array<i64: 1, 16, 32>}, {pipeline_mode = #tpu.pipeline_mode<synchronous>, transform_indices = @transform_2, window_bounds = array<i64: 128, 32>}, {pipeline_mode = #tpu.pipeline_mode<synchronous>, transform_indices = @transform_3, window_bounds = array<i64: 32, 32>}, {pipeline_mode = #tpu.pipeline_mode<synchronous>, transform_indices = @transform_4, window_bounds = array<i64: 32, 96>}, {pipeline_mode = #tpu.pipeline_mode<synchronous>, transform_indices = @transform_5, window_bounds = array<i64: 32, 96>}, {pipeline_mode = #tpu.pipeline_mode<synchronous>, transform_indices = @transform_6, window_bounds = array<i64: 32, 128>}, {pipeline_mode = #tpu.pipeline_mode<synchronous>, transform_indices = @transform_7, window_bounds = array<i64: 128, 32>}, {pipeline_mode = #tpu.pipeline_mode<synchronous>, transform_indices = @transform_8, window_bounds = array<i64: 10, 128>}, {pipeline_mode = #tpu.pipeline_mode<synchronous>, transform_indices = @transform_9, window_bounds = array<i64: 32, 4>}, {transform_indices = @transform_10, window_bounds = array<i64: 1, 16, 32>}]} {
    %c0 = arith.constant 0 : index
    %c0_0 = arith.constant 0 : index
    %0 = vector.load %arg3[%c0, %c0_0] : memref<128x32xbf16, #tpu.memory_space<vmem>>, vector<32x32xbf16>
    %c32 = arith.constant 32 : index
    %c0_1 = arith.constant 0 : index
    %1 = vector.load %arg3[%c32, %c0_1] : memref<128x32xbf16, #tpu.memory_space<vmem>>, vector<32x32xbf16>
    %c64 = arith.constant 64 : index
    %c0_2 = arith.constant 0 : index
    %2 = vector.load %arg3[%c64, %c0_2] : memref<128x32xbf16, #tpu.memory_space<vmem>>, vector<64x32xbf16>
    %c0_3 = arith.constant 0 : index
    %c0_4 = arith.constant 0 : index
    %3 = vector.load %arg10[%c0_3, %c0_4] : memref<32x4xf32, #tpu.memory_space<vmem>>, vector<32x1xf32>
    %c0_5 = arith.constant 0 : index
    %c1 = arith.constant 1 : index
    %4 = vector.load %arg10[%c0_5, %c1] : memref<32x4xf32, #tpu.memory_space<vmem>>, vector<32x1xf32>
    %c0_6 = arith.constant 0 : index
    %c2 = arith.constant 2 : index
    %5 = vector.load %arg10[%c0_6, %c2] : memref<32x4xf32, #tpu.memory_space<vmem>>, vector<32x1xf32>
    %c0_7 = arith.constant 0 : index
    %c3 = arith.constant 3 : index
    %6 = vector.load %arg10[%c0_7, %c3] : memref<32x4xf32, #tpu.memory_space<vmem>>, vector<32x1xf32>
    %c0_8 = arith.constant 0 : index
    %c0_9 = arith.constant 0 : index
    %7 = vector.load %arg9[%c0_8, %c0_9] : memref<10x128xf32, #tpu.memory_space<vmem>>, vector<1x32xf32>
    %c1_10 = arith.constant 1 : index
    %c0_11 = arith.constant 0 : index
    %8 = vector.load %arg9[%c1_10, %c0_11] : memref<10x128xf32, #tpu.memory_space<vmem>>, vector<1x32xf32>
    %c2_12 = arith.constant 2 : index
    %c0_13 = arith.constant 0 : index
    %9 = vector.load %arg9[%c2_12, %c0_13] : memref<10x128xf32, #tpu.memory_space<vmem>>, vector<1x32xf32>
    %c3_14 = arith.constant 3 : index
    %c0_15 = arith.constant 0 : index
    %10 = vector.load %arg9[%c3_14, %c0_15] : memref<10x128xf32, #tpu.memory_space<vmem>>, vector<1x32xf32>
    %c4 = arith.constant 4 : index
    %c0_16 = arith.constant 0 : index
    %11 = vector.load %arg9[%c4, %c0_16] : memref<10x128xf32, #tpu.memory_space<vmem>>, vector<1x96xf32>
    %c5 = arith.constant 5 : index
    %c0_17 = arith.constant 0 : index
    %12 = vector.load %arg9[%c5, %c0_17] : memref<10x128xf32, #tpu.memory_space<vmem>>, vector<1x96xf32>
    %c6 = arith.constant 6 : index
    %c0_18 = arith.constant 0 : index
    %13 = vector.load %arg9[%c6, %c0_18] : memref<10x128xf32, #tpu.memory_space<vmem>>, vector<1x128xf32>
    %c7 = arith.constant 7 : index
    %c0_19 = arith.constant 0 : index
    %14 = vector.load %arg9[%c7, %c0_19] : memref<10x128xf32, #tpu.memory_space<vmem>>, vector<1x32xf32>
    %c8 = arith.constant 8 : index
    %c0_20 = arith.constant 0 : index
    %15 = vector.load %arg9[%c8, %c0_20] : memref<10x128xf32, #tpu.memory_space<vmem>>, vector<1x32xf32>
    %c9 = arith.constant 9 : index
    %c0_21 = arith.constant 0 : index
    %16 = vector.load %arg9[%c9, %c0_21] : memref<10x128xf32, #tpu.memory_space<vmem>>, vector<1x32xf32>
    %c0_22 = arith.constant 0 : index
    %c0_23 = arith.constant 0 : index
    %17 = vector.load %arg4[%c0_22, %c0_23] : memref<32x32xf32, #tpu.memory_space<vmem>>, vector<32x32xf32>
    %c0_24 = arith.constant 0 : index
    %c0_25 = arith.constant 0 : index
    %18 = vector.load %arg5[%c0_24, %c0_25] : memref<32x96xf32, #tpu.memory_space<vmem>>, vector<32x96xf32>
    %c0_26 = arith.constant 0 : index
    %c0_27 = arith.constant 0 : index
    %19 = vector.load %arg6[%c0_26, %c0_27] : memref<32x96xf32, #tpu.memory_space<vmem>>, vector<32x96xf32>
    %c0_28 = arith.constant 0 : index
    %c0_29 = arith.constant 0 : index
    %20 = vector.load %arg7[%c0_28, %c0_29] : memref<32x128xf32, #tpu.memory_space<vmem>>, vector<32x128xf32>
    %c0_30 = arith.constant 0 : index
    %c0_31 = arith.constant 0 : index
    %21 = vector.load %arg8[%c0_30, %c0_31] : memref<128x32xf32, #tpu.memory_space<vmem>>, vector<128x32xf32>
    %c0_32 = arith.constant 0 : index
    %c0_33 = arith.constant 0 : index
    %c0_34 = arith.constant 0 : index
    %22 = vector.load %arg1[%c0_32, %c0_33, %c0_34] : memref<1x32x1024xbf16, #tpu.memory_space<vmem>>, vector<1x32x1024xbf16>
    %23 = vector.shape_cast %22 : vector<1x32x1024xbf16> to vector<32x1024xbf16>
    %cst = arith.constant dense<0.000000e+00> : vector<32x1024xf32>
    %24 = tpu.matmul %0, %23, %cst {dimension_numbers = #tpu.dot_dimension_numbers<[1], [0], [0], [1], [0, 0, 1, 1], [], []>} : vector<32x32xbf16>, vector<32x1024xbf16>, vector<32x1024xf32> -> vector<32x1024xf32>
    %25 = vector.broadcast %3 : vector<32x1xf32> to vector<32x1024xf32>
    %26 = arith.addf %24, %25 : vector<32x1024xf32>
    %cst_35 = arith.constant 0.000000e+00 : f32
    %27 = vector.broadcast %cst_35 : f32 to vector<32x1024xf32>
    %28 = arith.cmpf ogt, %26, %27 : vector<32x1024xf32>
    %cst_36 = arith.constant 0.00999999977 : f32
    %29 = vector.broadcast %cst_36 : f32 to vector<32x1024xf32>
    %30 = arith.mulf %29, %26 : vector<32x1024xf32>
    %31 = arith.select %28, %26, %30 : vector<32x1024xi1>, vector<32x1024xf32>
    %32 = arith.truncf %31 : vector<32x1024xf32> to vector<32x1024xbf16>
    %cst_37 = arith.constant dense<0.000000e+00> : vector<32x1024xf32>
    %33 = tpu.matmul %1, %32, %cst_37 {dimension_numbers = #tpu.dot_dimension_numbers<[1], [0], [0], [1], [0, 0, 1, 1], [], []>} : vector<32x32xbf16>, vector<32x1024xbf16>, vector<32x1024xf32> -> vector<32x1024xf32>
    %34 = vector.broadcast %4 : vector<32x1xf32> to vector<32x1024xf32>
    %35 = arith.addf %33, %34 : vector<32x1024xf32>
    %cst_38 = arith.constant dense<0.000000e+00> : vector<1024xf32>
    %36 = vector.multi_reduction <add>, %35, %cst_38 [0] : vector<32x1024xf32> to vector<1024xf32>
    %37 = vector.shape_cast %36 : vector<1024xf32> to vector<1x1024xf32>
    %cst_39 = arith.constant 3.200000e+01 : f32
    %38 = vector.broadcast %cst_39 : f32 to vector<1x1024xf32>
    %39 = arith.divf %37, %38 : vector<1x1024xf32>
    %40 = vector.broadcast %39 : vector<1x1024xf32> to vector<32x1024xf32>
    %41 = arith.subf %35, %40 : vector<32x1024xf32>
    %42 = arith.mulf %41, %41 : vector<32x1024xf32>
    %cst_40 = arith.constant dense<0.000000e+00> : vector<1024xf32>
    %43 = vector.multi_reduction <add>, %42, %cst_40 [0] : vector<32x1024xf32> to vector<1024xf32>
    %44 = vector.shape_cast %43 : vector<1024xf32> to vector<1x1024xf32>
    %cst_41 = arith.constant 3.200000e+01 : f32
    %45 = vector.broadcast %cst_41 : f32 to vector<1x1024xf32>
    %46 = arith.divf %44, %45 : vector<1x1024xf32>
    %47 = vector.broadcast %39 : vector<1x1024xf32> to vector<32x1024xf32>
    %48 = arith.subf %35, %47 : vector<32x1024xf32>
    %cst_42 = arith.constant 9.99999974E-6 : f32
    %49 = vector.broadcast %cst_42 : f32 to vector<1x1024xf32>
    %50 = arith.addf %46, %49 : vector<1x1024xf32>
    %51 = math.rsqrt %50 : vector<1x1024xf32>
    %52 = vector.broadcast %51 : vector<1x1024xf32> to vector<32x1024xf32>
    %53 = arith.mulf %48, %52 : vector<32x1024xf32>
    %54 = vector.broadcast %5 : vector<32x1xf32> to vector<32x1024xf32>
    %55 = arith.mulf %53, %54 : vector<32x1024xf32>
    %56 = vector.broadcast %6 : vector<32x1xf32> to vector<32x1024xf32>
    %57 = arith.addf %55, %56 : vector<32x1024xf32>
    %58 = arith.truncf %57 : vector<32x1024xf32> to vector<32x1024xbf16>
    %cst_43 = arith.constant dense<0.000000e+00> : vector<64x1024xf32>
    %59 = tpu.matmul %2, %58, %cst_43 {dimension_numbers = #tpu.dot_dimension_numbers<[1], [0], [0], [1], [0, 0, 1, 1], [], []>} : vector<64x32xbf16>, vector<32x1024xbf16>, vector<64x1024xf32> -> vector<64x1024xf32>
    %c0_44 = arith.constant 0 : index
    %c0_45 = arith.constant 0 : index
    %60 = vector.load %arg12[%c0_44, %c0_45] : memref<64x1024xf32, #tpu.memory_space<vmem>>, vector<64x1024xf32>
    tpu.vector_store %arg12[%c0_44, %c0_45], %59 {strides = array<i32>} : memref<64x1024xf32, #tpu.memory_space<vmem>>, vector<64x1024xf32>,
    %61 = math.exp %16 : vector<1x32xf32>
    %c0_46 = arith.constant 0 : index
    %c0_47 = arith.constant 0 : index
    %c0_48 = arith.constant 0 : index
    %62 = vector.load %arg2[%c0_46, %c0_47, %c0_48] : memref<1x16x32xf32, #tpu.memory_space<vmem>>, vector<1x16x32xf32>
    %63 = vector.shape_cast %62 : vector<1x16x32xf32> to vector<16x32xf32>
    %64 = vector.broadcast %61 : vector<1x32xf32> to vector<16x32xf32>
    %65 = arith.mulf %64, %63 : vector<16x32xf32>
    %66 = vector.broadcast %15 : vector<1x32xf32> to vector<16x32xf32>
    %67 = arith.addf %66, %65 : vector<16x32xf32>
    %cst_49 = arith.constant dense<0.000000e+00> : vector<16xf32>
    %68 = vector.multi_reduction <add>, %67, %cst_49 [1] : vector<16x32xf32> to vector<16xf32>
    %69 = vector.shape_cast %68 : vector<16xf32> to vector<16x1xf32>
    %cst_50 = arith.constant 3.200000e+01 : f32
    %70 = vector.broadcast %cst_50 : f32 to vector<16x1xf32>
    %71 = arith.divf %69, %70 : vector<16x1xf32>
    %72 = vector.broadcast %71 : vector<16x1xf32> to vector<16x32xf32>
    %73 = arith.subf %67, %72 : vector<16x32xf32>
    %74 = arith.mulf %73, %73 : vector<16x32xf32>
    %cst_51 = arith.constant dense<0.000000e+00> : vector<16xf32>
    %75 = vector.multi_reduction <add>, %74, %cst_51 [1] : vector<16x32xf32> to vector<16xf32>
    %76 = vector.shape_cast %75 : vector<16xf32> to vector<16x1xf32>
    %cst_52 = arith.constant 3.200000e+01 : f32
    %77 = vector.broadcast %cst_52 : f32 to vector<16x1xf32>
    %78 = arith.divf %76, %77 : vector<16x1xf32>
    %79 = vector.broadcast %71 : vector<16x1xf32> to vector<16x32xf32>
    %80 = arith.subf %67, %79 : vector<16x32xf32>
    %cst_53 = arith.constant 9.99999974E-6 : f32
    %81 = vector.broadcast %cst_53 : f32 to vector<16x1xf32>
    %82 = arith.addf %78, %81 : vector<16x1xf32>
    %83 = math.rsqrt %82 : vector<16x1xf32>
    %84 = vector.broadcast %83 : vector<16x1xf32> to vector<16x32xf32>
    %85 = arith.mulf %80, %84 : vector<16x32xf32>
    %86 = vector.broadcast %7 : vector<1x32xf32> to vector<16x32xf32>
    %87 = arith.mulf %85, %86 : vector<16x32xf32>
    %88 = vector.broadcast %8 : vector<1x32xf32> to vector<16x32xf32>
    %89 = arith.addf %87, %88 : vector<16x32xf32>
    %cst_54 = arith.constant dense<0.000000e+00> : vector<16x32xf32>
    %90 = tpu.matmul %89, %17, %cst_54 {dimension_numbers = #tpu.dot_dimension_numbers<[1], [0], [0], [1], [0, 0, 1, 1], [], []>} : vector<16x32xf32>, vector<32x32xf32>, vector<16x32xf32> -> vector<16x32xf32>
    %91 = vector.extract_strided_slice %90 {offsets = [0, 0], sizes = [4, 32], strides = [1, 1]} : vector<16x32xf32> to vector<4x32xf32>
    %c0_55 = arith.constant 0 : index
    %c0_56 = arith.constant 0 : index
    %92 = vector.load %arg12[%c0_55, %c0_56] : memref<64x1024xf32, #tpu.memory_space<vmem>>, vector<32x256xf32>
    %c32_57 = arith.constant 32 : index
    %c0_58 = arith.constant 0 : index
    %93 = vector.load %arg12[%c32_57, %c0_58] : memref<64x1024xf32, #tpu.memory_space<vmem>>, vector<32x256xf32>
    %cst_59 = arith.constant dense<0.000000e+00> : vector<4x256xf32>
    %94 = tpu.matmul %91, %92, %cst_59 {dimension_numbers = #tpu.dot_dimension_numbers<[1], [0], [0], [1], [0, 0, 1, 1], [], []>} : vector<4x32xf32>, vector<32x256xf32>, vector<4x256xf32> -> vector<4x256xf32>
    %cst_60 = arith.constant dense<0xFF800000> : vector<256xf32>
    %95 = vector.multi_reduction <maximumf>, %94, %cst_60 [0] : vector<4x256xf32> to vector<256xf32>
    %96 = vector.shape_cast %95 : vector<256xf32> to vector<1x256xf32>
    %97 = vector.broadcast %96 : vector<1x256xf32> to vector<4x256xf32>
    %98 = arith.subf %94, %97 : vector<4x256xf32>
    %99 = math.exp %98 : vector<4x256xf32>
    %cst_61 = arith.constant dense<0.000000e+00> : vector<256xf32>
    %100 = vector.multi_reduction <add>, %99, %cst_61 [0] : vector<4x256xf32> to vector<256xf32>
    %101 = vector.shape_cast %100 : vector<256xf32> to vector<1x256xf32>
    %102 = tpu.reciprocal %101 {approx = true} : vector<1x256xf32> -> vector<1x256xf32>
    %103 = vector.broadcast %102 : vector<1x256xf32> to vector<4x256xf32>
    %104 = arith.mulf %99, %103 : vector<4x256xf32>
    %cst_62 = arith.constant 9.99999993E-9 : f32
    %105 = vector.broadcast %cst_62 : f32 to vector<4x256xf32>
    %106 = arith.addf %104, %105 : vector<4x256xf32>
    %cst_63 = arith.constant dense<0.000000e+00> : vector<4xf32>
    %107 = vector.multi_reduction <add>, %106, %cst_63 [1] : vector<4x256xf32> to vector<4xf32>
    %108 = vector.shape_cast %107 : vector<4xf32> to vector<4x1xf32>
    %109 = tpu.reciprocal %108 {approx = true} : vector<4x1xf32> -> vector<4x1xf32>
    %110 = vector.broadcast %109 : vector<4x1xf32> to vector<4x256xf32>
    %111 = arith.mulf %106, %110 : vector<4x256xf32>
    "tpu.trace_start"() <{level = 10 : i32, message = "sn,dn->sd"}> : () -> ()
    %cst_64 = arith.constant dense<0.000000e+00> : vector<4x32xf32>
    %112 = tpu.matmul %111, %93, %cst_64 {dimension_numbers = #tpu.dot_dimension_numbers<[1], [1], [0], [0], [0, 0, 1, 0], [], []>} : vector<4x256xf32>, vector<32x256xf32>, vector<4x32xf32> -> vector<4x32xf32>
    "tpu.trace_stop"() : () -> ()
    %113 = vector.extract_strided_slice %90 {offsets = [4, 0], sizes = [4, 32], strides = [1, 1]} : vector<16x32xf32> to vector<4x32xf32>
    %c0_65 = arith.constant 0 : index
    %c256 = arith.constant 256 : index
    %114 = vector.load %arg12[%c0_65, %c256] : memref<64x1024xf32, #tpu.memory_space<vmem>>, vector<32x256xf32>
    %c32_66 = arith.constant 32 : index
    %c256_67 = arith.constant 256 : index
    %115 = vector.load %arg12[%c32_66, %c256_67] : memref<64x1024xf32, #tpu.memory_space<vmem>>, vector<32x256xf32>
    %cst_68 = arith.constant dense<0.000000e+00> : vector<4x256xf32>
    %116 = tpu.matmul %113, %114, %cst_68 {dimension_numbers = #tpu.dot_dimension_numbers<[1], [0], [0], [1], [0, 0, 1, 1], [], []>} : vector<4x32xf32>, vector<32x256xf32>, vector<4x256xf32> -> vector<4x256xf32>
    %cst_69 = arith.constant dense<0xFF800000> : vector<256xf32>
    %117 = vector.multi_reduction <maximumf>, %116, %cst_69 [0] : vector<4x256xf32> to vector<256xf32>
    %118 = vector.shape_cast %117 : vector<256xf32> to vector<1x256xf32>
    %119 = vector.broadcast %118 : vector<1x256xf32> to vector<4x256xf32>
    %120 = arith.subf %116, %119 : vector<4x256xf32>
    %121 = math.exp %120 : vector<4x256xf32>
    %cst_70 = arith.constant dense<0.000000e+00> : vector<256xf32>
    %122 = vector.multi_reduction <add>, %121, %cst_70 [0] : vector<4x256xf32> to vector<256xf32>
    %123 = vector.shape_cast %122 : vector<256xf32> to vector<1x256xf32>
    %124 = tpu.reciprocal %123 {approx = true} : vector<1x256xf32> -> vector<1x256xf32>
    %125 = vector.broadcast %124 : vector<1x256xf32> to vector<4x256xf32>
    %126 = arith.mulf %121, %125 : vector<4x256xf32>
    %cst_71 = arith.constant 9.99999993E-9 : f32
    %127 = vector.broadcast %cst_71 : f32 to vector<4x256xf32>
    %128 = arith.addf %126, %127 : vector<4x256xf32>
    %cst_72 = arith.constant dense<0.000000e+00> : vector<4xf32>
    %129 = vector.multi_reduction <add>, %128, %cst_72 [1] : vector<4x256xf32> to vector<4xf32>
    %130 = vector.shape_cast %129 : vector<4xf32> to vector<4x1xf32>
    %131 = tpu.reciprocal %130 {approx = true} : vector<4x1xf32> -> vector<4x1xf32>
    %132 = vector.broadcast %131 : vector<4x1xf32> to vector<4x256xf32>
    %133 = arith.mulf %128, %132 : vector<4x256xf32>
    "tpu.trace_start"() <{level = 10 : i32, message = "sn,dn->sd"}> : () -> ()
    %cst_73 = arith.constant dense<0.000000e+00> : vector<4x32xf32>
    %134 = tpu.matmul %133, %115, %cst_73 {dimension_numbers = #tpu.dot_dimension_numbers<[1], [1], [0], [0], [0, 0, 1, 0], [], []>} : vector<4x256xf32>, vector<32x256xf32>, vector<4x32xf32> -> vector<4x32xf32>
    "tpu.trace_stop"() : () -> ()
    %135 = vector.extract_strided_slice %90 {offsets = [8, 0], sizes = [4, 32], strides = [1, 1]} : vector<16x32xf32> to vector<4x32xf32>
    %c0_74 = arith.constant 0 : index
    %c512 = arith.constant 512 : index
    %136 = vector.load %arg12[%c0_74, %c512] : memref<64x1024xf32, #tpu.memory_space<vmem>>, vector<32x256xf32>
    %c32_75 = arith.constant 32 : index
    %c512_76 = arith.constant 512 : index
    %137 = vector.load %arg12[%c32_75, %c512_76] : memref<64x1024xf32, #tpu.memory_space<vmem>>, vector<32x256xf32>
    %cst_77 = arith.constant dense<0.000000e+00> : vector<4x256xf32>
    %138 = tpu.matmul %135, %136, %cst_77 {dimension_numbers = #tpu.dot_dimension_numbers<[1], [0], [0], [1], [0, 0, 1, 1], [], []>} : vector<4x32xf32>, vector<32x256xf32>, vector<4x256xf32> -> vector<4x256xf32>
    %cst_78 = arith.constant dense<0xFF800000> : vector<256xf32>
    %139 = vector.multi_reduction <maximumf>, %138, %cst_78 [0] : vector<4x256xf32> to vector<256xf32>
    %140 = vector.shape_cast %139 : vector<256xf32> to vector<1x256xf32>
    %141 = vector.broadcast %140 : vector<1x256xf32> to vector<4x256xf32>
    %142 = arith.subf %138, %141 : vector<4x256xf32>
    %143 = math.exp %142 : vector<4x256xf32>
    %cst_79 = arith.constant dense<0.000000e+00> : vector<256xf32>
    %144 = vector.multi_reduction <add>, %143, %cst_79 [0] : vector<4x256xf32> to vector<256xf32>
    %145 = vector.shape_cast %144 : vector<256xf32> to vector<1x256xf32>
    %146 = tpu.reciprocal %145 {approx = true} : vector<1x256xf32> -> vector<1x256xf32>
    %147 = vector.broadcast %146 : vector<1x256xf32> to vector<4x256xf32>
    %148 = arith.mulf %143, %147 : vector<4x256xf32>
    %cst_80 = arith.constant 9.99999993E-9 : f32
    %149 = vector.broadcast %cst_80 : f32 to vector<4x256xf32>
    %150 = arith.addf %148, %149 : vector<4x256xf32>
    %cst_81 = arith.constant dense<0.000000e+00> : vector<4xf32>
    %151 = vector.multi_reduction <add>, %150, %cst_81 [1] : vector<4x256xf32> to vector<4xf32>
    %152 = vector.shape_cast %151 : vector<4xf32> to vector<4x1xf32>
    %153 = tpu.reciprocal %152 {approx = true} : vector<4x1xf32> -> vector<4x1xf32>
    %154 = vector.broadcast %153 : vector<4x1xf32> to vector<4x256xf32>
    %155 = arith.mulf %150, %154 : vector<4x256xf32>
    "tpu.trace_start"() <{level = 10 : i32, message = "sn,dn->sd"}> : () -> ()
    %cst_82 = arith.constant dense<0.000000e+00> : vector<4x32xf32>
    %156 = tpu.matmul %155, %137, %cst_82 {dimension_numbers = #tpu.dot_dimension_numbers<[1], [1], [0], [0], [0, 0, 1, 0], [], []>} : vector<4x256xf32>, vector<32x256xf32>, vector<4x32xf32> -> vector<4x32xf32>
    "tpu.trace_stop"() : () -> ()
    %157 = vector.extract_strided_slice %90 {offsets = [12, 0], sizes = [4, 32], strides = [1, 1]} : vector<16x32xf32> to vector<4x32xf32>
    %c0_83 = arith.constant 0 : index
    %c768 = arith.constant 768 : index
    %158 = vector.load %arg12[%c0_83, %c768] : memref<64x1024xf32, #tpu.memory_space<vmem>>, vector<32x256xf32>
    %c32_84 = arith.constant 32 : index
    %c768_85 = arith.constant 768 : index
    %159 = vector.load %arg12[%c32_84, %c768_85] : memref<64x1024xf32, #tpu.memory_space<vmem>>, vector<32x256xf32>
    %cst_86 = arith.constant dense<0.000000e+00> : vector<4x256xf32>
    %160 = tpu.matmul %157, %158, %cst_86 {dimension_numbers = #tpu.dot_dimension_numbers<[1], [0], [0], [1], [0, 0, 1, 1], [], []>} : vector<4x32xf32>, vector<32x256xf32>, vector<4x256xf32> -> vector<4x256xf32>
    %cst_87 = arith.constant dense<0xFF800000> : vector<256xf32>
    %161 = vector.multi_reduction <maximumf>, %160, %cst_87 [0] : vector<4x256xf32> to vector<256xf32>
    %162 = vector.shape_cast %161 : vector<256xf32> to vector<1x256xf32>
    %163 = vector.broadcast %162 : vector<1x256xf32> to vector<4x256xf32>
    %164 = arith.subf %160, %163 : vector<4x256xf32>
    %165 = math.exp %164 : vector<4x256xf32>
    %cst_88 = arith.constant dense<0.000000e+00> : vector<256xf32>
    %166 = vector.multi_reduction <add>, %165, %cst_88 [0] : vector<4x256xf32> to vector<256xf32>
    %167 = vector.shape_cast %166 : vector<256xf32> to vector<1x256xf32>
    %168 = tpu.reciprocal %167 {approx = true} : vector<1x256xf32> -> vector<1x256xf32>
    %169 = vector.broadcast %168 : vector<1x256xf32> to vector<4x256xf32>
    %170 = arith.mulf %165, %169 : vector<4x256xf32>
    %cst_89 = arith.constant 9.99999993E-9 : f32
    %171 = vector.broadcast %cst_89 : f32 to vector<4x256xf32>
    %172 = arith.addf %170, %171 : vector<4x256xf32>
    %cst_90 = arith.constant dense<0.000000e+00> : vector<4xf32>
    %173 = vector.multi_reduction <add>, %172, %cst_90 [1] : vector<4x256xf32> to vector<4xf32>
    %174 = vector.shape_cast %173 : vector<4xf32> to vector<4x1xf32>
    %175 = tpu.reciprocal %174 {approx = true} : vector<4x1xf32> -> vector<4x1xf32>
    %176 = vector.broadcast %175 : vector<4x1xf32> to vector<4x256xf32>
    %177 = arith.mulf %172, %176 : vector<4x256xf32>
    "tpu.trace_start"() <{level = 10 : i32, message = "sn,dn->sd"}> : () -> ()
    %cst_91 = arith.constant dense<0.000000e+00> : vector<4x32xf32>
    %178 = tpu.matmul %177, %159, %cst_91 {dimension_numbers = #tpu.dot_dimension_numbers<[1], [1], [0], [0], [0, 0, 1, 0], [], []>} : vector<4x256xf32>, vector<32x256xf32>, vector<4x32xf32> -> vector<4x32xf32>
    "tpu.trace_stop"() : () -> ()
    %179 = tpu.concatenate %112, %134, %156, %178 in 0 : vector<4x32xf32>, vector<4x32xf32>, vector<4x32xf32>, vector<4x32xf32> -> vector<16x32xf32>
    %cst_92 = arith.constant dense<0.000000e+00> : vector<16x96xf32>
    %180 = tpu.matmul %179, %18, %cst_92 {dimension_numbers = #tpu.dot_dimension_numbers<[1], [0], [0], [1], [0, 0, 1, 1], [], []>} : vector<16x32xf32>, vector<32x96xf32>, vector<16x96xf32> -> vector<16x96xf32>
    %181 = vector.broadcast %11 : vector<1x96xf32> to vector<16x96xf32>
    %182 = arith.addf %180, %181 : vector<16x96xf32>
    %cst_93 = arith.constant dense<0.000000e+00> : vector<16x96xf32>
    %183 = tpu.matmul %67, %19, %cst_93 {dimension_numbers = #tpu.dot_dimension_numbers<[1], [0], [0], [1], [0, 0, 1, 1], [], []>} : vector<16x32xf32>, vector<32x96xf32>, vector<16x96xf32> -> vector<16x96xf32>
    %184 = vector.broadcast %12 : vector<1x96xf32> to vector<16x96xf32>
    %185 = arith.addf %183, %184 : vector<16x96xf32>
    %186 = vector.extract_strided_slice %182 {offsets = [0, 0], sizes = [16, 32], strides = [1, 1]} : vector<16x96xf32> to vector<16x32xf32>
    %187 = vector.extract_strided_slice %185 {offsets = [0, 0], sizes = [16, 32], strides = [1, 1]} : vector<16x96xf32> to vector<16x32xf32>
    %188 = arith.addf %186, %187 : vector<16x32xf32>
    %189 = arith.negf %188 : vector<16x32xf32>
    %190 = math.exp %189 : vector<16x32xf32>
    %cst_94 = arith.constant 1.000000e+00 : f32
    %191 = vector.broadcast %cst_94 : f32 to vector<16x32xf32>
    %192 = arith.addf %191, %190 : vector<16x32xf32>
    %193 = arith.divf %191, %192 : vector<16x32xf32>
    %194 = vector.extract_strided_slice %182 {offsets = [0, 32], sizes = [16, 32], strides = [1, 1]} : vector<16x96xf32> to vector<16x32xf32>
    %195 = vector.extract_strided_slice %185 {offsets = [0, 32], sizes = [16, 32], strides = [1, 1]} : vector<16x96xf32> to vector<16x32xf32>
    %196 = arith.addf %194, %195 : vector<16x32xf32>
    %197 = arith.negf %196 : vector<16x32xf32>
    %198 = math.exp %197 : vector<16x32xf32>
    %cst_95 = arith.constant 1.000000e+00 : f32
    %199 = vector.broadcast %cst_95 : f32 to vector<16x32xf32>
    %200 = arith.addf %199, %198 : vector<16x32xf32>
    %201 = arith.divf %199, %200 : vector<16x32xf32>
    %202 = vector.extract_strided_slice %182 {offsets = [0, 64], sizes = [16, 32], strides = [1, 1]} : vector<16x96xf32> to vector<16x32xf32>
    %203 = vector.extract_strided_slice %185 {offsets = [0, 64], sizes = [16, 32], strides = [1, 1]} : vector<16x96xf32> to vector<16x32xf32>
    %204 = arith.mulf %193, %203 : vector<16x32xf32>
    %205 = arith.addf %202, %204 : vector<16x32xf32>
    %206 = math.tanh %205 : vector<16x32xf32>
    %cst_96 = arith.constant 1.000000e+00 : f32
    %207 = vector.broadcast %cst_96 : f32 to vector<16x32xf32>
    %208 = arith.subf %207, %201 : vector<16x32xf32>
    %209 = arith.mulf %208, %206 : vector<16x32xf32>
    %210 = arith.mulf %201, %67 : vector<16x32xf32>
    %211 = arith.addf %209, %210 : vector<16x32xf32>
    %cst_97 = arith.constant dense<0.000000e+00> : vector<16xf32>
    %212 = vector.multi_reduction <add>, %211, %cst_97 [1] : vector<16x32xf32> to vector<16xf32>
    %213 = vector.shape_cast %212 : vector<16xf32> to vector<16x1xf32>
    %cst_98 = arith.constant 3.200000e+01 : f32
    %214 = vector.broadcast %cst_98 : f32 to vector<16x1xf32>
    %215 = arith.divf %213, %214 : vector<16x1xf32>
    %216 = vector.broadcast %215 : vector<16x1xf32> to vector<16x32xf32>
    %217 = arith.subf %211, %216 : vector<16x32xf32>
    %218 = arith.mulf %217, %217 : vector<16x32xf32>
    %cst_99 = arith.constant dense<0.000000e+00> : vector<16xf32>
    %219 = vector.multi_reduction <add>, %218, %cst_99 [1] : vector<16x32xf32> to vector<16xf32>
    %220 = vector.shape_cast %219 : vector<16xf32> to vector<16x1xf32>
    %cst_100 = arith.constant 3.200000e+01 : f32
    %221 = vector.broadcast %cst_100 : f32 to vector<16x1xf32>
    %222 = arith.divf %220, %221 : vector<16x1xf32>
    %223 = vector.broadcast %215 : vector<16x1xf32> to vector<16x32xf32>
    %224 = arith.subf %211, %223 : vector<16x32xf32>
    %cst_101 = arith.constant 9.99999974E-6 : f32
    %225 = vector.broadcast %cst_101 : f32 to vector<16x1xf32>
    %226 = arith.addf %222, %225 : vector<16x1xf32>
    %227 = math.rsqrt %226 : vector<16x1xf32>
    %228 = vector.broadcast %227 : vector<16x1xf32> to vector<16x32xf32>
    %229 = arith.mulf %224, %228 : vector<16x32xf32>
    %230 = vector.broadcast %9 : vector<1x32xf32> to vector<16x32xf32>
    %231 = arith.mulf %229, %230 : vector<16x32xf32>
    %232 = vector.broadcast %10 : vector<1x32xf32> to vector<16x32xf32>
    %233 = arith.addf %231, %232 : vector<16x32xf32>
    %cst_102 = arith.constant dense<0.000000e+00> : vector<16x128xf32>
    %234 = tpu.matmul %233, %20, %cst_102 {dimension_numbers = #tpu.dot_dimension_numbers<[1], [0], [0], [1], [0, 0, 1, 1], [], []>} : vector<16x32xf32>, vector<32x128xf32>, vector<16x128xf32> -> vector<16x128xf32>
    %235 = vector.broadcast %13 : vector<1x128xf32> to vector<16x128xf32>
    %236 = arith.addf %234, %235 : vector<16x128xf32>
    %cst_103 = arith.constant 0.000000e+00 : f32
    %237 = vector.broadcast %cst_103 : f32 to vector<16x128xf32>
    %238 = arith.maximumf %236, %237 : vector<16x128xf32>
    %cst_104 = arith.constant dense<0.000000e+00> : vector<16x32xf32>
    %239 = tpu.matmul %238, %21, %cst_104 {dimension_numbers = #tpu.dot_dimension_numbers<[1], [0], [0], [1], [0, 0, 1, 1], [], []>} : vector<16x128xf32>, vector<128x32xf32>, vector<16x32xf32> -> vector<16x32xf32>
    %240 = vector.broadcast %14 : vector<1x32xf32> to vector<16x32xf32>
    %241 = arith.addf %239, %240 : vector<16x32xf32>
    %242 = arith.addf %211, %241 : vector<16x32xf32>
    %cst_105 = arith.constant dense<0.000000e+00> : vector<16xf32>
    %243 = vector.multi_reduction <add>, %242, %cst_105 [1] : vector<16x32xf32> to vector<16xf32>
    %244 = vector.shape_cast %243 : vector<16xf32> to vector<16x1xf32>
    %cst_106 = arith.constant 3.200000e+01 : f32
    %245 = vector.broadcast %cst_106 : f32 to vector<16x1xf32>
    %246 = arith.divf %244, %245 : vector<16x1xf32>
    %247 = vector.broadcast %246 : vector<16x1xf32> to vector<16x32xf32>
    %248 = arith.subf %242, %247 : vector<16x32xf32>
    %249 = arith.mulf %248, %248 : vector<16x32xf32>
    %cst_107 = arith.constant dense<0.000000e+00> : vector<16xf32>
    %250 = vector.multi_reduction <add>, %249, %cst_107 [1] : vector<16x32xf32> to vector<16xf32>
    %251 = vector.shape_cast %250 : vector<16xf32> to vector<16x1xf32>
    %cst_108 = arith.constant 3.200000e+01 : f32
    %252 = vector.broadcast %cst_108 : f32 to vector<16x1xf32>
    %253 = arith.divf %251, %252 : vector<16x1xf32>
    %254 = vector.broadcast %246 : vector<16x1xf32> to vector<16x32xf32>
    %255 = arith.subf %242, %254 : vector<16x32xf32>
    %cst_109 = arith.constant 9.99999974E-6 : f32
    %256 = vector.broadcast %cst_109 : f32 to vector<16x1xf32>
    %257 = arith.addf %253, %256 : vector<16x1xf32>
    %258 = math.rsqrt %257 : vector<16x1xf32>
    %259 = vector.broadcast %258 : vector<16x1xf32> to vector<16x32xf32>
    %260 = arith.mulf %255, %259 : vector<16x32xf32>
    %261 = vector.broadcast %7 : vector<1x32xf32> to vector<16x32xf32>
    %262 = arith.mulf %260, %261 : vector<16x32xf32>
    %263 = vector.broadcast %8 : vector<1x32xf32> to vector<16x32xf32>
    %264 = arith.addf %262, %263 : vector<16x32xf32>
    %cst_110 = arith.constant dense<0.000000e+00> : vector<16x32xf32>
    %265 = tpu.matmul %264, %17, %cst_110 {dimension_numbers = #tpu.dot_dimension_numbers<[1], [0], [0], [1], [0, 0, 1, 1], [], []>} : vector<16x32xf32>, vector<32x32xf32>, vector<16x32xf32> -> vector<16x32xf32>
    %266 = vector.extract_strided_slice %265 {offsets = [0, 0], sizes = [4, 32], strides = [1, 1]} : vector<16x32xf32> to vector<4x32xf32>
    %c0_111 = arith.constant 0 : index
    %c0_112 = arith.constant 0 : index
    %267 = vector.load %arg12[%c0_111, %c0_112] : memref<64x1024xf32, #tpu.memory_space<vmem>>, vector<32x256xf32>
    %c32_113 = arith.constant 32 : index
    %c0_114 = arith.constant 0 : index
    %268 = vector.load %arg12[%c32_113, %c0_114] : memref<64x1024xf32, #tpu.memory_space<vmem>>, vector<32x256xf32>
    %cst_115 = arith.constant dense<0.000000e+00> : vector<4x256xf32>
    %269 = tpu.matmul %266, %267, %cst_115 {dimension_numbers = #tpu.dot_dimension_numbers<[1], [0], [0], [1], [0, 0, 1, 1], [], []>} : vector<4x32xf32>, vector<32x256xf32>, vector<4x256xf32> -> vector<4x256xf32>
    %cst_116 = arith.constant dense<0xFF800000> : vector<256xf32>
    %270 = vector.multi_reduction <maximumf>, %269, %cst_116 [0] : vector<4x256xf32> to vector<256xf32>
    %271 = vector.shape_cast %270 : vector<256xf32> to vector<1x256xf32>
    %272 = vector.broadcast %271 : vector<1x256xf32> to vector<4x256xf32>
    %273 = arith.subf %269, %272 : vector<4x256xf32>
    %274 = math.exp %273 : vector<4x256xf32>
    %cst_117 = arith.constant dense<0.000000e+00> : vector<256xf32>
    %275 = vector.multi_reduction <add>, %274, %cst_117 [0] : vector<4x256xf32> to vector<256xf32>
    %276 = vector.shape_cast %275 : vector<256xf32> to vector<1x256xf32>
    %277 = tpu.reciprocal %276 {approx = true} : vector<1x256xf32> -> vector<1x256xf32>
    %278 = vector.broadcast %277 : vector<1x256xf32> to vector<4x256xf32>
    %279 = arith.mulf %274, %278 : vector<4x256xf32>
    %cst_118 = arith.constant 9.99999993E-9 : f32
    %280 = vector.broadcast %cst_118 : f32 to vector<4x256xf32>
    %281 = arith.addf %279, %280 : vector<4x256xf32>
    %cst_119 = arith.constant dense<0.000000e+00> : vector<4xf32>
    %282 = vector.multi_reduction <add>, %281, %cst_119 [1] : vector<4x256xf32> to vector<4xf32>
    %283 = vector.shape_cast %282 : vector<4xf32> to vector<4x1xf32>
    %284 = tpu.reciprocal %283 {approx = true} : vector<4x1xf32> -> vector<4x1xf32>
    %285 = vector.broadcast %284 : vector<4x1xf32> to vector<4x256xf32>
    %286 = arith.mulf %281, %285 : vector<4x256xf32>
    "tpu.trace_start"() <{level = 10 : i32, message = "sn,dn->sd"}> : () -> ()
    %cst_120 = arith.constant dense<0.000000e+00> : vector<4x32xf32>
    %287 = tpu.matmul %286, %268, %cst_120 {dimension_numbers = #tpu.dot_dimension_numbers<[1], [1], [0], [0], [0, 0, 1, 0], [], []>} : vector<4x256xf32>, vector<32x256xf32>, vector<4x32xf32> -> vector<4x32xf32>
    "tpu.trace_stop"() : () -> ()
    %288 = vector.extract_strided_slice %265 {offsets = [4, 0], sizes = [4, 32], strides = [1, 1]} : vector<16x32xf32> to vector<4x32xf32>
    %c0_121 = arith.constant 0 : index
    %c256_122 = arith.constant 256 : index
    %289 = vector.load %arg12[%c0_121, %c256_122] : memref<64x1024xf32, #tpu.memory_space<vmem>>, vector<32x256xf32>
    %c32_123 = arith.constant 32 : index
    %c256_124 = arith.constant 256 : index
    %290 = vector.load %arg12[%c32_123, %c256_124] : memref<64x1024xf32, #tpu.memory_space<vmem>>, vector<32x256xf32>
    %cst_125 = arith.constant dense<0.000000e+00> : vector<4x256xf32>
    %291 = tpu.matmul %288, %289, %cst_125 {dimension_numbers = #tpu.dot_dimension_numbers<[1], [0], [0], [1], [0, 0, 1, 1], [], []>} : vector<4x32xf32>, vector<32x256xf32>, vector<4x256xf32> -> vector<4x256xf32>
    %cst_126 = arith.constant dense<0xFF800000> : vector<256xf32>
    %292 = vector.multi_reduction <maximumf>, %291, %cst_126 [0] : vector<4x256xf32> to vector<256xf32>
    %293 = vector.shape_cast %292 : vector<256xf32> to vector<1x256xf32>
    %294 = vector.broadcast %293 : vector<1x256xf32> to vector<4x256xf32>
    %295 = arith.subf %291, %294 : vector<4x256xf32>
    %296 = math.exp %295 : vector<4x256xf32>
    %cst_127 = arith.constant dense<0.000000e+00> : vector<256xf32>
    %297 = vector.multi_reduction <add>, %296, %cst_127 [0] : vector<4x256xf32> to vector<256xf32>
    %298 = vector.shape_cast %297 : vector<256xf32> to vector<1x256xf32>
    %299 = tpu.reciprocal %298 {approx = true} : vector<1x256xf32> -> vector<1x256xf32>
    %300 = vector.broadcast %299 : vector<1x256xf32> to vector<4x256xf32>
    %301 = arith.mulf %296, %300 : vector<4x256xf32>
    %cst_128 = arith.constant 9.99999993E-9 : f32
    %302 = vector.broadcast %cst_128 : f32 to vector<4x256xf32>
    %303 = arith.addf %301, %302 : vector<4x256xf32>
    %cst_129 = arith.constant dense<0.000000e+00> : vector<4xf32>
    %304 = vector.multi_reduction <add>, %303, %cst_129 [1] : vector<4x256xf32> to vector<4xf32>
    %305 = vector.shape_cast %304 : vector<4xf32> to vector<4x1xf32>
    %306 = tpu.reciprocal %305 {approx = true} : vector<4x1xf32> -> vector<4x1xf32>
    %307 = vector.broadcast %306 : vector<4x1xf32> to vector<4x256xf32>
    %308 = arith.mulf %303, %307 : vector<4x256xf32>
    "tpu.trace_start"() <{level = 10 : i32, message = "sn,dn->sd"}> : () -> ()
    %cst_130 = arith.constant dense<0.000000e+00> : vector<4x32xf32>
    %309 = tpu.matmul %308, %290, %cst_130 {dimension_numbers = #tpu.dot_dimension_numbers<[1], [1], [0], [0], [0, 0, 1, 0], [], []>} : vector<4x256xf32>, vector<32x256xf32>, vector<4x32xf32> -> vector<4x32xf32>
    "tpu.trace_stop"() : () -> ()
    %310 = vector.extract_strided_slice %265 {offsets = [8, 0], sizes = [4, 32], strides = [1, 1]} : vector<16x32xf32> to vector<4x32xf32>
    %c0_131 = arith.constant 0 : index
    %c512_132 = arith.constant 512 : index
    %311 = vector.load %arg12[%c0_131, %c512_132] : memref<64x1024xf32, #tpu.memory_space<vmem>>, vector<32x256xf32>
    %c32_133 = arith.constant 32 : index
    %c512_134 = arith.constant 512 : index
    %312 = vector.load %arg12[%c32_133, %c512_134] : memref<64x1024xf32, #tpu.memory_space<vmem>>, vector<32x256xf32>
    %cst_135 = arith.constant dense<0.000000e+00> : vector<4x256xf32>
    %313 = tpu.matmul %310, %311, %cst_135 {dimension_numbers = #tpu.dot_dimension_numbers<[1], [0], [0], [1], [0, 0, 1, 1], [], []>} : vector<4x32xf32>, vector<32x256xf32>, vector<4x256xf32> -> vector<4x256xf32>
    %cst_136 = arith.constant dense<0xFF800000> : vector<256xf32>
    %314 = vector.multi_reduction <maximumf>, %313, %cst_136 [0] : vector<4x256xf32> to vector<256xf32>
    %315 = vector.shape_cast %314 : vector<256xf32> to vector<1x256xf32>
    %316 = vector.broadcast %315 : vector<1x256xf32> to vector<4x256xf32>
    %317 = arith.subf %313, %316 : vector<4x256xf32>
    %318 = math.exp %317 : vector<4x256xf32>
    %cst_137 = arith.constant dense<0.000000e+00> : vector<256xf32>
    %319 = vector.multi_reduction <add>, %318, %cst_137 [0] : vector<4x256xf32> to vector<256xf32>
    %320 = vector.shape_cast %319 : vector<256xf32> to vector<1x256xf32>
    %321 = tpu.reciprocal %320 {approx = true} : vector<1x256xf32> -> vector<1x256xf32>
    %322 = vector.broadcast %321 : vector<1x256xf32> to vector<4x256xf32>
    %323 = arith.mulf %318, %322 : vector<4x256xf32>
    %cst_138 = arith.constant 9.99999993E-9 : f32
    %324 = vector.broadcast %cst_138 : f32 to vector<4x256xf32>
    %325 = arith.addf %323, %324 : vector<4x256xf32>
    %cst_139 = arith.constant dense<0.000000e+00> : vector<4xf32>
    %326 = vector.multi_reduction <add>, %325, %cst_139 [1] : vector<4x256xf32> to vector<4xf32>
    %327 = vector.shape_cast %326 : vector<4xf32> to vector<4x1xf32>
    %328 = tpu.reciprocal %327 {approx = true} : vector<4x1xf32> -> vector<4x1xf32>
    %329 = vector.broadcast %328 : vector<4x1xf32> to vector<4x256xf32>
    %330 = arith.mulf %325, %329 : vector<4x256xf32>
    "tpu.trace_start"() <{level = 10 : i32, message = "sn,dn->sd"}> : () -> ()
    %cst_140 = arith.constant dense<0.000000e+00> : vector<4x32xf32>
    %331 = tpu.matmul %330, %312, %cst_140 {dimension_numbers = #tpu.dot_dimension_numbers<[1], [1], [0], [0], [0, 0, 1, 0], [], []>} : vector<4x256xf32>, vector<32x256xf32>, vector<4x32xf32> -> vector<4x32xf32>
    "tpu.trace_stop"() : () -> ()
    %332 = vector.extract_strided_slice %265 {offsets = [12, 0], sizes = [4, 32], strides = [1, 1]} : vector<16x32xf32> to vector<4x32xf32>
    %c0_141 = arith.constant 0 : index
    %c768_142 = arith.constant 768 : index
    %333 = vector.load %arg12[%c0_141, %c768_142] : memref<64x1024xf32, #tpu.memory_space<vmem>>, vector<32x256xf32>
    %c32_143 = arith.constant 32 : index
    %c768_144 = arith.constant 768 : index
    %334 = vector.load %arg12[%c32_143, %c768_144] : memref<64x1024xf32, #tpu.memory_space<vmem>>, vector<32x256xf32>
    %cst_145 = arith.constant dense<0.000000e+00> : vector<4x256xf32>
    %335 = tpu.matmul %332, %333, %cst_145 {dimension_numbers = #tpu.dot_dimension_numbers<[1], [0], [0], [1], [0, 0, 1, 1], [], []>} : vector<4x32xf32>, vector<32x256xf32>, vector<4x256xf32> -> vector<4x256xf32>
    %cst_146 = arith.constant dense<0xFF800000> : vector<256xf32>
    %336 = vector.multi_reduction <maximumf>, %335, %cst_146 [0] : vector<4x256xf32> to vector<256xf32>
    %337 = vector.shape_cast %336 : vector<256xf32> to vector<1x256xf32>
    %338 = vector.broadcast %337 : vector<1x256xf32> to vector<4x256xf32>
    %339 = arith.subf %335, %338 : vector<4x256xf32>
    %340 = math.exp %339 : vector<4x256xf32>
    %cst_147 = arith.constant dense<0.000000e+00> : vector<256xf32>
    %341 = vector.multi_reduction <add>, %340, %cst_147 [0] : vector<4x256xf32> to vector<256xf32>
    %342 = vector.shape_cast %341 : vector<256xf32> to vector<1x256xf32>
    %343 = tpu.reciprocal %342 {approx = true} : vector<1x256xf32> -> vector<1x256xf32>
    %344 = vector.broadcast %343 : vector<1x256xf32> to vector<4x256xf32>
    %345 = arith.mulf %340, %344 : vector<4x256xf32>
    %cst_148 = arith.constant 9.99999993E-9 : f32
    %346 = vector.broadcast %cst_148 : f32 to vector<4x256xf32>
    %347 = arith.addf %345, %346 : vector<4x256xf32>
    %cst_149 = arith.constant dense<0.000000e+00> : vector<4xf32>
    %348 = vector.multi_reduction <add>, %347, %cst_149 [1] : vector<4x256xf32> to vector<4xf32>
    %349 = vector.shape_cast %348 : vector<4xf32> to vector<4x1xf32>
    %350 = tpu.reciprocal %349 {approx = true} : vector<4x1xf32> -> vector<4x1xf32>
    %351 = vector.broadcast %350 : vector<4x1xf32> to vector<4x256xf32>
    %352 = arith.mulf %347, %351 : vector<4x256xf32>
    "tpu.trace_start"() <{level = 10 : i32, message = "sn,dn->sd"}> : () -> ()
    %cst_150 = arith.constant dense<0.000000e+00> : vector<4x32xf32>
    %353 = tpu.matmul %352, %334, %cst_150 {dimension_numbers = #tpu.dot_dimension_numbers<[1], [1], [0], [0], [0, 0, 1, 0], [], []>} : vector<4x256xf32>, vector<32x256xf32>, vector<4x32xf32> -> vector<4x32xf32>
    "tpu.trace_stop"() : () -> ()
    %354 = tpu.concatenate %287, %309, %331, %353 in 0 : vector<4x32xf32>, vector<4x32xf32>, vector<4x32xf32>, vector<4x32xf32> -> vector<16x32xf32>
    %cst_151 = arith.constant dense<0.000000e+00> : vector<16x96xf32>
    %355 = tpu.matmul %354, %18, %cst_151 {dimension_numbers = #tpu.dot_dimension_numbers<[1], [0], [0], [1], [0, 0, 1, 1], [], []>} : vector<16x32xf32>, vector<32x96xf32>, vector<16x96xf32> -> vector<16x96xf32>
    %356 = vector.broadcast %11 : vector<1x96xf32> to vector<16x96xf32>
    %357 = arith.addf %355, %356 : vector<16x96xf32>
    %cst_152 = arith.constant dense<0.000000e+00> : vector<16x96xf32>
    %358 = tpu.matmul %242, %19, %cst_152 {dimension_numbers = #tpu.dot_dimension_numbers<[1], [0], [0], [1], [0, 0, 1, 1], [], []>} : vector<16x32xf32>, vector<32x96xf32>, vector<16x96xf32> -> vector<16x96xf32>
    %359 = vector.broadcast %12 : vector<1x96xf32> to vector<16x96xf32>
    %360 = arith.addf %358, %359 : vector<16x96xf32>
    %361 = vector.extract_strided_slice %357 {offsets = [0, 0], sizes = [16, 32], strides = [1, 1]} : vector<16x96xf32> to vector<16x32xf32>
    %362 = vector.extract_strided_slice %360 {offsets = [0, 0], sizes = [16, 32], strides = [1, 1]} : vector<16x96xf32> to vector<16x32xf32>
    %363 = arith.addf %361, %362 : vector<16x32xf32>
    %364 = arith.negf %363 : vector<16x32xf32>
    %365 = math.exp %364 : vector<16x32xf32>
    %cst_153 = arith.constant 1.000000e+00 : f32
    %366 = vector.broadcast %cst_153 : f32 to vector<16x32xf32>
    %367 = arith.addf %366, %365 : vector<16x32xf32>
    %368 = arith.divf %366, %367 : vector<16x32xf32>
    %369 = vector.extract_strided_slice %357 {offsets = [0, 32], sizes = [16, 32], strides = [1, 1]} : vector<16x96xf32> to vector<16x32xf32>
    %370 = vector.extract_strided_slice %360 {offsets = [0, 32], sizes = [16, 32], strides = [1, 1]} : vector<16x96xf32> to vector<16x32xf32>
    %371 = arith.addf %369, %370 : vector<16x32xf32>
    %372 = arith.negf %371 : vector<16x32xf32>
    %373 = math.exp %372 : vector<16x32xf32>
    %cst_154 = arith.constant 1.000000e+00 : f32
    %374 = vector.broadcast %cst_154 : f32 to vector<16x32xf32>
    %375 = arith.addf %374, %373 : vector<16x32xf32>
    %376 = arith.divf %374, %375 : vector<16x32xf32>
    %377 = vector.extract_strided_slice %357 {offsets = [0, 64], sizes = [16, 32], strides = [1, 1]} : vector<16x96xf32> to vector<16x32xf32>
    %378 = vector.extract_strided_slice %360 {offsets = [0, 64], sizes = [16, 32], strides = [1, 1]} : vector<16x96xf32> to vector<16x32xf32>
    %379 = arith.mulf %368, %378 : vector<16x32xf32>
    %380 = arith.addf %377, %379 : vector<16x32xf32>
    %381 = math.tanh %380 : vector<16x32xf32>
    %cst_155 = arith.constant 1.000000e+00 : f32
    %382 = vector.broadcast %cst_155 : f32 to vector<16x32xf32>
    %383 = arith.subf %382, %376 : vector<16x32xf32>
    %384 = arith.mulf %383, %381 : vector<16x32xf32>
    %385 = arith.mulf %376, %242 : vector<16x32xf32>
    %386 = arith.addf %384, %385 : vector<16x32xf32>
    %cst_156 = arith.constant dense<0.000000e+00> : vector<16xf32>
    %387 = vector.multi_reduction <add>, %386, %cst_156 [1] : vector<16x32xf32> to vector<16xf32>
    %388 = vector.shape_cast %387 : vector<16xf32> to vector<16x1xf32>
    %cst_157 = arith.constant 3.200000e+01 : f32
    %389 = vector.broadcast %cst_157 : f32 to vector<16x1xf32>
    %390 = arith.divf %388, %389 : vector<16x1xf32>
    %391 = vector.broadcast %390 : vector<16x1xf32> to vector<16x32xf32>
    %392 = arith.subf %386, %391 : vector<16x32xf32>
    %393 = arith.mulf %392, %392 : vector<16x32xf32>
    %cst_158 = arith.constant dense<0.000000e+00> : vector<16xf32>
    %394 = vector.multi_reduction <add>, %393, %cst_158 [1] : vector<16x32xf32> to vector<16xf32>
    %395 = vector.shape_cast %394 : vector<16xf32> to vector<16x1xf32>
    %cst_159 = arith.constant 3.200000e+01 : f32
    %396 = vector.broadcast %cst_159 : f32 to vector<16x1xf32>
    %397 = arith.divf %395, %396 : vector<16x1xf32>
    %398 = vector.broadcast %390 : vector<16x1xf32> to vector<16x32xf32>
    %399 = arith.subf %386, %398 : vector<16x32xf32>
    %cst_160 = arith.constant 9.99999974E-6 : f32
    %400 = vector.broadcast %cst_160 : f32 to vector<16x1xf32>
    %401 = arith.addf %397, %400 : vector<16x1xf32>
    %402 = math.rsqrt %401 : vector<16x1xf32>
    %403 = vector.broadcast %402 : vector<16x1xf32> to vector<16x32xf32>
    %404 = arith.mulf %399, %403 : vector<16x32xf32>
    %405 = vector.broadcast %9 : vector<1x32xf32> to vector<16x32xf32>
    %406 = arith.mulf %404, %405 : vector<16x32xf32>
    %407 = vector.broadcast %10 : vector<1x32xf32> to vector<16x32xf32>
    %408 = arith.addf %406, %407 : vector<16x32xf32>
    %cst_161 = arith.constant dense<0.000000e+00> : vector<16x128xf32>
    %409 = tpu.matmul %408, %20, %cst_161 {dimension_numbers = #tpu.dot_dimension_numbers<[1], [0], [0], [1], [0, 0, 1, 1], [], []>} : vector<16x32xf32>, vector<32x128xf32>, vector<16x128xf32> -> vector<16x128xf32>
    %410 = vector.broadcast %13 : vector<1x128xf32> to vector<16x128xf32>
    %411 = arith.addf %409, %410 : vector<16x128xf32>
    %cst_162 = arith.constant 0.000000e+00 : f32
    %412 = vector.broadcast %cst_162 : f32 to vector<16x128xf32>
    %413 = arith.maximumf %411, %412 : vector<16x128xf32>
    %cst_163 = arith.constant dense<0.000000e+00> : vector<16x32xf32>
    %414 = tpu.matmul %413, %21, %cst_163 {dimension_numbers = #tpu.dot_dimension_numbers<[1], [0], [0], [1], [0, 0, 1, 1], [], []>} : vector<16x128xf32>, vector<128x32xf32>, vector<16x32xf32> -> vector<16x32xf32>
    %415 = vector.broadcast %14 : vector<1x32xf32> to vector<16x32xf32>
    %416 = arith.addf %414, %415 : vector<16x32xf32>
    %417 = arith.addf %386, %416 : vector<16x32xf32>
    %cst_164 = arith.constant dense<0.000000e+00> : vector<16xf32>
    %418 = vector.multi_reduction <add>, %417, %cst_164 [1] : vector<16x32xf32> to vector<16xf32>
    %419 = vector.shape_cast %418 : vector<16xf32> to vector<16x1xf32>
    %cst_165 = arith.constant 3.200000e+01 : f32
    %420 = vector.broadcast %cst_165 : f32 to vector<16x1xf32>
    %421 = arith.divf %419, %420 : vector<16x1xf32>
    %422 = vector.broadcast %421 : vector<16x1xf32> to vector<16x32xf32>
    %423 = arith.subf %417, %422 : vector<16x32xf32>
    %424 = arith.mulf %423, %423 : vector<16x32xf32>
    %cst_166 = arith.constant dense<0.000000e+00> : vector<16xf32>
    %425 = vector.multi_reduction <add>, %424, %cst_166 [1] : vector<16x32xf32> to vector<16xf32>
    %426 = vector.shape_cast %425 : vector<16xf32> to vector<16x1xf32>
    %cst_167 = arith.constant 3.200000e+01 : f32
    %427 = vector.broadcast %cst_167 : f32 to vector<16x1xf32>
    %428 = arith.divf %426, %427 : vector<16x1xf32>
    %429 = vector.broadcast %421 : vector<16x1xf32> to vector<16x32xf32>
    %430 = arith.subf %417, %429 : vector<16x32xf32>
    %cst_168 = arith.constant 9.99999974E-6 : f32
    %431 = vector.broadcast %cst_168 : f32 to vector<16x1xf32>
    %432 = arith.addf %428, %431 : vector<16x1xf32>
    %433 = math.rsqrt %432 : vector<16x1xf32>
    %434 = vector.broadcast %433 : vector<16x1xf32> to vector<16x32xf32>
    %435 = arith.mulf %430, %434 : vector<16x32xf32>
    %436 = vector.broadcast %7 : vector<1x32xf32> to vector<16x32xf32>
    %437 = arith.mulf %435, %436 : vector<16x32xf32>
    %438 = vector.broadcast %8 : vector<1x32xf32> to vector<16x32xf32>
    %439 = arith.addf %437, %438 : vector<16x32xf32>
    %cst_169 = arith.constant dense<0.000000e+00> : vector<16x32xf32>
    %440 = tpu.matmul %439, %17, %cst_169 {dimension_numbers = #tpu.dot_dimension_numbers<[1], [0], [0], [1], [0, 0, 1, 1], [], []>} : vector<16x32xf32>, vector<32x32xf32>, vector<16x32xf32> -> vector<16x32xf32>
    %441 = vector.extract_strided_slice %440 {offsets = [0, 0], sizes = [4, 32], strides = [1, 1]} : vector<16x32xf32> to vector<4x32xf32>
    %c0_170 = arith.constant 0 : index
    %c0_171 = arith.constant 0 : index
    %442 = vector.load %arg12[%c0_170, %c0_171] : memref<64x1024xf32, #tpu.memory_space<vmem>>, vector<32x256xf32>
    %c32_172 = arith.constant 32 : index
    %c0_173 = arith.constant 0 : index
    %443 = vector.load %arg12[%c32_172, %c0_173] : memref<64x1024xf32, #tpu.memory_space<vmem>>, vector<32x256xf32>
    %cst_174 = arith.constant dense<0.000000e+00> : vector<4x256xf32>
    %444 = tpu.matmul %441, %442, %cst_174 {dimension_numbers = #tpu.dot_dimension_numbers<[1], [0], [0], [1], [0, 0, 1, 1], [], []>} : vector<4x32xf32>, vector<32x256xf32>, vector<4x256xf32> -> vector<4x256xf32>
    %cst_175 = arith.constant dense<0xFF800000> : vector<256xf32>
    %445 = vector.multi_reduction <maximumf>, %444, %cst_175 [0] : vector<4x256xf32> to vector<256xf32>
    %446 = vector.shape_cast %445 : vector<256xf32> to vector<1x256xf32>
    %447 = vector.broadcast %446 : vector<1x256xf32> to vector<4x256xf32>
    %448 = arith.subf %444, %447 : vector<4x256xf32>
    %449 = math.exp %448 : vector<4x256xf32>
    %cst_176 = arith.constant dense<0.000000e+00> : vector<256xf32>
    %450 = vector.multi_reduction <add>, %449, %cst_176 [0] : vector<4x256xf32> to vector<256xf32>
    %451 = vector.shape_cast %450 : vector<256xf32> to vector<1x256xf32>
    %452 = tpu.reciprocal %451 {approx = true} : vector<1x256xf32> -> vector<1x256xf32>
    %453 = vector.broadcast %452 : vector<1x256xf32> to vector<4x256xf32>
    %454 = arith.mulf %449, %453 : vector<4x256xf32>
    %cst_177 = arith.constant 9.99999993E-9 : f32
    %455 = vector.broadcast %cst_177 : f32 to vector<4x256xf32>
    %456 = arith.addf %454, %455 : vector<4x256xf32>
    %cst_178 = arith.constant dense<0.000000e+00> : vector<4xf32>
    %457 = vector.multi_reduction <add>, %456, %cst_178 [1] : vector<4x256xf32> to vector<4xf32>
    %458 = vector.shape_cast %457 : vector<4xf32> to vector<4x1xf32>
    %459 = tpu.reciprocal %458 {approx = true} : vector<4x1xf32> -> vector<4x1xf32>
    %460 = vector.broadcast %459 : vector<4x1xf32> to vector<4x256xf32>
    %461 = arith.mulf %456, %460 : vector<4x256xf32>
    "tpu.trace_start"() <{level = 10 : i32, message = "sn,dn->sd"}> : () -> ()
    %cst_179 = arith.constant dense<0.000000e+00> : vector<4x32xf32>
    %462 = tpu.matmul %461, %443, %cst_179 {dimension_numbers = #tpu.dot_dimension_numbers<[1], [1], [0], [0], [0, 0, 1, 0], [], []>} : vector<4x256xf32>, vector<32x256xf32>, vector<4x32xf32> -> vector<4x32xf32>
    "tpu.trace_stop"() : () -> ()
    %463 = vector.extract_strided_slice %440 {offsets = [4, 0], sizes = [4, 32], strides = [1, 1]} : vector<16x32xf32> to vector<4x32xf32>
    %c0_180 = arith.constant 0 : index
    %c256_181 = arith.constant 256 : index
    %464 = vector.load %arg12[%c0_180, %c256_181] : memref<64x1024xf32, #tpu.memory_space<vmem>>, vector<32x256xf32>
    %c32_182 = arith.constant 32 : index
    %c256_183 = arith.constant 256 : index
    %465 = vector.load %arg12[%c32_182, %c256_183] : memref<64x1024xf32, #tpu.memory_space<vmem>>, vector<32x256xf32>
    %cst_184 = arith.constant dense<0.000000e+00> : vector<4x256xf32>
    %466 = tpu.matmul %463, %464, %cst_184 {dimension_numbers = #tpu.dot_dimension_numbers<[1], [0], [0], [1], [0, 0, 1, 1], [], []>} : vector<4x32xf32>, vector<32x256xf32>, vector<4x256xf32> -> vector<4x256xf32>
    %cst_185 = arith.constant dense<0xFF800000> : vector<256xf32>
    %467 = vector.multi_reduction <maximumf>, %466, %cst_185 [0] : vector<4x256xf32> to vector<256xf32>
    %468 = vector.shape_cast %467 : vector<256xf32> to vector<1x256xf32>
    %469 = vector.broadcast %468 : vector<1x256xf32> to vector<4x256xf32>
    %470 = arith.subf %466, %469 : vector<4x256xf32>
    %471 = math.exp %470 : vector<4x256xf32>
    %cst_186 = arith.constant dense<0.000000e+00> : vector<256xf32>
    %472 = vector.multi_reduction <add>, %471, %cst_186 [0] : vector<4x256xf32> to vector<256xf32>
    %473 = vector.shape_cast %472 : vector<256xf32> to vector<1x256xf32>
    %474 = tpu.reciprocal %473 {approx = true} : vector<1x256xf32> -> vector<1x256xf32>
    %475 = vector.broadcast %474 : vector<1x256xf32> to vector<4x256xf32>
    %476 = arith.mulf %471, %475 : vector<4x256xf32>
    %cst_187 = arith.constant 9.99999993E-9 : f32
    %477 = vector.broadcast %cst_187 : f32 to vector<4x256xf32>
    %478 = arith.addf %476, %477 : vector<4x256xf32>
    %cst_188 = arith.constant dense<0.000000e+00> : vector<4xf32>
    %479 = vector.multi_reduction <add>, %478, %cst_188 [1] : vector<4x256xf32> to vector<4xf32>
    %480 = vector.shape_cast %479 : vector<4xf32> to vector<4x1xf32>
    %481 = tpu.reciprocal %480 {approx = true} : vector<4x1xf32> -> vector<4x1xf32>
    %482 = vector.broadcast %481 : vector<4x1xf32> to vector<4x256xf32>
    %483 = arith.mulf %478, %482 : vector<4x256xf32>
    "tpu.trace_start"() <{level = 10 : i32, message = "sn,dn->sd"}> : () -> ()
    %cst_189 = arith.constant dense<0.000000e+00> : vector<4x32xf32>
    %484 = tpu.matmul %483, %465, %cst_189 {dimension_numbers = #tpu.dot_dimension_numbers<[1], [1], [0], [0], [0, 0, 1, 0], [], []>} : vector<4x256xf32>, vector<32x256xf32>, vector<4x32xf32> -> vector<4x32xf32>
    "tpu.trace_stop"() : () -> ()
    %485 = vector.extract_strided_slice %440 {offsets = [8, 0], sizes = [4, 32], strides = [1, 1]} : vector<16x32xf32> to vector<4x32xf32>
    %c0_190 = arith.constant 0 : index
    %c512_191 = arith.constant 512 : index
    %486 = vector.load %arg12[%c0_190, %c512_191] : memref<64x1024xf32, #tpu.memory_space<vmem>>, vector<32x256xf32>
    %c32_192 = arith.constant 32 : index
    %c512_193 = arith.constant 512 : index
    %487 = vector.load %arg12[%c32_192, %c512_193] : memref<64x1024xf32, #tpu.memory_space<vmem>>, vector<32x256xf32>
    %cst_194 = arith.constant dense<0.000000e+00> : vector<4x256xf32>
    %488 = tpu.matmul %485, %486, %cst_194 {dimension_numbers = #tpu.dot_dimension_numbers<[1], [0], [0], [1], [0, 0, 1, 1], [], []>} : vector<4x32xf32>, vector<32x256xf32>, vector<4x256xf32> -> vector<4x256xf32>
    %cst_195 = arith.constant dense<0xFF800000> : vector<256xf32>
    %489 = vector.multi_reduction <maximumf>, %488, %cst_195 [0] : vector<4x256xf32> to vector<256xf32>
    %490 = vector.shape_cast %489 : vector<256xf32> to vector<1x256xf32>
    %491 = vector.broadcast %490 : vector<1x256xf32> to vector<4x256xf32>
    %492 = arith.subf %488, %491 : vector<4x256xf32>
    %493 = math.exp %492 : vector<4x256xf32>
    %cst_196 = arith.constant dense<0.000000e+00> : vector<256xf32>
    %494 = vector.multi_reduction <add>, %493, %cst_196 [0] : vector<4x256xf32> to vector<256xf32>
    %495 = vector.shape_cast %494 : vector<256xf32> to vector<1x256xf32>
    %496 = tpu.reciprocal %495 {approx = true} : vector<1x256xf32> -> vector<1x256xf32>
    %497 = vector.broadcast %496 : vector<1x256xf32> to vector<4x256xf32>
    %498 = arith.mulf %493, %497 : vector<4x256xf32>
    %cst_197 = arith.constant 9.99999993E-9 : f32
    %499 = vector.broadcast %cst_197 : f32 to vector<4x256xf32>
    %500 = arith.addf %498, %499 : vector<4x256xf32>
    %cst_198 = arith.constant dense<0.000000e+00> : vector<4xf32>
    %501 = vector.multi_reduction <add>, %500, %cst_198 [1] : vector<4x256xf32> to vector<4xf32>
    %502 = vector.shape_cast %501 : vector<4xf32> to vector<4x1xf32>
    %503 = tpu.reciprocal %502 {approx = true} : vector<4x1xf32> -> vector<4x1xf32>
    %504 = vector.broadcast %503 : vector<4x1xf32> to vector<4x256xf32>
    %505 = arith.mulf %500, %504 : vector<4x256xf32>
    "tpu.trace_start"() <{level = 10 : i32, message = "sn,dn->sd"}> : () -> ()
    %cst_199 = arith.constant dense<0.000000e+00> : vector<4x32xf32>
    %506 = tpu.matmul %505, %487, %cst_199 {dimension_numbers = #tpu.dot_dimension_numbers<[1], [1], [0], [0], [0, 0, 1, 0], [], []>} : vector<4x256xf32>, vector<32x256xf32>, vector<4x32xf32> -> vector<4x32xf32>
    "tpu.trace_stop"() : () -> ()
    %507 = vector.extract_strided_slice %440 {offsets = [12, 0], sizes = [4, 32], strides = [1, 1]} : vector<16x32xf32> to vector<4x32xf32>
    %c0_200 = arith.constant 0 : index
    %c768_201 = arith.constant 768 : index
    %508 = vector.load %arg12[%c0_200, %c768_201] : memref<64x1024xf32, #tpu.memory_space<vmem>>, vector<32x256xf32>
    %c32_202 = arith.constant 32 : index
    %c768_203 = arith.constant 768 : index
    %509 = vector.load %arg12[%c32_202, %c768_203] : memref<64x1024xf32, #tpu.memory_space<vmem>>, vector<32x256xf32>
    %cst_204 = arith.constant dense<0.000000e+00> : vector<4x256xf32>
    %510 = tpu.matmul %507, %508, %cst_204 {dimension_numbers = #tpu.dot_dimension_numbers<[1], [0], [0], [1], [0, 0, 1, 1], [], []>} : vector<4x32xf32>, vector<32x256xf32>, vector<4x256xf32> -> vector<4x256xf32>
    %cst_205 = arith.constant dense<0xFF800000> : vector<256xf32>
    %511 = vector.multi_reduction <maximumf>, %510, %cst_205 [0] : vector<4x256xf32> to vector<256xf32>
    %512 = vector.shape_cast %511 : vector<256xf32> to vector<1x256xf32>
    %513 = vector.broadcast %512 : vector<1x256xf32> to vector<4x256xf32>
    %514 = arith.subf %510, %513 : vector<4x256xf32>
    %515 = math.exp %514 : vector<4x256xf32>
    %cst_206 = arith.constant dense<0.000000e+00> : vector<256xf32>
    %516 = vector.multi_reduction <add>, %515, %cst_206 [0] : vector<4x256xf32> to vector<256xf32>
    %517 = vector.shape_cast %516 : vector<256xf32> to vector<1x256xf32>
    %518 = tpu.reciprocal %517 {approx = true} : vector<1x256xf32> -> vector<1x256xf32>
    %519 = vector.broadcast %518 : vector<1x256xf32> to vector<4x256xf32>
    %520 = arith.mulf %515, %519 : vector<4x256xf32>
    %cst_207 = arith.constant 9.99999993E-9 : f32
    %521 = vector.broadcast %cst_207 : f32 to vector<4x256xf32>
    %522 = arith.addf %520, %521 : vector<4x256xf32>
    %cst_208 = arith.constant dense<0.000000e+00> : vector<4xf32>
    %523 = vector.multi_reduction <add>, %522, %cst_208 [1] : vector<4x256xf32> to vector<4xf32>
    %524 = vector.shape_cast %523 : vector<4xf32> to vector<4x1xf32>
    %525 = tpu.reciprocal %524 {approx = true} : vector<4x1xf32> -> vector<4x1xf32>
    %526 = vector.broadcast %525 : vector<4x1xf32> to vector<4x256xf32>
    %527 = arith.mulf %522, %526 : vector<4x256xf32>
    "tpu.trace_start"() <{level = 10 : i32, message = "sn,dn->sd"}> : () -> ()
    %cst_209 = arith.constant dense<0.000000e+00> : vector<4x32xf32>
    %528 = tpu.matmul %527, %509, %cst_209 {dimension_numbers = #tpu.dot_dimension_numbers<[1], [1], [0], [0], [0, 0, 1, 0], [], []>} : vector<4x256xf32>, vector<32x256xf32>, vector<4x32xf32> -> vector<4x32xf32>
    "tpu.trace_stop"() : () -> ()
    %529 = tpu.concatenate %462, %484, %506, %528 in 0 : vector<4x32xf32>, vector<4x32xf32>, vector<4x32xf32>, vector<4x32xf32> -> vector<16x32xf32>
    %cst_210 = arith.constant dense<0.000000e+00> : vector<16x96xf32>
    %530 = tpu.matmul %529, %18, %cst_210 {dimension_numbers = #tpu.dot_dimension_numbers<[1], [0], [0], [1], [0, 0, 1, 1], [], []>} : vector<16x32xf32>, vector<32x96xf32>, vector<16x96xf32> -> vector<16x96xf32>
    %531 = vector.broadcast %11 : vector<1x96xf32> to vector<16x96xf32>
    %532 = arith.addf %530, %531 : vector<16x96xf32>
    %cst_211 = arith.constant dense<0.000000e+00> : vector<16x96xf32>
    %533 = tpu.matmul %417, %19, %cst_211 {dimension_numbers = #tpu.dot_dimension_numbers<[1], [0], [0], [1], [0, 0, 1, 1], [], []>} : vector<16x32xf32>, vector<32x96xf32>, vector<16x96xf32> -> vector<16x96xf32>
    %534 = vector.broadcast %12 : vector<1x96xf32> to vector<16x96xf32>
    %535 = arith.addf %533, %534 : vector<16x96xf32>
    %536 = vector.extract_strided_slice %532 {offsets = [0, 0], sizes = [16, 32], strides = [1, 1]} : vector<16x96xf32> to vector<16x32xf32>
    %537 = vector.extract_strided_slice %535 {offsets = [0, 0], sizes = [16, 32], strides = [1, 1]} : vector<16x96xf32> to vector<16x32xf32>
    %538 = arith.addf %536, %537 : vector<16x32xf32>
    %539 = arith.negf %538 : vector<16x32xf32>
    %540 = math.exp %539 : vector<16x32xf32>
    %cst_212 = arith.constant 1.000000e+00 : f32
    %541 = vector.broadcast %cst_212 : f32 to vector<16x32xf32>
    %542 = arith.addf %541, %540 : vector<16x32xf32>
    %543 = arith.divf %541, %542 : vector<16x32xf32>
    %544 = vector.extract_strided_slice %532 {offsets = [0, 32], sizes = [16, 32], strides = [1, 1]} : vector<16x96xf32> to vector<16x32xf32>
    %545 = vector.extract_strided_slice %535 {offsets = [0, 32], sizes = [16, 32], strides = [1, 1]} : vector<16x96xf32> to vector<16x32xf32>
    %546 = arith.addf %544, %545 : vector<16x32xf32>
    %547 = arith.negf %546 : vector<16x32xf32>
    %548 = math.exp %547 : vector<16x32xf32>
    %cst_213 = arith.constant 1.000000e+00 : f32
    %549 = vector.broadcast %cst_213 : f32 to vector<16x32xf32>
    %550 = arith.addf %549, %548 : vector<16x32xf32>
    %551 = arith.divf %549, %550 : vector<16x32xf32>
    %552 = vector.extract_strided_slice %532 {offsets = [0, 64], sizes = [16, 32], strides = [1, 1]} : vector<16x96xf32> to vector<16x32xf32>
    %553 = vector.extract_strided_slice %535 {offsets = [0, 64], sizes = [16, 32], strides = [1, 1]} : vector<16x96xf32> to vector<16x32xf32>
    %554 = arith.mulf %543, %553 : vector<16x32xf32>
    %555 = arith.addf %552, %554 : vector<16x32xf32>
    %556 = math.tanh %555 : vector<16x32xf32>
    %cst_214 = arith.constant 1.000000e+00 : f32
    %557 = vector.broadcast %cst_214 : f32 to vector<16x32xf32>
    %558 = arith.subf %557, %551 : vector<16x32xf32>
    %559 = arith.mulf %558, %556 : vector<16x32xf32>
    %560 = arith.mulf %551, %417 : vector<16x32xf32>
    %561 = arith.addf %559, %560 : vector<16x32xf32>
    %cst_215 = arith.constant dense<0.000000e+00> : vector<16xf32>
    %562 = vector.multi_reduction <add>, %561, %cst_215 [1] : vector<16x32xf32> to vector<16xf32>
    %563 = vector.shape_cast %562 : vector<16xf32> to vector<16x1xf32>
    %cst_216 = arith.constant 3.200000e+01 : f32
    %564 = vector.broadcast %cst_216 : f32 to vector<16x1xf32>
    %565 = arith.divf %563, %564 : vector<16x1xf32>
    %566 = vector.broadcast %565 : vector<16x1xf32> to vector<16x32xf32>
    %567 = arith.subf %561, %566 : vector<16x32xf32>
    %568 = arith.mulf %567, %567 : vector<16x32xf32>
    %cst_217 = arith.constant dense<0.000000e+00> : vector<16xf32>
    %569 = vector.multi_reduction <add>, %568, %cst_217 [1] : vector<16x32xf32> to vector<16xf32>
    %570 = vector.shape_cast %569 : vector<16xf32> to vector<16x1xf32>
    %cst_218 = arith.constant 3.200000e+01 : f32
    %571 = vector.broadcast %cst_218 : f32 to vector<16x1xf32>
    %572 = arith.divf %570, %571 : vector<16x1xf32>
    %573 = vector.broadcast %565 : vector<16x1xf32> to vector<16x32xf32>
    %574 = arith.subf %561, %573 : vector<16x32xf32>
    %cst_219 = arith.constant 9.99999974E-6 : f32
    %575 = vector.broadcast %cst_219 : f32 to vector<16x1xf32>
    %576 = arith.addf %572, %575 : vector<16x1xf32>
    %577 = math.rsqrt %576 : vector<16x1xf32>
    %578 = vector.broadcast %577 : vector<16x1xf32> to vector<16x32xf32>
    %579 = arith.mulf %574, %578 : vector<16x32xf32>
    %580 = vector.broadcast %9 : vector<1x32xf32> to vector<16x32xf32>
    %581 = arith.mulf %579, %580 : vector<16x32xf32>
    %582 = vector.broadcast %10 : vector<1x32xf32> to vector<16x32xf32>
    %583 = arith.addf %581, %582 : vector<16x32xf32>
    %cst_220 = arith.constant dense<0.000000e+00> : vector<16x128xf32>
    %584 = tpu.matmul %583, %20, %cst_220 {dimension_numbers = #tpu.dot_dimension_numbers<[1], [0], [0], [1], [0, 0, 1, 1], [], []>} : vector<16x32xf32>, vector<32x128xf32>, vector<16x128xf32> -> vector<16x128xf32>
    %585 = vector.broadcast %13 : vector<1x128xf32> to vector<16x128xf32>
    %586 = arith.addf %584, %585 : vector<16x128xf32>
    %cst_221 = arith.constant 0.000000e+00 : f32
    %587 = vector.broadcast %cst_221 : f32 to vector<16x128xf32>
    %588 = arith.maximumf %586, %587 : vector<16x128xf32>
    %cst_222 = arith.constant dense<0.000000e+00> : vector<16x32xf32>
    %589 = tpu.matmul %588, %21, %cst_222 {dimension_numbers = #tpu.dot_dimension_numbers<[1], [0], [0], [1], [0, 0, 1, 1], [], []>} : vector<16x128xf32>, vector<128x32xf32>, vector<16x32xf32> -> vector<16x32xf32>
    %590 = vector.broadcast %14 : vector<1x32xf32> to vector<16x32xf32>
    %591 = arith.addf %589, %590 : vector<16x32xf32>
    %592 = arith.addf %561, %591 : vector<16x32xf32>
    %c0_223 = arith.constant 0 : index
    %c0_224 = arith.constant 0 : index
    %c0_225 = arith.constant 0 : index
    %593 = vector.load %arg11[%c0_223, %c0_224, %c0_225] : memref<1x16x32xf32, #tpu.memory_space<vmem>>, vector<1x16x32xf32>
    %594 = vector.shape_cast %593 : vector<1x16x32xf32> to vector<16x32xf32>
    %595 = vector.shape_cast %592 : vector<16x32xf32> to vector<1x16x32xf32>
    tpu.vector_store %arg11[%c0_223, %c0_224, %c0_225], %595 {strides = array<i32>} : memref<1x16x32xf32, #tpu.memory_space<vmem>>, vector<1x16x32xf32>,
    return
  }
  func.func @transform_0(%arg0: i32) -> (i32, i32, i32) {
    %c0_i32 = arith.constant 0 : i32
    %c0_i32_0 = arith.constant 0 : i32
    %c0_i32_1 = arith.constant 0 : i32
    return %arg0, %c0_i32, %c0_i32_0 : i32, i32, i32
  }
  func.func @transform_1(%arg0: i32) -> (i32, i32, i32) {
    %c0_i32 = arith.constant 0 : i32
    %c0_i32_0 = arith.constant 0 : i32
    %c0_i32_1 = arith.constant 0 : i32
    return %arg0, %c0_i32, %c0_i32_0 : i32, i32, i32
  }
  func.func @transform_2(%arg0: i32) -> (i32, i32) {
    %c0_i32 = arith.constant 0 : i32
    %c0_i32_0 = arith.constant 0 : i32
    %c0_i32_1 = arith.constant 0 : i32
    return %c0_i32, %c0_i32_0 : i32, i32
  }
  func.func @transform_3(%arg0: i32) -> (i32, i32) {
    %c0_i32 = arith.constant 0 : i32
    %c0_i32_0 = arith.constant 0 : i32
    %c0_i32_1 = arith.constant 0 : i32
    return %c0_i32, %c0_i32_0 : i32, i32
  }
  func.func @transform_4(%arg0: i32) -> (i32, i32) {
    %c0_i32 = arith.constant 0 : i32
    %c0_i32_0 = arith.constant 0 : i32
    %c0_i32_1 = arith.constant 0 : i32
    return %c0_i32, %c0_i32_0 : i32, i32
  }
  func.func @transform_5(%arg0: i32) -> (i32, i32) {
    %c0_i32 = arith.constant 0 : i32
    %c0_i32_0 = arith.constant 0 : i32
    %c0_i32_1 = arith.constant 0 : i32
    return %c0_i32, %c0_i32_0 : i32, i32
  }
  func.func @transform_6(%arg0: i32) -> (i32, i32) {
    %c0_i32 = arith.constant 0 : i32
    %c0_i32_0 = arith.constant 0 : i32
    %c0_i32_1 = arith.constant 0 : i32
    return %c0_i32, %c0_i32_0 : i32, i32
  }
  func.func @transform_7(%arg0: i32) -> (i32, i32) {
    %c0_i32 = arith.constant 0 : i32
    %c0_i32_0 = arith.constant 0 : i32
    %c0_i32_1 = arith.constant 0 : i32
    return %c0_i32, %c0_i32_0 : i32, i32
  }
  func.func @transform_8(%arg0: i32) -> (i32, i32) {
    %c0_i32 = arith.constant 0 : i32
    %c0_i32_0 = arith.constant 0 : i32
    %c0_i32_1 = arith.constant 0 : i32
    return %c0_i32, %c0_i32_0 : i32, i32
  }
  func.func @transform_9(%arg0: i32) -> (i32, i32) {
    %c0_i32 = arith.constant 0 : i32
    %c0_i32_0 = arith.constant 0 : i32
    %c0_i32_1 = arith.constant 0 : i32
    return %c0_i32, %c0_i32_0 : i32, i32
  }
  func.func @transform_10(%arg0: i32) -> (i32, i32, i32) {
    %c0_i32 = arith.constant 0 : i32
    %c0_i32_0 = arith.constant 0 : i32
    %c0_i32_1 = arith.constant 0 : i32
    return %arg0, %c0_i32, %c0_i32_0 : i32, i32, i32
  }
}

</mosaic_0001>

<bundles_post_ra>
// kernel: tpu_custom_call.1
= control target key start
LH: loop header
LB: loop body
LE: loop exit
PB: predicated region body
PF: predicated region fallthrough
CT: control target
= control target key end

     0   :  { %15 = vsyncpa [#allocation4], 0  ;;  %s8617_s0 = inlined_call_operand.vmem [shape: bf16[1,32,1024], index: 0, kind: input, shape index: {}]   ;;  %s8618_s1 = inlined_call_operand.hbm [shape: f32[1,16,32], index: 1, kind: input, shape index: {}]   ;;  %s8619_s2 = inlined_call_operand.vmem [shape: bf16[128,32], index: 2, kind: input, shape index: {}]   ;;  %s8620_s3 = inlined_call_operand.vmem [shape: f32[32,32], index: 3, kind: input, shape index: {}]   ;;  %s8621_s4 = inlined_call_operand.vmem [shape: f32[32,96], index: 4, kind: input, shape index: {}]   ;;  %s8622_s5 = inlined_call_operand.vmem [shape: f32[32,96], index: 5, kind: input, shape index: {}]   ;;  %s8623_s6 = inlined_call_operand.vmem [shape: f32[32,128], index: 6, kind: input, shape index: {}]   ;;  %s8624_s7 = inlined_call_operand.vmem [shape: f32[128,32], index: 7, kind: input, shape index: {}]   ;;  %s8625_s8 = inlined_call_operand.vmem [shape: f32[10,128], index: 8, kind: input, shape index: {}]   ;;  %s8626_s9 = inlined_call_operand.vmem [shape: f32[32,4], index: 9, kind: input, shape index: {}]   ;;  %s8627_s10 = inlined_call_operand.hbm [shape: f32[1,16,32], index: 10, kind: output, shape index: {}]  }
   0x1   :  { %16 = vsyncpa [#allocation5], 0  ;;  %s7006_s13 = smov [#allocation3]   ;;  %s6958_s17 = scalar_lea.hbm %s8618_s1, 256 }
   0x2   :  { %s24_s14 = sshll.u32 %s7006_s13, 4  ;;  %p6959_p0 = scmp.ne.s32.totalorder %s8618_s1, %s6958_s17  ;;  %s25_s14 = int_to_ptr.vmem [resolvable:$true] %s24_s14 }
   0x3   :  { %p6962_p1 = scmp.lt.u32.totalorder %s6958_s17, %s8618_s1 }
   0x5   :  { %p6964_p2 = pnand %p6962_p1, %p6959_p0 }
   0x7   :  { %6967 = shalt.err (!%p6964_p2)
}
   0x8   :  { %s6968_s22 = scalar_lea.vmem %s25_s14, 256  ;;  %p6973_p4 = scmp.lt.s32.totalorder %s25_s14, %s25_s14 }
   0x9   :  { %p6969_p3 = scmp.ne.s32.totalorder %s25_s14, %s6968_s22  ;;  %p6974_p5 = scmp.lt.s32.totalorder %s6968_s22, %s6968_s22 }
   0xb   :  { %p6975_p6 = por %p6974_p5, %p6973_p4 }
   0xd   :  { %p6976_p7 = pnand %p6975_p6, %p6969_p3 }
   0xf   :  { %6979 = shalt.err (!%p6976_p7)
}
  0x10   :  { %s7007_s23 = smov 128   ;;  %s7008_s24 = smov 8  }
  0x11   :  { %30 = dma.hbm_to_vmem [thread:$0]  %s8618_s1, 256, %s25_s14, [#allocation4], %s7007_s23, %s7007_s23, %s7008_s24  }
  0x12   :  { %7002 = dma.done.wait [#allocation4], 256  }
  0x13   :  { %7003 = vsyncadd [#allocation4], 4294967040  ;;  %v8628_v0 = vmov 0   ;;  %v113_v1 = vld [vmem:[%s8617_s0] sm:$0xff]  ;;  %v115_v3 = vld [vmem:[%s8617_s0 + $0x10] sm:$0xff]  ;;  %vm239_vm0 = vcmask 261120   ;;  %v1591_v42 = vlaneseq }
  0x14   :  { %278 = vmatprep.mubr.bf16.mxu1 %v8628_v0  ;;  %384 = vmatprep.mubr.bf16.mxu0 %v8628_v0  ;;  %v117_v2 = vld [vmem:[%s8617_s0 + $0x20] sm:$0xff]  ;;  %v119_v5 = vld [vmem:[%s8617_s0 + $0x30] sm:$0xff]  ;;  %v114_v16 = vld [vmem:[%s8617_s0 + $0x8] sm:$0xff]  ;;  %v7010_v34 = vmov 1   ;;  %v7011_v56 = vmov 2   ;;  %v7012_v57 = vmov 3  }
  0x15   :  { %6737 = vset.pattern.permute.xlu1 %v8628_v0  ;;  %6736 = vset.pattern.permute.xlu0 %v8628_v0  ;;  %v5873_v4 = vcombine.high %v113_v1, %v117_v2  ;;  %v5872_v6 = vcombine.low %v113_v1, %v117_v2  ;;  %v121_v7 = vld [vmem:[%s8617_s0 + $0x40] sm:$0xff]  ;;  %v5877_v9 = vcombine.high %v115_v3, %v119_v5  ;;  %v123_v12 = vld [vmem:[%s8617_s0 + $0x50] sm:$0xff]  ;;  %v118_v18 = vld [vmem:[%s8617_s0 + $0x28] sm:$0xff]  ;;  %v1592_v43 = vshrl.u32 %v1591_v42, 7  ;;  %s7015_s17 = smov 32   ;;  %s7016_s18 = smov 96  }
  0x16   :  { %v125_v8 = vld [vmem:[%s8617_s0 + $0x60] sm:$0xff]  ;;  %v5876_v10 = vcombine.low %v115_v3, %v119_v5  ;;  %v127_v13 = vld [vmem:[%s8617_s0 + $0x70] sm:$0xff]  ;;  %v5875_v20 = vcombine.high %v114_v16, %v118_v18  ;;  %v122_v21 = vld [vmem:[%s8617_s0 + $0x48] sm:$0xff]  ;;  %v5874_v25 = vcombine.low %v114_v16, %v118_v18  ;;  %s7017_s22 = smov [#allocation6]  }
  0x17   :  { %v5881_v11 = vcombine.high %v121_v7, %v125_v8  ;;  %246 = vmatprep.subr.bf16.mxu1 %v5873_v4  ;;  %v5885_v14 = vcombine.high %v123_v12, %v127_v13  ;;  %352 = vmatprep.subr.bf16.mxu0 %v5877_v9  ;;  %v5880_v15 = vcombine.low %v121_v7, %v125_v8  ;;  %v6746_v19 = vld [vmem:[%s8619_s2] sm:$0xff]   ;;  %v126_v22 = vld [vmem:[%s8617_s0 + $0x68] sm:$0xff]  ;;  %v7134_v23 = vld [vmem:[%s8626_s9 + $0x10] sm:$0xff]  ;;  %v1593_v44 = vsub.s32 0, %v1592_v43  ;;  %s5858_s25 = sshll.u32 %s7017_s22, 4  ;;  %s5859_s25 = int_to_ptr.vmem [resolvable:$true] %s5858_s25 }
  0x18   :  { %247 = vmatpush1.bf16.msra.mxu1 %v5872_v6  ;;  %353 = vmatpush1.bf16.msra.mxu0 %v5876_v10  ;;  %v5884_v17 = vcombine.low %v123_v12, %v127_v13  ;;  %v7139_v24 = vld [vmem:[%s8626_s9] sm:$0xff]  ;;  %v116_v26 = vld [vmem:[%s8617_s0 + $0x18] sm:$0xff]  ;;  %v5883_v29 = vcombine.high %v122_v21, %v126_v22  ;;  %v7157_v30 = vld [vmem:[%s8626_s9 + $0x8] sm:$0xff]  ;;  %v5882_v31 = vcombine.low %v122_v21, %v126_v22  ;;  %p6985_p9 = scmp.lt.s32.totalorder %s5859_s25, %s5859_s25 }
  0x19   :  { %248 = vmatprep.subr.bf16.mxu1 %v5881_v11  ;;  %354 = vmatprep.subr.bf16.mxu0 %v5885_v14  ;;  %v120_v27 = vld [vmem:[%s8617_s0 + $0x38] sm:$0xff]  ;;  %v6747_v33 = vld [vmem:[%s8619_s2 + $0x8] sm:$0xff]   ;;  %v1589_v48 = vld [vmem:[#allocation3] sm:$0xff] }
  0x1a   :  { %141 = vperm.xlu1 %6737, %v7134_v23   ;;  %v7151_v28 = vld [vmem:[%s8626_s9 + $0x18] sm:$0xff]  ;;  %131 = vperm.xlu0 %6736, %v7139_v24   ;;  %v5879_v32 = vcombine.high %v116_v26, %v120_v27  ;;  %v80_v37 = vld [vmem:[%s8625_s8 + $0x9] sm:$0x1]  ;;  %v5878_v38 = vcombine.low %v116_v26, %v120_v27  ;;  %v5926_v50 = vld [vmem:[%s8625_s8 + $0x8] ss:$0 sm:$0xff] }
  0x1b   :  { %v124_v35 = vld [vmem:[%s8617_s0 + $0x58] sm:$0xff]  ;;  %v1587_v40 = vmul.f32 1.442695, %v80_v37  ;;  %v1590_v47 = vld [vmem:[#allocation3 + $0x8] sm:$0xff] }
  0x1c   :  { %249 = vmatpush1.bf16.msra.mxu1 %v5880_v15  ;;  %355 = vmatpush1.bf16.msra.mxu0 %v5884_v17  ;;  %v128_v36 = vld [vmem:[%s8617_s0 + $0x78] sm:$0xff] }
  0x1d   :  { %299 = vmatprep.subr.bf16.mxu1 %v5875_v20  ;;  %v5887_v39 = vcombine.high %v124_v35, %v128_v36  ;;  %v5886_v41 = vcombine.low %v124_v35, %v128_v36  ;;  %6754 = vpow2.f32 %v1587_v40 }
  0x1e   :  { %146 = vperm.xlu1 %6737, %v7151_v28   ;;  %136 = vperm.xlu0 %6736, %v7157_v30  }
  0x1f   :  { %5888 = vmatmul.mubr.msk.bf16.vlgmr.msra.gmra.mrb[0].mxu1 %vm239_vm0, %v6746_v19  ;;  %5892 = vmatmul.mubr.msk.bf16.vlgmr.msra.gmra.mrb[0].mxu0 %vm239_vm0, %v6746_v19 }
  0x20   :  { %288 = vmatprep.mubr.bf16.mxu1 %v8628_v0  ;;  %394 = vmatprep.mubr.bf16.mxu0 %v8628_v0 }
  0x21   :  { %300 = vmatpush1.bf16.msra.mxu1 %v5874_v25 }
  0x22   :  { %301 = vmatprep.subr.bf16.mxu1 %v5883_v29  ;;  %6739 = vset.pattern.permute.xlu1 %v7010_v34 }
  0x23   :  { %575 = vperm.xlu1 %6739, %v7157_v30   ;;  %6738 = vset.pattern.permute.xlu0 %v7010_v34 }
  0x24   :  { %571 = vperm.xlu0 %6738, %v7139_v24  }
  0x25   :  { %302 = vmatpush1.bf16.msra.mxu1 %v5882_v31 }
  0x26   :  { %405 = vmatprep.subr.bf16.mxu1 %v5879_v32 }
  0x27   :  { %5889 = vmatmul.mubr.msk.bf16.gmra.mrb[4].mxu1 %vm239_vm0, %v6747_v33  ;;  %5893 = vmatmul.mubr.msk.bf16.gmra.mrb[4].mxu0 %vm239_vm0, %v6747_v33  ;;  %v6755_v45 = vpop.eup %6754 }
  0x28   :  { %331 = vmatprep.mubr.bf16.mxu1 %v8628_v0  ;;  %634 = vmatprep.mubr.bf16.mxu0 %v8628_v0  ;;  %v1594_v46 = vrot.slane %v6755_v45, %v1593_v44 }
  0x29   :  { %579 = vperm.xlu1 %6739, %v7134_v23   ;;  %583 = vperm.xlu0 %6738, %v7151_v28  }
  0x2a   :  { %v1596_v49 = vmul.f32 %v1594_v46, %v1590_v47  ;;  %v1595_v51 = vmul.f32 %v1594_v46, %v1589_v48 }
  0x2c   :  { %v7194_v52 = vadd.f32 %v5926_v50, %v1596_v49  ;;  %v7197_v53 = vadd.f32 %v5926_v50, %v1595_v51 }
  0x2d   :  { %6741 = vset.pattern.permute.xlu1 %v7011_v56  ;;  %6740 = vset.pattern.permute.xlu0 %v7011_v56 }
  0x2e   :  { %8681 = vst [vmem:[#allocation9_spill] sm:$0xff] %v7194_v52  ;;  %8682 = vst [vmem:[#allocation10_spill] sm:$0xff] %v7197_v53  ;;  %v1606_v54 = vsel %vm239_vm0, %v7194_v52, 0.0  ;;  %v1603_v55 = vsel %vm239_vm0, %v7197_v53, 0.0 }
  0x2f   :  { %5890 = vmatmul.mubr.msk.bf16.vlgmr.msra.gmra.mrb[8].mxu1 %vm239_vm0, %v6746_v19 }
  0x30   :  { %341 = vmatprep.mubr.bf16.mxu1 %v8628_v0  ;;  %406 = vmatpush1.bf16.msra.mxu1 %v5878_v38 }
  0x31   :  { %407 = vmatprep.subr.bf16.mxu1 %v5887_v39 }
  0x34   :  { %408 = vmatpush1.bf16.msra.mxu1 %v5886_v41 }
  0x37   :  { %5891 = vmatmul.mubr.msk.bf16.gmra.mrb[12].mxu1 %vm239_vm0, %v6747_v33 }
  0x38   :  { %437 = vmatprep.mubr.bf16.mxu1 %v8628_v0 }
  0x3f   :  { %5894 = vmatmul.mubr.msk.bf16.vlgmr.msra.gmra.mrb[16].mxu1 %vm239_vm0, %v6746_v19 }
  0x40   :  { %447 = vmatprep.mubr.bf16.mxu1 %v8628_v0 }
  0x47   :  { %5895 = vmatmul.mubr.msk.bf16.gmra.mrb[20].mxu1 %vm239_vm0, %v6747_v33 }
  0x48   :  { %687 = vmatprep.mubr.bf16.mxu1 %v8628_v0  ;;  %1607 = vadd.xlane.f32.xlu0 %v1606_v54 }
  0x4d   :  { %1604 = vadd.xlane.f32.xlu1 %v1603_v55 }
  0x5e   :  { %1092 = vperm.xlu1 %6741, %v7157_v30   ;;  %1088 = vperm.xlu0 %6740, %v7139_v24  }
  0x62   :  { %6742 = vset.pattern.permute.xlu1 %v7012_v57  ;;  %6745 = vset.pattern.permute.xlu0 %v7012_v57 }
  0x63   :  { %1136 = vperm.xlu1 %6742, %v7139_v24  }
  0x67   :  { %1140 = vperm.xlu1 %6742, %v7157_v30  }
  0x6b   :  { %6743 = vset.pattern.permute.xlu1 %v7011_v56 }
  0x6c   :  { %1096 = vperm.xlu1 %6743, %v7134_v23  }
  0x70   :  { %1100 = vperm.xlu1 %6743, %v7151_v28  }
  0x74   :  { %6744 = vset.pattern.permute.xlu1 %v7012_v57 }
  0x75   :  { %1144 = vperm.xlu1 %6744, %v7134_v23  }
  0x79   :  { %1148 = vperm.xlu1 %6744, %v7151_v28  }
  0x99   :  { %v7212_v58 = vpop.permute.xlu0 %131  ;;  %v7214_v59 = vpop.permute.xlu1 %141 }
  0x9d   :  { %v7216_v60 = vpop.permute.xlu0 %136  ;;  %v7218_v61 = vpop.permute.xlu1 %146 }
  0xa2   :  { %v7222_v63 = vpop.permute.xlu1 %575 }
  0xa3   :  { %v7220_v62 = vpop.permute.xlu0 %571 }
  0xa8   :  { %v7224_v1 = vpop.permute.xlu0 %583  ;;  %v7226_v2 = vpop.permute.xlu1 %579 }
  0xd5   :  { %v1608_v3 = vpop.xlane.xlu0 %1607 }
  0xd6   :  { %v1610_v4 = vmul.f32 0.03125, %v1608_v3 }
  0xd8   :  { %v7229_v7 = vsub.f32 %v7194_v52, %v1610_v4 }
  0xda   :  { %v1605_v5 = vpop.xlane.xlu1 %1604  ;;  %8683 = vst [vmem:[#allocation11_spill] sm:$0xff] %v7229_v7  ;;  %v1614_v9 = vmul.f32 %v7229_v7, %v7229_v7 }
  0xdb   :  { %v1609_v6 = vmul.f32 0.03125, %v1605_v5 }
  0xdc   :  { %v1618_v11 = vsel %vm239_vm0, %v1614_v9, 0.0 }
  0xdd   :  { %v7232_v8 = vsub.f32 %v7197_v53, %v1609_v6  ;;  %1619 = vadd.xlane.f32.xlu0 %v1618_v11 }
  0xdf   :  { %v1613_v10 = vmul.f32 %v7232_v8, %v7232_v8 }
  0xe1   :  { %v1615_v12 = vsel %vm239_vm0, %v1613_v10, 0.0 }
  0xe2   :  { %1616 = vadd.xlane.f32.xlu1 %v1615_v12 }
  0xf2   :  { %v280_v13 = vpop.f32.mrb[0].mxu1  ;;  %v386_v15 = vpop.f32.mrb[0].mxu0 }
  0xf3   :  { %v281_v14 = vadd.f32 %v280_v13, %v7212_v58  ;;  %v282_v16 = vpop.f32.mrb[1].mxu1  ;;  %v387_v17 = vadd.f32 %v386_v15, %v7212_v58  ;;  %v388_v19 = vpop.f32.mrb[1].mxu0 }
  0xf4   :  { %v283_v18 = vadd.f32 %v282_v16, %v7212_v58  ;;  %v284_v20 = vpop.f32.mrb[2].mxu1  ;;  %v389_v22 = vadd.f32 %v388_v19, %v7212_v58  ;;  %v390_v24 = vpop.f32.mrb[2].mxu0 }
  0xf5   :  { %vm458_vm1 = vcmp.gt.f32.partialorder %v281_v14, 0.0  ;;  %v490_v21 = vmul.f32 0.01, %v281_v14  ;;  %v285_v23 = vadd.f32 %v284_v20, %v7216_v60  ;;  %v286_v25 = vpop.f32.mrb[3].mxu1  ;;  %vm462_vm2 = vcmp.gt.f32.partialorder %v387_v17, 0.0  ;;  %v392_v29 = vpop.f32.mrb[3].mxu0 }
  0xf6   :  { %v494_v26 = vmul.f32 0.01, %v387_v17  ;;  %vm459_vm3 = vcmp.gt.f32.partialorder %v283_v18, 0.0  ;;  %v491_v27 = vmul.f32 0.01, %v283_v18  ;;  %vm463_vm5 = vcmp.gt.f32.partialorder %v389_v22, 0.0 }
  0xf7   :  { %v495_v28 = vmul.f32 0.01, %v389_v22  ;;  %vm466_vm4 = vcmp.gt.f32.partialorder %v285_v23, 0.0  ;;  %v498_v30 = vmul.f32 0.01, %v285_v23  ;;  %v391_v31 = vadd.f32 %v390_v24, %v7216_v60 }
  0xf8   :  { %v287_v32 = vadd.f32 %v286_v25, %v7216_v60  ;;  %v522_v33 = vsel %vm458_vm1, %v281_v14, %v490_v21  ;;  %v7248_v34 = vsel %vm462_vm2, %v387_v17, %v494_v26  ;;  %v393_v35 = vadd.f32 %v392_v29, %v7216_v60 }
  0xf9   :  { %v523_v36 = vsel %vm459_vm3, %v283_v18, %v491_v27  ;;  %v530_v37 = vsel %vm466_vm4, %v285_v23, %v498_v30  ;;  %vm470_vm6 = vcmp.gt.f32.partialorder %v391_v31, 0.0  ;;  %v502_v38 = vmul.f32 0.01, %v391_v31 }
  0xfa   :  { %vm467_vm7 = vcmp.gt.f32.partialorder %v287_v32, 0.0  ;;  %v290_v39 = vpop.f32.mrb[4].mxu1  ;;  %v554_v40 = vpack.c.bf16 %v530_v37, %v522_v33  ;;  %v499_v41 = vmul.f32 0.01, %v287_v32  ;;  %vm471_vm8 = vcmp.gt.f32.partialorder %v393_v35, 0.0  ;;  %v396_v42 = vpop.f32.mrb[4].mxu0 }
  0xfb   :  { %v7252_v43 = vsel %vm463_vm5, %v389_v22, %v495_v28  ;;  %v7254_v44 = vsel %vm470_vm6, %v391_v31, %v502_v38  ;;  %v503_v45 = vmul.f32 0.01, %v393_v35  ;;  %v291_v46 = vadd.f32 %v290_v39, %v7214_v59  ;;  %v292_v48 = vpop.f32.mrb[5].mxu1  ;;  %v398_v49 = vpop.f32.mrb[5].mxu0 }
  0xfc   :  { %v397_v47 = vadd.f32 %v396_v42, %v7214_v59  ;;  %v558_v50 = vpack.c.bf16 %v7254_v44, %v7248_v34  ;;  %v293_v51 = vadd.f32 %v292_v48, %v7214_v59  ;;  %v399_v54 = vadd.f32 %v398_v49, %v7214_v59  ;;  %v294_v55 = vpop.f32.mrb[6].mxu1  ;;  %v400_v56 = vpop.f32.mrb[6].mxu0  ;;  %v7300_v34 = vld [vmem:[%s8619_s2 + $0x18] sm:$0xff]  }
  0xfd   :  { %v531_v57 = vsel %vm467_vm7, %v287_v32, %v499_v41  ;;  %vm474_vm9 = vcmp.gt.f32.partialorder %v291_v46, 0.0  ;;  %v506_v3 = vmul.f32 0.01, %v291_v46  ;;  %v295_v11 = vadd.f32 %v294_v55, %v7218_v61  ;;  %v296_v13 = vpop.f32.mrb[7].mxu1  ;;  %v402_v14 = vpop.f32.mrb[7].mxu0 }
  0xfe   :  { %vm478_vm10 = vcmp.gt.f32.partialorder %v397_v47, 0.0  ;;  %v510_v4 = vmul.f32 0.01, %v397_v47  ;;  %vm475_vm11 = vcmp.gt.f32.partialorder %v293_v51, 0.0  ;;  %v507_v5 = vmul.f32 0.01, %v293_v51 }
  0xff   :  { %vm479_vm12 = vcmp.gt.f32.partialorder %v399_v54, 0.0  ;;  %v511_v6 = vmul.f32 0.01, %v399_v54  ;;  %v538_v9 = vsel %vm474_vm9, %v291_v46, %v506_v3  ;;  %v401_v12 = vadd.f32 %v400_v56, %v7218_v61 }
 0x100   :  { %v7263_v10 = vsel %vm478_vm10, %v397_v47, %v510_v4  ;;  %v297_v15 = vadd.f32 %v296_v13, %v7218_v61  ;;  %v403_v16 = vadd.f32 %v402_v14, %v7218_v61  ;;  %v555_v17 = vpack.c.bf16 %v531_v57, %v523_v36  ;;  %v7284_v47 = vld [vmem:[%s8619_s2 + $0x10] sm:$0xff]  }
 0x101   :  { %v539_v18 = vsel %vm475_vm11, %v293_v51, %v507_v5  ;;  %vm482_vm13 = vcmp.gt.f32.partialorder %v295_v11, 0.0  ;;  %v514_v19 = vmul.f32 0.01, %v295_v11  ;;  %vm486_vm14 = vcmp.gt.f32.partialorder %v401_v12, 0.0 }
 0x102   :  { %v518_v20 = vmul.f32 0.01, %v401_v12  ;;  %vm483_vm15 = vcmp.gt.f32.partialorder %v297_v15, 0.0  ;;  %v515_v21 = vmul.f32 0.01, %v297_v15  ;;  %vm487_vm1 = vcmp.gt.f32.partialorder %v403_v16, 0.0  ;;  %602 = vmatprep.subr.bf16.mxu0 %v555_v17 }
 0x103   :  { %v519_v22 = vmul.f32 0.01, %v403_v16  ;;  %v546_v23 = vsel %vm482_vm13, %v295_v11, %v514_v19  ;;  %603 = vmatpush1.bf16.msra.mxu0 %v554_v40  ;;  %v333_v25 = vpop.f32.mrb[8].mxu1  ;;  %v535_v26 = vsel %vm471_vm8, %v393_v35, %v503_v45  ;;  %v543_v27 = vsel %vm479_vm12, %v399_v54, %v511_v6 }
 0x104   :  { %v7269_v24 = vsel %vm486_vm14, %v401_v12, %v518_v20  ;;  %v562_v28 = vpack.c.bf16 %v546_v23, %v538_v9  ;;  %v334_v30 = vadd.f32 %v333_v25, %v7212_v58  ;;  %v335_v31 = vpop.f32.mrb[9].mxu1  ;;  %v547_v32 = vsel %vm483_vm15, %v297_v15, %v515_v21 }
 0x105   :  { %v566_v29 = vpack.c.bf16 %v7269_v24, %v7263_v10  ;;  %v336_v33 = vadd.f32 %v335_v31, %v7212_v58  ;;  %v337_v36 = vpop.f32.mrb[10].mxu1  ;;  %v563_v37 = vpack.c.bf16 %v547_v32, %v539_v18  ;;  %v559_v38 = vpack.c.bf16 %v535_v26, %v7252_v43 }
 0x106   :  { %v551_v39 = vsel %vm487_vm1, %v403_v16, %v519_v22  ;;  %v492_v40 = vmul.f32 0.01, %v334_v30  ;;  %v338_v35 = vadd.f32 %v337_v36, %v7216_v60  ;;  %v339_v41 = vpop.f32.mrb[11].mxu1  ;;  %vm460_vm2 = vcmp.gt.f32.partialorder %v334_v30, 0.0 }
 0x107   :  { %v567_v42 = vpack.c.bf16 %v551_v39, %v543_v27  ;;  %v493_v45 = vmul.f32 0.01, %v336_v33  ;;  %v340_v46 = vadd.f32 %v339_v41, %v7216_v60  ;;  %604 = vmatprep.subr.bf16.mxu0 %v563_v37  ;;  %vm461_vm3 = vcmp.gt.f32.partialorder %v336_v33, 0.0 }
 0x108   :  { %vm468_vm4 = vcmp.gt.f32.partialorder %v338_v35, 0.0  ;;  %v500_v43 = vmul.f32 0.01, %v338_v35  ;;  %605 = vmatpush1.bf16.msra.mxu0 %v562_v28  ;;  %v524_v51 = vsel %vm460_vm2, %v334_v30, %v492_v40 }
 0x109   :  { %vm469_vm5 = vcmp.gt.f32.partialorder %v340_v46, 0.0  ;;  %v501_v48 = vmul.f32 0.01, %v340_v46  ;;  %708 = vmatprep.subr.bf16.mxu0 %v559_v38  ;;  %v525_v5 = vsel %vm461_vm3, %v336_v33, %v493_v45  ;;  %vm1812_vm3 = vcmask 1043456  }
 0x10a   :  { %v343_v49 = vpop.f32.mrb[12].mxu1  ;;  %v532_v54 = vsel %vm468_vm4, %v338_v35, %v500_v43 }
 0x10b   :  { %v344_v55 = vadd.f32 %v343_v49, %v7214_v59  ;;  %v345_v56 = vpop.f32.mrb[13].mxu1  ;;  %v556_v57 = vpack.c.bf16 %v532_v54, %v524_v51  ;;  %5898 = vmatmul.mubr.msk.bf16.vlgmr.msra.gmra.mrb[8].mxu0 %vm239_vm0, %v7284_v47  ;;  %v533_v6 = vsel %vm469_vm5, %v340_v46, %v501_v48 }
 0x10c   :  { %v346_v3 = vadd.f32 %v345_v56, %v7214_v59  ;;  %v347_v4 = vpop.f32.mrb[14].mxu1  ;;  %709 = vmatpush1.bf16.msra.mxu0 %v558_v50  ;;  %v557_v12 = vpack.c.bf16 %v533_v6, %v525_v5  ;;  %644 = vmatprep.mubr.bf16.mxu0 %v8628_v0 }
 0x10d   :  { %v508_v9 = vmul.f32 0.01, %v344_v55  ;;  %v348_v10 = vadd.f32 %v347_v4, %v7218_v61  ;;  %v349_v11 = vpop.f32.mrb[15].mxu1  ;;  %vm476_vm6 = vcmp.gt.f32.partialorder %v344_v55, 0.0  ;;  %710 = vmatprep.subr.bf16.mxu0 %v567_v42 }
 0x10e   :  { %v509_v13 = vmul.f32 0.01, %v346_v3  ;;  %v350_v14 = vadd.f32 %v349_v11, %v7218_v61  ;;  %vm477_vm7 = vcmp.gt.f32.partialorder %v346_v3, 0.0  ;;  %655 = vmatprep.subr.bf16.mxu1 %v557_v12 }
 0x10f   :  { %vm484_vm8 = vcmp.gt.f32.partialorder %v348_v10, 0.0  ;;  %v516_v15 = vmul.f32 0.01, %v348_v10  ;;  %656 = vmatpush1.bf16.msra.mxu1 %v556_v57  ;;  %v540_v44 = vsel %vm476_vm6, %v344_v55, %v508_v9 }
 0x110   :  { %vm485_vm9 = vcmp.gt.f32.partialorder %v350_v14, 0.0  ;;  %v517_v16 = vmul.f32 0.01, %v350_v14  ;;  %711 = vmatpush1.bf16.msra.mxu0 %v566_v29  ;;  %v541_v19 = vsel %vm477_vm7, %v346_v3, %v509_v13 }
 0x111   :  { %v548_v50 = vsel %vm484_vm8, %v348_v10, %v516_v15 }
 0x112   :  { %v564_v17 = vpack.c.bf16 %v548_v50, %v540_v44  ;;  %v439_v18 = vpop.f32.mrb[16].mxu1  ;;  %v549_v20 = vsel %vm485_vm9, %v350_v14, %v517_v16 }
 0x113   :  { %v440_v21 = vadd.f32 %v439_v18, %v7212_v58  ;;  %v441_v22 = vpop.f32.mrb[17].mxu1  ;;  %v565_v23 = vpack.c.bf16 %v549_v20, %v541_v19  ;;  %5899 = vmatmul.mubr.msk.bf16.gmra.mrb[12].mxu0 %vm239_vm0, %v7300_v34 }
 0x114   :  { %v442_v24 = vadd.f32 %v441_v22, %v7212_v58  ;;  %v443_v25 = vpop.f32.mrb[18].mxu1  ;;  %740 = vmatprep.mubr.bf16.mxu0 %v8628_v0 }
 0x115   :  { %v496_v26 = vmul.f32 0.01, %v440_v21  ;;  %v444_v27 = vadd.f32 %v443_v25, %v7216_v60  ;;  %v445_v28 = vpop.f32.mrb[19].mxu1  ;;  %657 = vmatprep.subr.bf16.mxu1 %v565_v23  ;;  %vm464_vm10 = vcmp.gt.f32.partialorder %v440_v21, 0.0 }
 0x116   :  { %v497_v29 = vmul.f32 0.01, %v442_v24  ;;  %v446_v30 = vadd.f32 %v445_v28, %v7216_v60  ;;  %658 = vmatpush1.bf16.msra.mxu1 %v564_v17  ;;  %vm465_vm11 = vcmp.gt.f32.partialorder %v442_v24, 0.0 }
 0x117   :  { %vm472_vm12 = vcmp.gt.f32.partialorder %v444_v27, 0.0  ;;  %v504_v31 = vmul.f32 0.01, %v444_v27  ;;  %v528_v33 = vsel %vm464_vm10, %v440_v21, %v496_v26 }
 0x118   :  { %vm473_vm13 = vcmp.gt.f32.partialorder %v446_v30, 0.0  ;;  %v505_v32 = vmul.f32 0.01, %v446_v30  ;;  %v529_v38 = vsel %vm465_vm11, %v442_v24, %v497_v29 }
 0x119   :  { %v536_v58 = vsel %vm472_vm12, %v444_v27, %v504_v31  ;;  %5900 = vmatmul.mubr.msk.bf16.vlgmr.msra.gmra.mrb[24].mxu1 %vm239_vm0, %v7284_v47 }
 0x11a   :  { %v560_v36 = vpack.c.bf16 %v536_v58, %v528_v33  ;;  %v449_v37 = vpop.f32.mrb[20].mxu1  ;;  %v537_v39 = vsel %vm473_vm13, %v446_v30, %v505_v32  ;;  %697 = vmatprep.mubr.bf16.mxu1 %v8628_v0 }
 0x11b   :  { %v450_v40 = vadd.f32 %v449_v37, %v7214_v59  ;;  %v451_v60 = vpop.f32.mrb[21].mxu1  ;;  %v561_v35 = vpack.c.bf16 %v537_v39, %v529_v38  ;;  %5902 = vmatmul.mubr.msk.bf16.vlgmr.msra.gmra.mrb[16].mxu0 %vm239_vm0, %v7284_v47 }
 0x11c   :  { %v452_v41 = vadd.f32 %v451_v60, %v7214_v59  ;;  %v453_v42 = vpop.f32.mrb[22].mxu1  ;;  %750 = vmatprep.mubr.bf16.mxu0 %v8628_v0 }
 0x11d   :  { %v512_v45 = vmul.f32 0.01, %v450_v40  ;;  %v454_v46 = vadd.f32 %v453_v42, %v7218_v61  ;;  %v455_v43 = vpop.f32.mrb[23].mxu1  ;;  %761 = vmatprep.subr.bf16.mxu1 %v561_v35  ;;  %vm480_vm14 = vcmp.gt.f32.partialorder %v450_v40, 0.0 }
 0x11e   :  { %v513_v48 = vmul.f32 0.01, %v452_v41  ;;  %v456_v49 = vadd.f32 %v455_v43, %v7218_v61  ;;  %762 = vmatpush1.bf16.msra.mxu1 %v560_v36  ;;  %vm481_vm15 = vcmp.gt.f32.partialorder %v452_v41, 0.0 }
 0x11f   :  { %vm488_vm1 = vcmp.gt.f32.partialorder %v454_v46, 0.0  ;;  %v520_v51 = vmul.f32 0.01, %v454_v46  ;;  %v544_v55 = vsel %vm480_vm14, %v450_v40, %v512_v45 }
 0x120   :  { %vm489_vm2 = vcmp.gt.f32.partialorder %v456_v49, 0.0  ;;  %v521_v54 = vmul.f32 0.01, %v456_v49  ;;  %v545_v57 = vsel %vm481_vm15, %v452_v41, %v513_v48 }
 0x121   :  { %v552_v59 = vsel %vm488_vm1, %v454_v46, %v520_v51  ;;  %5901 = vmatmul.mubr.msk.bf16.gmra.mrb[28].mxu1 %vm239_vm0, %v7300_v34 }
 0x122   :  { %v568_v56 = vpack.c.bf16 %v552_v59, %v544_v55  ;;  %v553_v3 = vsel %vm489_vm2, %v456_v49, %v521_v54  ;;  %793 = vmatprep.mubr.bf16.mxu1 %v8628_v0 }
 0x123   :  { %v569_v4 = vpack.c.bf16 %v553_v3, %v545_v57  ;;  %5903 = vmatmul.mubr.msk.bf16.gmra.mrb[20].mxu0 %vm239_vm0, %v7300_v34 }
 0x124   :  { %1263 = vmatprep.mubr.bf16.mxu0 %v8628_v0 }
 0x125   :  { %763 = vmatprep.subr.bf16.mxu1 %v569_v4 }
 0x126   :  { %764 = vmatpush1.bf16.msra.mxu1 %v568_v56 }
 0x129   :  { %5904 = vmatmul.mubr.msk.bf16.vlgmr.msra.gmra.mrb[32].mxu1 %vm239_vm0, %v7284_v47 }
 0x12a   :  { %803 = vmatprep.mubr.bf16.mxu1 %v8628_v0 }
 0x131   :  { %5905 = vmatmul.mubr.msk.bf16.gmra.mrb[36].mxu1 %vm239_vm0, %v7300_v34 }
 0x132   :  { %1336 = vmatprep.mubr.bf16.mxu1 %v8628_v0 }
 0x1de   :  { %v636_v61 = vpop.f32.mrb[8].mxu0 }
 0x1df   :  { %v638_v5 = vpop.f32.mrb[9].mxu0  ;;  %v7332_v9 = vadd.f32 %v636_v61, %v7220_v62 }
 0x1e0   :  { %v640_v6 = vpop.f32.mrb[10].mxu0  ;;  %v7338_v12 = vadd.f32 %v638_v5, %v7220_v62 }
 0x1e1   :  { %v7335_v10 = vadd.f32 %v640_v6, %v7222_v63  ;;  %v642_v11 = vpop.f32.mrb[11].mxu0 }
 0x1e2   :  { %v7341_v47 = vadd.f32 %v642_v11, %v7222_v63 }
 0x1e3   :  { %v814_v13 = vadd.f32 %v7335_v10, %v7332_v9 }
 0x1e4   :  { %v823_v14 = vadd.f32 %v7341_v47, %v7338_v12 }
 0x1e6   :  { %v646_v15 = vpop.f32.mrb[12].mxu0 }
 0x1e7   :  { %v7348_v16 = vadd.f32 %v646_v15, %v7226_v2  ;;  %v648_v34 = vpop.f32.mrb[13].mxu0 }
 0x1e8   :  { %v7351_v44 = vadd.f32 %v648_v34, %v7226_v2  ;;  %v650_v50 = vpop.f32.mrb[14].mxu0 }
 0x1e9   :  { %v815_v17 = vadd.f32 %v814_v13, %v7348_v16  ;;  %v7355_v18 = vadd.f32 %v650_v50, %v7224_v1  ;;  %v652_v19 = vpop.f32.mrb[15].mxu0 }
 0x1ea   :  { %v824_v20 = vadd.f32 %v823_v14, %v7351_v44  ;;  %v7359_v21 = vadd.f32 %v652_v19, %v7224_v1 }
 0x1eb   :  { %v816_v22 = vadd.f32 %v815_v17, %v7355_v18 }
 0x1ec   :  { %v689_v23 = vpop.f32.mrb[24].mxu1  ;;  %v825_v24 = vadd.f32 %v824_v20, %v7359_v21 }
 0x1ed   :  { %v691_v25 = vpop.f32.mrb[25].mxu1  ;;  %v817_v26 = vrot.slane %v816_v22, 4  ;;  %v7364_v29 = vadd.f32 %v689_v23, %v7220_v62 }
 0x1ee   :  { %v693_v27 = vpop.f32.mrb[26].mxu1  ;;  %v826_v28 = vrot.slane %v825_v24, 4  ;;  %v742_v30 = vpop.f32.mrb[16].mxu0  ;;  %v7370_v58 = vadd.f32 %v691_v25, %v7220_v62 }
 0x1ef   :  { %v7367_v31 = vadd.f32 %v693_v27, %v7222_v63  ;;  %v695_v32 = vpop.f32.mrb[27].mxu1  ;;  %v818_v33 = vadd.f32 %v817_v26, %v816_v22  ;;  %v744_v36 = vpop.f32.mrb[17].mxu0  ;;  %v7378_v35 = vadd.f32 %v742_v30, %v7220_v62 }
 0x1f0   :  { %v7373_v37 = vadd.f32 %v695_v32, %v7222_v63  ;;  %v827_v38 = vadd.f32 %v826_v28, %v825_v24  ;;  %v746_v40 = vpop.f32.mrb[18].mxu0  ;;  %v7386_v43 = vadd.f32 %v744_v36, %v7220_v62 }
 0x1f1   :  { %v832_v39 = vadd.f32 %v7367_v31, %v7364_v29  ;;  %v819_v60 = vrot.slane %v818_v33, 2  ;;  %v7381_v41 = vadd.f32 %v746_v40, %v7222_v63  ;;  %v748_v45 = vpop.f32.mrb[19].mxu0 }
 0x1f2   :  { %v841_v42 = vadd.f32 %v7373_v37, %v7370_v58  ;;  %v828_v46 = vrot.slane %v827_v38, 2  ;;  %v7389_v48 = vadd.f32 %v748_v45, %v7222_v63 }
 0x1f3   :  { %v820_v49 = vadd.f32 %v819_v60, %v818_v33  ;;  %v850_v51 = vadd.f32 %v7381_v41, %v7378_v35 }
 0x1f4   :  { %v699_v54 = vpop.f32.mrb[28].mxu1  ;;  %v829_v55 = vadd.f32 %v828_v46, %v827_v38  ;;  %v859_v59 = vadd.f32 %v7389_v48, %v7386_v43 }
 0x1f5   :  { %v7396_v56 = vadd.f32 %v699_v54, %v7226_v2  ;;  %v701_v57 = vpop.f32.mrb[29].mxu1  ;;  %v821_v3 = vrot.slane %v820_v49, 1 }
 0x1f6   :  { %v7399_v4 = vadd.f32 %v701_v57, %v7226_v2  ;;  %v703_v61 = vpop.f32.mrb[30].mxu1  ;;  %v830_v5 = vrot.slane %v829_v55, 1  ;;  %v752_v11 = vpop.f32.mrb[20].mxu0 }
 0x1f7   :  { %v833_v6 = vadd.f32 %v832_v39, %v7396_v56  ;;  %v7403_v13 = vadd.f32 %v703_v61, %v7224_v1  ;;  %v705_v14 = vpop.f32.mrb[31].mxu1  ;;  %v822_v15 = vadd.f32 %v821_v3, %v820_v49  ;;  %v7406_v34 = vadd.f32 %v752_v11, %v7226_v2  ;;  %v754_v17 = vpop.f32.mrb[21].mxu0 }
 0x1f8   :  { %v842_v50 = vadd.f32 %v841_v42, %v7399_v4  ;;  %v7410_v19 = vadd.f32 %v705_v14, %v7224_v1  ;;  %v831_v20 = vadd.f32 %v830_v5, %v829_v55  ;;  %v7413_v22 = vadd.f32 %v754_v17, %v7226_v2  ;;  %v756_v24 = vpop.f32.mrb[22].mxu0 }
 0x1f9   :  { %v834_v23 = vadd.f32 %v833_v6, %v7403_v13  ;;  %v887_v25 = vmul.f32 0.03125, %v822_v15  ;;  %v851_v26 = vadd.f32 %v850_v51, %v7406_v34  ;;  %v7418_v27 = vadd.f32 %v756_v24, %v7224_v1  ;;  %v758_v30 = vpop.f32.mrb[23].mxu0 }
 0x1fa   :  { %v843_v28 = vadd.f32 %v842_v50, %v7410_v19  ;;  %v888_v32 = vmul.f32 0.03125, %v831_v20  ;;  %v860_v33 = vadd.f32 %v859_v59, %v7413_v22  ;;  %v7423_v38 = vadd.f32 %v758_v30, %v7224_v1 }
 0x1fb   :  { %v835_v36 = vrot.slane %v834_v23, 4  ;;  %v7426_v39 = vsub.f32 %v7332_v9, %v887_v25  ;;  %v7429_v40 = vsub.f32 %v7335_v10, %v887_v25  ;;  %v7432_v60 = vsub.f32 %v7348_v16, %v887_v25 }
 0x1fc   :  { %v7435_v42 = vsub.f32 %v7355_v18, %v887_v25  ;;  %v795_v45 = vpop.f32.mrb[32].mxu1  ;;  %v7438_v46 = vsub.f32 %v7338_v12, %v888_v32  ;;  %v7441_v49 = vsub.f32 %v7341_v47, %v888_v32  ;;  %v7444_v51 = vsub.f32 %v7351_v44, %v888_v32 }
 0x1fd   :  { %v7447_v9 = vsub.f32 %v7359_v21, %v888_v32  ;;  %v797_v10 = vpop.f32.mrb[33].mxu1  ;;  %v927_v16 = vmul.f32 %v7426_v39, %v7426_v39  ;;  %v935_v18 = vmul.f32 %v7429_v40, %v7429_v40  ;;  %v943_v12 = vmul.f32 %v7432_v60, %v7432_v60 }
 0x1fe   :  { %v951_v47 = vmul.f32 %v7435_v42, %v7435_v42  ;;  %v799_v54 = vpop.f32.mrb[34].mxu1  ;;  %v928_v44 = vmul.f32 %v7438_v46, %v7438_v46  ;;  %v936_v21 = vmul.f32 %v7441_v49, %v7441_v49  ;;  %v944_v55 = vmul.f32 %v7444_v51, %v7444_v51 }
 0x1ff   :  { %v952_v59 = vmul.f32 %v7447_v9, %v7447_v9  ;;  %v801_v57 = vpop.f32.mrb[35].mxu1  ;;  %v959_v3 = vadd.f32 %v935_v18, %v927_v16  ;;  %v836_v61 = vadd.f32 %v835_v36, %v834_v23  ;;  %v852_v5 = vadd.f32 %v851_v26, %v7418_v27 }
 0x200   :  { %v844_v6 = vrot.slane %v843_v28, 4  ;;  %v968_v11 = vadd.f32 %v936_v21, %v928_v44  ;;  %v861_v14 = vadd.f32 %v860_v33, %v7423_v38  ;;  %v7468_v15 = vadd.f32 %v795_v45, %v7220_v62 }
 0x201   :  { %v7471_v50 = vadd.f32 %v797_v10, %v7220_v62  ;;  %v960_v17 = vadd.f32 %v959_v3, %v943_v12  ;;  %v837_v20 = vrot.slane %v836_v61, 2  ;;  %v853_v24 = vrot.slane %v852_v5, 4 }
 0x202   :  { %v845_v25 = vadd.f32 %v844_v6, %v843_v28  ;;  %v969_v30 = vadd.f32 %v968_v11, %v944_v55  ;;  %v862_v32 = vrot.slane %v861_v14, 4  ;;  %v7474_v23 = vadd.f32 %v799_v54, %v7222_v63 }
 0x203   :  { %v7477_v26 = vadd.f32 %v801_v57, %v7222_v63  ;;  %v961_v36 = vadd.f32 %v960_v17, %v951_v47  ;;  %v838_v33 = vadd.f32 %v837_v20, %v836_v61  ;;  %v854_v16 = vadd.f32 %v853_v24, %v852_v5 }
 0x204   :  { %v846_v45 = vrot.slane %v845_v25, 2  ;;  %v805_v18 = vpop.f32.mrb[36].mxu1  ;;  %v970_v44 = vadd.f32 %v969_v30, %v952_v59  ;;  %v863_v62 = vadd.f32 %v862_v32, %v861_v14  ;;  %v868_v10 = vadd.f32 %v7474_v23, %v7468_v15 }
 0x205   :  { %v877_v28 = vadd.f32 %v7477_v26, %v7471_v50  ;;  %v807_v12 = vpop.f32.mrb[37].mxu1  ;;  %v962_v21 = vrot.slane %v961_v36, 4  ;;  %v839_v54 = vrot.slane %v838_v33, 1  ;;  %v855_v55 = vrot.slane %v854_v16, 2 }
 0x206   :  { %v847_v3 = vadd.f32 %v846_v45, %v845_v25  ;;  %v809_v63 = vpop.f32.mrb[38].mxu1  ;;  %v971_v57 = vrot.slane %v970_v44, 4  ;;  %v864_v47 = vrot.slane %v863_v62, 2  ;;  %v7484_v61 = vadd.f32 %v805_v18, %v7226_v2 }
 0x207   :  { %v7487_v59 = vadd.f32 %v807_v12, %v7226_v2  ;;  %v811_v5 = vpop.f32.mrb[39].mxu1  ;;  %v963_v6 = vadd.f32 %v962_v21, %v961_v36  ;;  %v840_v11 = vadd.f32 %v839_v54, %v838_v33  ;;  %v856_v14 = vadd.f32 %v855_v55, %v854_v16  ;;  %v7494_v12 = vpop.permute.xlu1 %1092 }
 0x208   :  { %v848_v17 = vrot.slane %v847_v3, 1  ;;  %v972_v20 = vadd.f32 %v971_v57, %v970_v44  ;;  %v865_v24 = vadd.f32 %v864_v47, %v863_v62  ;;  %v869_v30 = vadd.f32 %v868_v10, %v7484_v61 }
 0x209   :  { %v878_v25 = vadd.f32 %v877_v28, %v7487_v59  ;;  %v964_v32 = vrot.slane %v963_v6, 2  ;;  %v889_v45 = vmul.f32 0.03125, %v840_v11  ;;  %v857_v0 = vrot.slane %v856_v14, 1 }
 0x20a   :  { %v849_v52 = vadd.f32 %v848_v17, %v847_v3  ;;  %v973_v18 = vrot.slane %v972_v20, 2  ;;  %v866_v53 = vrot.slane %v865_v24, 1  ;;  %v7492_v2 = vadd.f32 %v809_v63, %v7224_v1 }
 0x20b   :  { %v965_v36 = vadd.f32 %v964_v32, %v963_v6  ;;  %v7497_v33 = vsub.f32 %v7364_v29, %v889_v45  ;;  %v7500_v16 = vsub.f32 %v7367_v31, %v889_v45  ;;  %v7503_v44 = vsub.f32 %v7396_v56, %v889_v45 }
 0x20c   :  { %v974_v62 = vadd.f32 %v973_v18, %v972_v20  ;;  %v7506_v10 = vsub.f32 %v7403_v13, %v889_v45  ;;  %v858_v28 = vadd.f32 %v857_v0, %v856_v14  ;;  %v890_v21 = vmul.f32 0.03125, %v849_v52 }
 0x20d   :  { %v966_v54 = vrot.slane %v965_v36, 1  ;;  %v929_v55 = vmul.f32 %v7497_v33, %v7497_v33  ;;  %v937_v29 = vmul.f32 %v7500_v16, %v7500_v16  ;;  %v945_v31 = vmul.f32 %v7503_v44, %v7503_v44 }
 0x20e   :  { %v975_v3 = vrot.slane %v974_v62, 1  ;;  %v953_v56 = vmul.f32 %v7506_v10, %v7506_v10  ;;  %v891_v63 = vmul.f32 0.03125, %v858_v28  ;;  %v7517_v13 = vsub.f32 %v7370_v58, %v890_v21  ;;  %v7534_v58 = vpop.permute.xlu1 %1136 }
 0x20f   :  { %v967_v0 = vadd.f32 %v966_v54, %v965_v36  ;;  %v977_v52 = vadd.f32 %v937_v29, %v929_v55  ;;  %v7520_v57 = vsub.f32 %v7373_v37, %v890_v21  ;;  %v7523_v47 = vsub.f32 %v7399_v4, %v890_v21 }
 0x210   :  { %v976_v6 = vadd.f32 %v975_v3, %v974_v62  ;;  %v7526_v11 = vsub.f32 %v7378_v35, %v891_v63  ;;  %v7529_v14 = vsub.f32 %v7381_v41, %v891_v63  ;;  %v7532_v17 = vsub.f32 %v7406_v34, %v891_v63 }
 0x211   :  { %v1031_v20 = vmul.f32 0.03125, %v967_v0  ;;  %v978_v32 = vadd.f32 %v977_v52, %v945_v31  ;;  %v7537_v37 = vsub.f32 %v7418_v27, %v891_v63  ;;  %v7540_v4 = vsub.f32 %v7410_v19, %v890_v21 }
 0x212   :  { %v1032_v45 = vmul.f32 0.03125, %v976_v6  ;;  %v931_v35 = vmul.f32 %v7526_v11, %v7526_v11  ;;  %v939_v41 = vmul.f32 %v7529_v14, %v7529_v14  ;;  %v7547_v34 = vadd.f32 %v811_v5, %v7224_v1 }
 0x213   :  { %v1039_v18 = vadd.f32 1e-05, %v1031_v20  ;;  %v979_v36 = vadd.f32 %v978_v32, %v953_v56  ;;  %v947_v62 = vmul.f32 %v7532_v17, %v7532_v17  ;;  %v930_v27 = vmul.f32 %v7517_v13, %v7517_v13  ;;  %v7560_v56 = vpop.permute.xlu1 %1140 }
 0x214   :  { %v1040_v19 = vadd.f32 1e-05, %v1032_v45  ;;  %v955_v28 = vmul.f32 %v7537_v37, %v7537_v37  ;;  %v995_v21 = vadd.f32 %v939_v41, %v931_v35  ;;  %v938_v54 = vmul.f32 %v7520_v57, %v7520_v57 }
 0x215   :  { %6756 = vrsqrt.f32 %v1039_v18  ;;  %v980_v55 = vrot.slane %v979_v36, 4  ;;  %v946_v1 = vmul.f32 %v7523_v47, %v7523_v47  ;;  %v867_v5 = vadd.f32 %v866_v53, %v865_v24 }
 0x216   :  { %6758 = vrsqrt.f32 %v1040_v19  ;;  %v996_v29 = vadd.f32 %v995_v21, %v947_v62  ;;  %v986_v31 = vadd.f32 %v938_v54, %v930_v27  ;;  %v870_v3 = vadd.f32 %v869_v30, %v7492_v2 }
 0x217   :  { %v981_v63 = vadd.f32 %v980_v55, %v979_v36  ;;  %v892_v0 = vmul.f32 0.03125, %v867_v5  ;;  %v879_v52 = vadd.f32 %v878_v25, %v7547_v34  ;;  %v954_v20 = vmul.f32 %v7540_v4, %v7540_v4  ;;  %v7581_v21 = vpop.permute.xlu1 %1096 }
 0x218   :  { %v997_v6 = vadd.f32 %v996_v29, %v955_v28  ;;  %v987_v32 = vadd.f32 %v986_v31, %v946_v1  ;;  %v871_v45 = vrot.slane %v870_v3, 4 }
 0x219   :  { %v982_v35 = vrot.slane %v981_v63, 2  ;;  %v7566_v53 = vsub.f32 %v7386_v43, %v892_v0  ;;  %v7569_v24 = vsub.f32 %v7389_v48, %v892_v0  ;;  %v7572_v30 = vsub.f32 %v7413_v22, %v892_v0 }
 0x21a   :  { %v998_v41 = vrot.slane %v997_v6, 4  ;;  %v988_v18 = vadd.f32 %v987_v32, %v954_v20  ;;  %v7575_v25 = vsub.f32 %v7423_v38, %v892_v0  ;;  %v872_v36 = vadd.f32 %v871_v45, %v870_v3 }
 0x21b   :  { %v983_v62 = vadd.f32 %v982_v35, %v981_v63  ;;  %v932_v27 = vmul.f32 %v7566_v53, %v7566_v53  ;;  %v940_v43 = vmul.f32 %v7569_v24, %v7569_v24  ;;  %v948_v54 = vmul.f32 %v7572_v30, %v7572_v30 }
 0x21c   :  { %v999_v19 = vadd.f32 %v998_v41, %v997_v6  ;;  %v989_v28 = vrot.slane %v988_v18, 4  ;;  %v873_v48 = vrot.slane %v872_v36, 2  ;;  %v880_v38 = vrot.slane %v879_v52, 4 }
 0x21d   :  { %v984_v22 = vrot.slane %v983_v62, 1  ;;  %v1004_v55 = vadd.f32 %v940_v43, %v932_v27  ;;  %v956_v63 = vmul.f32 %v7575_v25, %v7575_v25 }
 0x21e   :  { %v1000_v1 = vrot.slane %v999_v19, 2  ;;  %v990_v5 = vadd.f32 %v989_v28, %v988_v18  ;;  %v874_v29 = vadd.f32 %v873_v48, %v872_v36  ;;  %v881_v6 = vadd.f32 %v880_v38, %v879_v52 }
 0x21f   :  { %v7585_v31 = vpop.eup %6756  ;;  %v985_v3 = vadd.f32 %v984_v22, %v983_v62  ;;  %v1005_v0 = vadd.f32 %v1004_v55, %v948_v54  ;;  %v7597_v22 = vpop.permute.xlu1 %1100 }
 0x220   :  { %v7589_v20 = vpop.eup %6758  ;;  %v7593_v32 = vmul.f32 %v7585_v31, %v7435_v42  ;;  %v1001_v45 = vadd.f32 %v1000_v1, %v999_v19  ;;  %v991_v35 = vrot.slane %v990_v5, 2  ;;  %v875_v41 = vrot.slane %v874_v29, 1 }
 0x221   :  { %v1080_v18 = vmul.f32 %v7589_v20, %v7447_v9  ;;  %v1033_v36 = vmul.f32 0.03125, %v985_v3  ;;  %v1006_v27 = vadd.f32 %v1005_v0, %v956_v63  ;;  %v882_v62 = vrot.slane %v881_v6, 2 }
 0x222   :  { %v1002_v43 = vrot.slane %v1001_v45, 1  ;;  %v992_v28 = vadd.f32 %v991_v35, %v990_v5  ;;  %v876_v48 = vadd.f32 %v875_v41, %v874_v29  ;;  %v1056_v3 = vmul.f32 %v7589_v20, %v7438_v46 }
 0x223   :  { %v1041_v52 = vadd.f32 1e-05, %v1033_v36  ;;  %v1007_v54 = vrot.slane %v1006_v27, 4  ;;  %v883_v55 = vadd.f32 %v882_v62, %v881_v6  ;;  %v7600_v42 = vmul.f32 %v7597_v22, %v1080_v18 }
 0x224   :  { %v1003_v19 = vadd.f32 %v1002_v43, %v1001_v45  ;;  %v993_v38 = vrot.slane %v992_v28, 1  ;;  %v893_v1 = vmul.f32 0.03125, %v876_v48  ;;  %v7626_v48 = vpop.permute.xlu0 %1088 }
 0x225   :  { %6760 = vrsqrt.f32 %v1041_v52  ;;  %v1008_v7 = vadd.f32 %v1007_v54, %v1006_v27  ;;  %v884_v9 = vrot.slane %v883_v55, 1 }
 0x226   :  { %v1035_v63 = vmul.f32 0.03125, %v1003_v19  ;;  %v994_v5 = vadd.f32 %v993_v38, %v992_v28  ;;  %v7605_v29 = vsub.f32 %v7468_v15, %v893_v1  ;;  %v7608_v0 = vsub.f32 %v7474_v23, %v893_v1 }
 0x227   :  { %v1009_v6 = vrot.slane %v1008_v7, 2  ;;  %v7611_v35 = vsub.f32 %v7484_v61, %v893_v1  ;;  %v7614_v45 = vsub.f32 %v7492_v2, %v893_v1  ;;  %v885_v41 = vadd.f32 %v884_v9, %v883_v55 }
 0x228   :  { %v1043_v18 = vadd.f32 1e-05, %v1035_v63  ;;  %v1034_v36 = vmul.f32 0.03125, %v994_v5  ;;  %v933_v46 = vmul.f32 %v7605_v29, %v7605_v29  ;;  %v941_v15 = vmul.f32 %v7608_v0, %v7608_v0 }
 0x229   :  { %v1010_v27 = vadd.f32 %v1009_v6, %v1008_v7  ;;  %v949_v23 = vmul.f32 %v7611_v35, %v7611_v35  ;;  %v957_v61 = vmul.f32 %v7614_v45, %v7614_v45  ;;  %v894_v62 = vmul.f32 0.03125, %v885_v41 }
 0x22a   :  { %6762 = vrsqrt.f32 %v1043_v18  ;;  %v1042_v2 = vadd.f32 1e-05, %v1034_v36  ;;  %v1013_v43 = vadd.f32 %v941_v15, %v933_v46  ;;  %v1064_v28 = vmul.f32 %v7589_v20, %v7441_v49  ;;  %v7641_v49 = vpop.permute.xlu1 %1144 }
 0x22b   :  { %v1011_v52 = vrot.slane %v1010_v27, 1  ;;  %v7629_v54 = vsub.f32 %v7471_v50, %v894_v62  ;;  %v7632_v7 = vsub.f32 %v7477_v26, %v894_v62  ;;  %v7635_v55 = vsub.f32 %v7487_v59, %v894_v62 }
 0x22c   :  { %6764 = vrsqrt.f32 %v1042_v2  ;;  %v1014_v19 = vadd.f32 %v1013_v43, %v949_v23  ;;  %v7638_v38 = vsub.f32 %v7547_v34, %v894_v62  ;;  %v1104_v1 = vmul.f32 %v7626_v48, %v1056_v3 }
 0x22d   :  { %v1012_v9 = vadd.f32 %v1011_v52, %v1010_v27  ;;  %v934_v50 = vmul.f32 %v7629_v54, %v7629_v54  ;;  %v942_v26 = vmul.f32 %v7632_v7, %v7632_v7  ;;  %v950_v59 = vmul.f32 %v7635_v55, %v7635_v55 }
 0x22e   :  { %v1015_v63 = vadd.f32 %v1014_v19, %v957_v61  ;;  %v958_v5 = vmul.f32 %v7638_v38, %v7638_v38  ;;  %v1112_v34 = vmul.f32 %v7494_v12, %v1064_v28  ;;  %v1152_v3 = vadd.f32 %v7534_v58, %v1104_v1 }
 0x22f   :  { %v7653_v6 = vpop.eup %6760  ;;  %v1036_v41 = vmul.f32 0.03125, %v1012_v9  ;;  %v1022_v18 = vadd.f32 %v942_v26, %v934_v50  ;;  %v1055_v36 = vmul.f32 %v7585_v31, %v7426_v39  ;;  %v1063_v46 = vmul.f32 %v7585_v31, %v7429_v40 }
 0x230   :  { %v1081_v15 = vmul.f32 %v7653_v6, %v7506_v10  ;;  %v1016_v27 = vrot.slane %v1015_v63, 4  ;;  %v1160_v23 = vadd.f32 %v7560_v56, %v1112_v34  ;;  %v1072_v61 = vmul.f32 %v7589_v20, %v7444_v51  ;;  %v7669_v10 = vpop.permute.xlu1 %1148 }
 0x231   :  { %v1044_v62 = vadd.f32 1e-05, %v1036_v41  ;;  %v1023_v2 = vadd.f32 %v1022_v18, %v950_v59  ;;  %v1103_v43 = vmul.f32 %v7626_v48, %v1055_v36  ;;  %v1111_v28 = vmul.f32 %v7494_v12, %v1063_v46 }
 0x232   :  { %v1127_v39 = vmul.f32 %v7597_v22, %v7593_v32  ;;  %v1017_v52 = vadd.f32 %v1016_v27, %v1015_v63  ;;  %v1184_v40 = vpack.c.bf16 %v1160_v23, %v1152_v3  ;;  %v1120_v19 = vmul.f32 %v7581_v21, %v1072_v61 }
 0x233   :  { %6766 = vrsqrt.f32 %v1044_v62  ;;  %v1024_v1 = vadd.f32 %v1023_v2, %v958_v5  ;;  %v1151_v9 = vadd.f32 %v7534_v58, %v1103_v43  ;;  %v1159_v51 = vadd.f32 %v7560_v56, %v1111_v28 }
 0x234   :  { %v7673_v20 = vpop.eup %6762  ;;  %v1018_v50 = vrot.slane %v1017_v52, 2  ;;  %1231 = vmatprep.subr.bf16.mxu0 %v1184_v40  ;;  %v1168_v26 = vadd.f32 %v7641_v49, %v1120_v19  ;;  %v1176_v32 = vadd.f32 %v7669_v10, %v7600_v42  ;;  %v1071_v5 = vmul.f32 %v7585_v31, %v7432_v60 }
 0x235   :  { %v1083_v59 = vmul.f32 %v7673_v20, %v7537_v37  ;;  %v1025_v63 = vrot.slane %v1024_v1, 4  ;;  %v1183_v34 = vpack.c.bf16 %v1159_v51, %v1151_v9  ;;  %v1057_v36 = vmul.f32 %v7653_v6, %v7497_v33 }
 0x236   :  { %v6765_v3 = vpop.eup %6764  ;;  %v1019_v41 = vadd.f32 %v1018_v50, %v1017_v52  ;;  %v1192_v18 = vpack.c.bf16 %v1176_v32, %v1168_v26  ;;  %v1065_v46 = vmul.f32 %v7653_v6, %v7500_v16  ;;  %v1175_v27 = vadd.f32 %v7669_v10, %v1127_v39 }
 0x237   :  { %v1082_v42 = vmul.f32 %v6765_v3, %v7540_v4  ;;  %v1026_v23 = vadd.f32 %v1025_v63, %v1024_v1  ;;  %1232 = vmatpush1.bf16.msra.mxu0 %v1183_v34  ;;  %v1119_v37 = vmul.f32 %v7581_v21, %v1071_v5  ;;  %v1058_v60 = vmul.f32 %v6765_v3, %v7517_v13  ;;  %v7704_v1 = vld [vmem:[%s8619_s2 + $0x20] sm:$0xff]  }
 0x238   :  { %v1020_v61 = vrot.slane %v1019_v41, 1  ;;  %1233 = vmatprep.subr.bf16.mxu0 %v1192_v18  ;;  %v1066_v31 = vmul.f32 %v6765_v3, %v7520_v57  ;;  %v1105_v62 = vmul.f32 %v7626_v48, %v1057_v36  ;;  %v1129_v33 = vmul.f32 %v7597_v22, %v1081_v15 }
 0x239   :  { %v1130_v16 = vmul.f32 %v7597_v22, %v1082_v42  ;;  %v1027_v2 = vrot.slane %v1026_v23, 2  ;;  %v1167_v43 = vadd.f32 %v7641_v49, %v1119_v37  ;;  %v1106_v28 = vmul.f32 %v7626_v48, %v1058_v60 }
 0x23a   :  { %v1021_v4 = vadd.f32 %v1020_v61, %v1019_v41  ;;  %v1114_v39 = vmul.f32 %v7494_v12, %v1066_v31  ;;  %v1113_v52 = vmul.f32 %v7494_v12, %v1065_v46  ;;  %v1153_v57 = vadd.f32 %v7534_v58, %v1105_v62 }
 0x23b   :  { %v1028_v40 = vadd.f32 %v1027_v2, %v1026_v23  ;;  %v1191_v13 = vpack.c.bf16 %v1175_v27, %v1167_v43  ;;  %v1059_v19 = vmul.f32 %v7673_v20, %v7526_v11  ;;  %v1154_v9 = vadd.f32 %v7534_v58, %v1106_v28 }
 0x23c   :  { %v1037_v15 = vmul.f32 0.03125, %v1021_v4  ;;  %v1162_v51 = vadd.f32 %v7560_v56, %v1114_v39  ;;  %v1161_v50 = vadd.f32 %v7560_v56, %v1113_v52  ;;  %v1067_v63 = vmul.f32 %v7673_v20, %v7529_v14  ;;  %v7735_v52 = vld [vmem:[%s8619_s2 + $0x28] sm:$0xff]  }
 0x23d   :  { %v6767_v26 = vpop.eup %6766  ;;  %v1029_v32 = vrot.slane %v1028_v40, 1  ;;  %1234 = vmatpush1.bf16.msra.mxu0 %v1191_v13  ;;  %v1107_v11 = vmul.f32 %v7626_v48, %v1059_v19  ;;  %v1074_v34 = vmul.f32 %v6765_v3, %v7523_v47  ;;  %v8684_v3 = vmov 0  }
 0x23e   :  { %v1084_v5 = vmul.f32 %v6767_v26, %v7575_v25  ;;  %v1045_v41 = vadd.f32 1e-05, %v1037_v15  ;;  %v1186_v18 = vpack.c.bf16 %v1162_v51, %v1154_v9  ;;  %v1060_v36 = vmul.f32 %v6767_v26, %v7566_v53 }
 0x23f   :  { %v1030_v46 = vadd.f32 %v1029_v32, %v1028_v40  ;;  %v1068_v27 = vmul.f32 %v6767_v26, %v7569_v24  ;;  %v1185_v42 = vpack.c.bf16 %v1161_v50, %v1153_v57  ;;  %v1115_v23 = vmul.f32 %v7494_v12, %v1067_v63 }
 0x240   :  { %v1132_v37 = vmul.f32 %v7597_v22, %v1084_v5  ;;  %6768 = vrsqrt.f32 %v1045_v41  ;;  %5910 = vmatmul.mubr.msk.bf16.vlgmr.msra.gmra.mrb[24].mxu0 %vm239_vm0, %v7704_v1  ;;  %1304 = vmatprep.subr.bf16.mxu1 %v1186_v18  ;;  %v1108_v47 = vmul.f32 %v7626_v48, %v1060_v36  ;;  %v1155_v14 = vadd.f32 %v7534_v58, %v1107_v11  ;;  %v7768_v36 = vld [vmem:[%s8619_s2 + $0x30] sm:$0xff]  }
 0x241   :  { %v1038_v25 = vmul.f32 0.03125, %v1030_v46  ;;  %1273 = vmatprep.mubr.bf16.mxu0 %v8684_v3  ;;  %v1116_v53 = vmul.f32 %v7494_v12, %v1068_v27  ;;  %1305 = vmatpush1.bf16.msra.mxu1 %v1185_v42  ;;  %v1163_v24 = vadd.f32 %v7560_v56, %v1115_v23  ;;  %v1122_v61 = vmul.f32 %v7581_v21, %v1074_v34 }
 0x242   :  { %v1131_v60 = vmul.f32 %v7597_v22, %v1083_v59  ;;  %v1156_v31 = vadd.f32 %v7534_v58, %v1108_v47  ;;  %v1178_v62 = vadd.f32 %v7669_v10, %v1130_v16  ;;  %v1076_v2 = vmul.f32 %v6767_v26, %v7572_v30 }
 0x243   :  { %v1046_v43 = vadd.f32 1e-05, %v1038_v25  ;;  %v1164_v4 = vadd.f32 %v7560_v56, %v1116_v53  ;;  %v1187_v28 = vpack.c.bf16 %v1163_v24, %v1155_v14  ;;  %v1170_v39 = vadd.f32 %v7641_v49, %v1122_v61 }
 0x244   :  { %v1124_v40 = vmul.f32 %v7581_v21, %v1076_v2  ;;  %v1180_v59 = vadd.f32 %v7669_v10, %v1132_v37  ;;  %v1073_v16 = vmul.f32 %v7653_v6, %v7503_v44  ;;  %v1075_v30 = vmul.f32 %v7673_v20, %v7532_v17  ;;  %v81_v44 = vld [vmem:[%s8620_s3] sm:$0xff]  ;;  %v82_v17 = vld [vmem:[%s8620_s3 + $0x8] sm:$0xff] }
 0x245   :  { %v1177_v13 = vadd.f32 %v7669_v10, %v1129_v33  ;;  %6770 = vrsqrt.f32 %v1046_v43  ;;  %v1188_v57 = vpack.c.bf16 %v1164_v4, %v1156_v31  ;;  %v1194_v19 = vpack.c.bf16 %v1178_v62, %v1170_v39 }
 0x246   :  { %v1179_v15 = vadd.f32 %v7669_v10, %v1131_v60  ;;  %v1172_v9 = vadd.f32 %v7641_v49, %v1124_v40  ;;  %v1121_v51 = vmul.f32 %v7581_v21, %v1073_v16  ;;  %v1123_v50 = vmul.f32 %v7581_v21, %v1075_v30  ;;  %v5927_v16 = vld [vmem:[%s8625_s8] ss:$0 sm:$0xff] }
 0x247   :  { %1377 = vmatprep.subr.bf16.mxu0 %v1188_v57  ;;  %1306 = vmatprep.subr.bf16.mxu1 %v1194_v19  ;;  %v7759_v11 = vpack.c.bf16 %v82_v17, %v81_v44  ;;  %v8686_v57 = vld [vmem:[#allocation11_spill] sm:$0xff] }
 0x248   :  { %5911 = vmatmul.mubr.msk.bf16.gmra.mrb[28].mxu0 %vm239_vm0, %v7735_v52  ;;  %v1196_v6 = vpack.c.bf16 %v1180_v59, %v1172_v9  ;;  %v1169_v20 = vadd.f32 %v7641_v49, %v1121_v51  ;;  %v1171_v33 = vadd.f32 %v7641_v49, %v1123_v50  ;;  %v8635_v51 = vmov 0.0  }
 0x249   :  { %1378 = vmatpush1.bf16.msra.mxu0 %v1187_v28  ;;  %1283 = vmatprep.mubr.bf16.mxu0 %v8684_v3  ;;  %v1617_v28 = vpop.xlane.xlu1 %1616 }
 0x24a   :  { %v6769_v26 = vpop.eup %6768  ;;  %1379 = vmatprep.subr.bf16.mxu0 %v1196_v6  ;;  %v1193_v32 = vpack.c.bf16 %v1177_v13, %v1169_v20  ;;  %v1195_v63 = vpack.c.bf16 %v1179_v15, %v1171_v33 }
 0x24b   :  { %v1085_v34 = vmul.f32 %v6769_v26, %v7614_v45  ;;  %v1061_v5 = vmul.f32 %v6769_v26, %v7605_v29  ;;  %v1069_v41 = vmul.f32 %v6769_v26, %v7608_v0  ;;  %v1077_v18 = vmul.f32 %v6769_v26, %v7611_v35 }
 0x24c   :  { %1307 = vmatpush1.bf16.msra.mxu1 %v1193_v32 }
 0x24d   :  { %v1133_v46 = vmul.f32 %v7597_v22, %v1085_v34  ;;  %1380 = vmatpush1.bf16.msra.mxu0 %v1195_v63  ;;  %v1109_v27 = vmul.f32 %v7626_v48, %v1061_v5  ;;  %v1117_v42 = vmul.f32 %v7494_v12, %v1069_v41  ;;  %v1125_v45 = vmul.f32 %v7581_v21, %v1077_v18 }
 0x24e   :  { %6341 = vmatprep.subr.bf16.mxu0 %v7759_v11 }
 0x24f   :  { %v6771_v29 = vpop.eup %6770  ;;  %v1181_v0 = vadd.f32 %v7669_v10, %v1133_v46  ;;  %5914 = vmatmul.mubr.msk.bf16.vlgmr.msra.gmra.mrb[40].mxu1 %vm239_vm0, %v7704_v1  ;;  %v1157_v35 = vadd.f32 %v7534_v58, %v1109_v27  ;;  %v1165_v23 = vadd.f32 %v7560_v56, %v1117_v42  ;;  %v1173_v37 = vadd.f32 %v7641_v49, %v1125_v45 }
 0x250   :  { %v1086_v47 = vmul.f32 %v6771_v29, %v7638_v38  ;;  %5912 = vmatmul.mubr.msk.bf16.gmra.mrb[32].mxu0 %vm239_vm0, %v7768_v36  ;;  %v1062_v14 = vmul.f32 %v6771_v29, %v7629_v54  ;;  %v1070_v25 = vmul.f32 %v6771_v29, %v7632_v7  ;;  %v1078_v53 = vmul.f32 %v6771_v29, %v7635_v55  ;;  %v6753_v54 = vld [vmem:[%s8619_s2 + $0x38] sm:$0xff]  }
 0x251   :  { %1293 = vmatprep.mubr.bf16.mxu0 %v8684_v3  ;;  %v1189_v24 = vpack.c.bf16 %v1165_v23, %v1157_v35  ;;  %v1197_v61 = vpack.c.bf16 %v1181_v0, %v1173_v37  ;;  %1346 = vmatprep.mubr.bf16.mxu1 %v8684_v3 }
 0x252   :  { %v1134_v60 = vmul.f32 %v7597_v22, %v1086_v47  ;;  %v1110_v31 = vmul.f32 %v7626_v48, %v1062_v14  ;;  %v1118_v38 = vmul.f32 %v7494_v12, %v1070_v25  ;;  %v1126_v62 = vmul.f32 %v7581_v21, %v1078_v53  ;;  %v1620_v48 = vpop.xlane.xlu0 %1619 }
 0x253   :  { %v1621_v12 = vmul.f32 0.03125, %v1617_v28 }
 0x254   :  { %v1158_v7 = vadd.f32 %v7534_v58, %v1110_v31  ;;  %v1166_v55 = vadd.f32 %v7560_v56, %v1118_v38  ;;  %v1174_v2 = vadd.f32 %v7641_v49, %v1126_v62  ;;  %v1182_v43 = vadd.f32 %v7669_v10, %v1134_v60  ;;  %v83_v58 = vld [vmem:[%s8620_s3 + $0x10] sm:$0xff]  ;;  %v84_v56 = vld [vmem:[%s8620_s3 + $0x18] sm:$0xff] }
 0x255   :  { %v1623_v21 = vadd.f32 1e-05, %v1621_v12  ;;  %v7811_v49 = vpack.c.bf16 %v84_v56, %v83_v58  ;;  %v1622_v10 = vmul.f32 0.03125, %v1620_v48 }
 0x256   :  { %v1190_v4 = vpack.c.bf16 %v1166_v55, %v1158_v7  ;;  %v1198_v22 = vpack.c.bf16 %v1182_v43, %v1174_v2 }
 0x257   :  { %5915 = vmatmul.mubr.msk.bf16.gmra.mrb[44].mxu1 %vm239_vm0, %v7735_v52  ;;  %8685 = vst [vmem:[#allocation12_spill] sm:$0xff] %v7811_v49  ;;  %6772 = vrsqrt.f32 %v1623_v21  ;;  %v1624_v39 = vadd.f32 1e-05, %v1622_v10 }
 0x258   :  { %5913 = vmatmul.mubr.msk.bf16.gmra.mrb[36].mxu0 %vm239_vm0, %v6753_v54  ;;  %1450 = vmatprep.subr.bf16.mxu1 %v1190_v4 }
 0x259   :  { %1451 = vmatpush1.bf16.msra.mxu1 %v1189_v24  ;;  %1409 = vmatprep.mubr.bf16.mxu0 %v8684_v3  ;;  %6774 = vrsqrt.f32 %v1624_v39 }
 0x25a   :  { %1452 = vmatprep.subr.bf16.mxu1 %v1198_v22  ;;  %1356 = vmatprep.mubr.bf16.mxu1 %v8684_v3 }
 0x25d   :  { %1453 = vmatpush1.bf16.msra.mxu1 %v1197_v61 }
 0x25f   :  { %5916 = vmatmul.mubr.msk.bf16.gmra.mrb[48].mxu1 %vm239_vm0, %v7768_v36 }
 0x260   :  { %5918 = vmatmul.mubr.msk.bf16.vlgmr.msra.gmra.mrb[40].mxu0 %vm239_vm0, %v7704_v1  ;;  %1366 = vmatprep.mubr.bf16.mxu1 %v8684_v3 }
 0x261   :  { %1419 = vmatprep.mubr.bf16.mxu0 %v8684_v3  ;;  %6343 = vmatpush3.bf16.msra.mxu0 %v7759_v11  ;;  %v6773_v40 = vpop.eup %6772 }
 0x262   :  { %6345 = vmatprep.subr.bf16.mxu0 %v7811_v49  ;;  %v1627_v59 = vmul.f32 %v6773_v40, %v7232_v8  ;;  %v5928_v8 = vld [vmem:[%s8625_s8 + $0x1] ss:$0 sm:$0xff] }
 0x263   :  { %v6775_v30 = vpop.eup %6774 }
 0x264   :  { %v1633_v13 = vmul.f32 %v5927_v16, %v1627_v59  ;;  %v1628_v19 = vmul.f32 %v6775_v30, %v8686_v57 }
 0x265   :  { %6347 = vmatpush3.bf16.msra.mxu0 %v7811_v49 }
 0x266   :  { %v1634_v15 = vmul.f32 %v5927_v16, %v1628_v19 }
 0x267   :  { %5917 = vmatmul.mubr.msk.bf16.gmra.mrb[52].mxu1 %vm239_vm0, %v6753_v54 }
 0x268   :  { %5919 = vmatmul.mubr.msk.bf16.gmra.mrb[44].mxu0 %vm239_vm0, %v7735_v52  ;;  %1482 = vmatprep.mubr.bf16.mxu1 %v8684_v3  ;;  %v1640_v9 = vadd.f32 %v5928_v8, %v1634_v15 }
 0x269   :  { %1429 = vmatprep.mubr.bf16.mxu0 %v8684_v3 }
 0x26f   :  { %5922 = vmatmul.mubr.msk.bf16.vlgmr.msra.gmra.mrb[56].mxu1 %vm239_vm0, %v7704_v1  ;;  %v1639_v1 = vadd.f32 %v5928_v8, %v1633_v13 }
 0x270   :  { %5920 = vmatmul.mubr.msk.bf16.gmra.mrb[48].mxu0 %vm239_vm0, %v7768_v36  ;;  %1492 = vmatprep.mubr.bf16.mxu1 %v8684_v3 }
 0x271   :  { %1439 = vmatprep.mubr.bf16.mxu0 %v8684_v3 }
 0x277   :  { %5923 = vmatmul.mubr.msk.bf16.gmra.mrb[60].mxu1 %vm239_vm0, %v7735_v52 }
 0x278   :  { %5921 = vmatmul.mubr.msk.bf16.gmra.mrb[52].mxu0 %vm239_vm0, %v6753_v54  ;;  %1502 = vmatprep.mubr.bf16.mxu1 %v8684_v3 }
 0x279   :  { %6111 = vmatprep.mubr.msk.f32.mxu0 %vm239_vm0, %v1639_v1 }
 0x27f   :  { %5924 = vmatmul.mubr.msk.bf16.gmra.mrb[64].mxu1 %vm239_vm0, %v7768_v36 }
 0x280   :  { %6112 = vmatmul.mubr.msk.f32.vlgmr.msra.gmra.mrb[56].mxu0 %vm239_vm0, %v1640_v9  ;;  %1512 = vmatprep.mubr.bf16.mxu1 %v8684_v3 }
 0x287   :  { %5925 = vmatmul.mubr.msk.bf16.gmra.mrb[68].mxu1 %vm239_vm0, %v6753_v54 }
 0x288   :  { %1805 = vmatprep.mubr.f32.mxu1 %v8635_v51 }
 0x313   :  { %v1265_v52 = vpop.f32.mrb[24].mxu0 }
 0x314   :  { %v1267_v50 = vpop.f32.mrb[25].mxu0 }
 0x315   :  { %v1269_v44 = vpop.f32.mrb[26].mxu0 }
 0x316   :  { %v7852_v17 = vpack.c.bf16 %v1269_v44, %v1265_v52  ;;  %v1271_v6 = vpop.f32.mrb[27].mxu0 }
 0x317   :  { %v7854_v20 = vpack.c.bf16 %v1271_v6, %v1267_v50 }
 0x318   :  { %8687 = vst [vmem:[#allocation11_spill] sm:$0xff] %v7852_v17 }
 0x319   :  { %8688 = vst [vmem:[#allocation13_spill] sm:$0xff] %v7854_v20  ;;  %6349 = vmatprep.subr.bf16.mxu1 %v7854_v20 }
 0x31a   :  { %6351 = vmatpush1.bf16.msra.mxu1 %v7852_v17 }
 0x31b   :  { %v1275_v33 = vpop.f32.mrb[28].mxu0 }
 0x31c   :  { %v1277_v26 = vpop.f32.mrb[29].mxu0 }
 0x31d   :  { %v1279_v3 = vpop.f32.mrb[30].mxu0 }
 0x31e   :  { %v7858_v32 = vpack.c.bf16 %v1279_v3, %v1275_v33  ;;  %v1281_v63 = vpop.f32.mrb[31].mxu0 }
 0x31f   :  { %v7860_v34 = vpack.c.bf16 %v1281_v63, %v1277_v26 }
 0x320   :  { %8689 = vst [vmem:[#allocation14_spill] sm:$0xff] %v7858_v32 }
 0x321   :  { %8690 = vst [vmem:[#allocation15_spill] sm:$0xff] %v7860_v34  ;;  %6353 = vmatprep.subr.bf16.mxu1 %v7860_v34 }
 0x322   :  { %6355 = vmatpush1.bf16.msra.mxu1 %v7858_v32  ;;  %v1338_v5 = vpop.f32.mrb[40].mxu1 }
 0x323   :  { %v1285_v41 = vpop.f32.mrb[32].mxu0  ;;  %v1340_v18 = vpop.f32.mrb[41].mxu1 }
 0x324   :  { %v1287_v36 = vpop.f32.mrb[33].mxu0  ;;  %v1342_v46 = vpop.f32.mrb[42].mxu1 }
 0x325   :  { %v1289_v27 = vpop.f32.mrb[34].mxu0  ;;  %v7864_v42 = vpack.c.bf16 %v1342_v46, %v1338_v5  ;;  %v1344_v45 = vpop.f32.mrb[43].mxu1 }
 0x326   :  { %v7866_v29 = vpack.c.bf16 %v1289_v27, %v1285_v41  ;;  %v1291_v0 = vpop.f32.mrb[35].mxu0  ;;  %v7868_v35 = vpack.c.bf16 %v1344_v45, %v1340_v18 }
 0x327   :  { %8691 = vst [vmem:[#allocation16_spill] sm:$0xff] %v7864_v42  ;;  %v7870_v23 = vpack.c.bf16 %v1291_v0, %v1287_v36 }
 0x328   :  { %8692 = vst [vmem:[#allocation17_spill] sm:$0xff] %v7866_v29  ;;  %8693 = vst [vmem:[#allocation18_spill] sm:$0xff] %v7868_v35  ;;  %6365 = vmatprep.subr.bf16.mxu1 %v7868_v35 }
 0x329   :  { %8694 = vst [vmem:[#allocation19_spill] sm:$0xff] %v7870_v23  ;;  %6357 = vmatprep.subr.bf16.mxu0 %v7870_v23 }
 0x32a   :  { %6359 = vmatpush1.bf16.xpose.msra.mxu0 %v7866_v29  ;;  %v1348_v37 = vpop.f32.mrb[44].mxu1 }
 0x32b   :  { %v1295_v47 = vpop.f32.mrb[36].mxu0  ;;  %v1350_v14 = vpop.f32.mrb[45].mxu1 }
 0x32c   :  { %v1297_v25 = vpop.f32.mrb[37].mxu0  ;;  %v1352_v53 = vpop.f32.mrb[46].mxu1 }
 0x32d   :  { %v1299_v24 = vpop.f32.mrb[38].mxu0  ;;  %v7875_v61 = vpack.c.bf16 %v1352_v53, %v1348_v37  ;;  %v1354_v60 = vpop.f32.mrb[47].mxu1 }
 0x32e   :  { %v7877_v31 = vpack.c.bf16 %v1299_v24, %v1295_v47  ;;  %v1301_v38 = vpop.f32.mrb[39].mxu0  ;;  %v7879_v62 = vpack.c.bf16 %v1354_v60, %v1350_v14 }
 0x32f   :  { %8695 = vst [vmem:[#allocation20_spill] sm:$0xff] %v7875_v61  ;;  %v7881_v54 = vpack.c.bf16 %v1301_v38, %v1297_v25 }
 0x330   :  { %8696 = vst [vmem:[#allocation21_spill] sm:$0xff] %v7877_v31  ;;  %8697 = vst [vmem:[#allocation22_spill] sm:$0xff] %v7879_v62 }
 0x331   :  { %8698 = vst [vmem:[#allocation23_spill] sm:$0xff] %v7881_v54  ;;  %6361 = vmatprep.subr.bf16.mxu0 %v7881_v54 }
 0x332   :  { %6363 = vmatpush1.bf16.xpose.msra.mxu0 %v7877_v31  ;;  %v1358_v7 = vpop.f32.mrb[48].mxu1 }
 0x333   :  { %v1411_v55 = vpop.f32.mrb[40].mxu0  ;;  %v1360_v2 = vpop.f32.mrb[49].mxu1 }
 0x334   :  { %v1413_v43 = vpop.f32.mrb[41].mxu0  ;;  %v1362_v4 = vpop.f32.mrb[50].mxu1 }
 0x335   :  { %v1415_v22 = vpop.f32.mrb[42].mxu0  ;;  %v7885_v28 = vpack.c.bf16 %v1362_v4, %v1358_v7  ;;  %v1364_v12 = vpop.f32.mrb[51].mxu1 }
 0x336   :  { %v7887_v58 = vpack.c.bf16 %v1415_v22, %v1411_v55  ;;  %v1417_v56 = vpop.f32.mrb[43].mxu0  ;;  %v7889_v21 = vpack.c.bf16 %v1364_v12, %v1360_v2 }
 0x337   :  { %v7891_v48 = vpack.c.bf16 %v1417_v56, %v1413_v43 }
 0x338   :  { %8699 = vst [vmem:[#allocation24_spill] sm:$0xff] %v7887_v58  ;;  %8700 = vst [vmem:[#allocation25_spill] sm:$0xff] %v7889_v21 }
 0x339   :  { %8701 = vst [vmem:[#allocation26_spill] sm:$0xff] %v7891_v48  ;;  %6381 = vmatprep.subr.bf16.mxu0 %v7891_v48 }
 0x33a   :  { %v1368_v10 = vpop.f32.mrb[52].mxu1 }
 0x33b   :  { %v1421_v39 = vpop.f32.mrb[44].mxu0  ;;  %v1370_v40 = vpop.f32.mrb[53].mxu1 }
 0x33c   :  { %v1423_v59 = vpop.f32.mrb[45].mxu0  ;;  %v1372_v16 = vpop.f32.mrb[54].mxu1 }
 0x33d   :  { %v1425_v30 = vpop.f32.mrb[46].mxu0  ;;  %v7894_v13 = vpack.c.bf16 %v1372_v16, %v1368_v10  ;;  %v1374_v8 = vpop.f32.mrb[55].mxu1 }
 0x33e   :  { %v7896_v57 = vpack.c.bf16 %v1425_v30, %v1421_v39  ;;  %v1427_v19 = vpop.f32.mrb[47].mxu0  ;;  %v7898_v1 = vpack.c.bf16 %v1374_v8, %v1370_v40 }
 0x33f   :  { %v7900_v15 = vpack.c.bf16 %v1427_v19, %v1423_v59 }
 0x340   :  { %8702 = vst [vmem:[#allocation27_spill] sm:$0xff] %v7896_v57 }
 0x341   :  { %8703 = vst [vmem:[#allocation28_spill] sm:$0xff] %v7900_v15 }
 0x342   :  { %v1484_v9 = vpop.f32.mrb[56].mxu1 }
 0x343   :  { %v1431_v52 = vpop.f32.mrb[48].mxu0  ;;  %v1486_v50 = vpop.f32.mrb[57].mxu1 }
 0x344   :  { %v1433_v44 = vpop.f32.mrb[49].mxu0  ;;  %v1488_v6 = vpop.f32.mrb[58].mxu1 }
 0x345   :  { %v1435_v33 = vpop.f32.mrb[50].mxu0  ;;  %v7902_v26 = vpack.c.bf16 %v1488_v6, %v1484_v9  ;;  %v1490_v3 = vpop.f32.mrb[59].mxu1 }
 0x346   :  { %v7904_v63 = vpack.c.bf16 %v1435_v33, %v1431_v52  ;;  %v1437_v5 = vpop.f32.mrb[51].mxu0  ;;  %v7906_v41 = vpack.c.bf16 %v1490_v3, %v1486_v50 }
 0x347   :  { %v7908_v18 = vpack.c.bf16 %v1437_v5, %v1433_v44 }
 0x348   :  { %8704 = vst [vmem:[#allocation29_spill] sm:$0xff] %v7904_v63  ;;  %8705 = vst [vmem:[#allocation30_spill] sm:$0xff] %v7906_v41 }
 0x349   :  { %8706 = vst [vmem:[#allocation31_spill] sm:$0xff] %v7908_v18 }
 0x34a   :  { %v1494_v36 = vpop.f32.mrb[60].mxu1 }
 0x34b   :  { %v1441_v46 = vpop.f32.mrb[52].mxu0  ;;  %v1496_v27 = vpop.f32.mrb[61].mxu1 }
 0x34c   :  { %v1443_v45 = vpop.f32.mrb[53].mxu0  ;;  %v1498_v0 = vpop.f32.mrb[62].mxu1 }
 0x34d   :  { %v1445_v37 = vpop.f32.mrb[54].mxu0  ;;  %v7910_v47 = vpack.c.bf16 %v1498_v0, %v1494_v36  ;;  %v1500_v14 = vpop.f32.mrb[63].mxu1 }
 0x34e   :  { %v7912_v25 = vpack.c.bf16 %v1445_v37, %v1441_v46  ;;  %v1447_v53 = vpop.f32.mrb[55].mxu0  ;;  %v7914_v24 = vpack.c.bf16 %v1500_v14, %v1496_v27 }
 0x34f   :  { %v7916_v60 = vpack.c.bf16 %v1447_v53, %v1443_v45 }
 0x350   :  { %8707 = vst [vmem:[#allocation32_spill] sm:$0xff] %v7912_v25 }
 0x351   :  { %8708 = vst [vmem:[#allocation33_spill] sm:$0xff] %v7916_v60 }
 0x352   :  { %v1504_v38 = vpop.f32.mrb[64].mxu1 }
 0x353   :  { %v7918_v7 = vpop.f32.mrb[56].mxu0  ;;  %v1506_v55 = vpop.f32.mrb[65].mxu1 }
 0x354   :  { %v1713_v2 = vpop.f32.mrb[57].mxu0  ;;  %v1508_v43 = vpop.f32.mrb[66].mxu1 }
 0x355   :  { %5931 = vmatmul.mubr.msk.f32.vlgmr.msra.gmra.mrb[72].mxu1 %vm239_vm0, %v1713_v2  ;;  %v7921_v4 = vpack.c.bf16 %v1508_v43, %v1504_v38  ;;  %v1510_v22 = vpop.f32.mrb[67].mxu1  ;;  %v1947_v10 = vrot.slane %v1713_v2, 4 }
 0x356   :  { %6367 = vmatpush1.bf16.msra.mxu1 %v7864_v42  ;;  %2014 = vmatprep.mubr.f32.mxu1 %v8635_v51  ;;  %v7925_v12 = vpack.c.bf16 %v1510_v22, %v1506_v55 }
 0x357   :  { %6369 = vmatprep.subr.bf16.mxu1 %v7879_v62 }
 0x35a   :  { %6371 = vmatpush1.bf16.msra.mxu1 %v7875_v61  ;;  %v1514_v56 = vpop.f32.mrb[68].mxu1 }
 0x35b   :  { %6373 = vmatprep.subr.bf16.mxu1 %v7889_v21  ;;  %v1516_v39 = vpop.f32.mrb[69].mxu1 }
 0x35c   :  { %v1518_v40 = vpop.f32.mrb[70].mxu1 }
 0x35d   :  { %5932 = vmatmul.mubr.msk.f32.vlgmr.msra.gmra.mrb[74].mxu1 %vm239_vm0, %v1947_v10  ;;  %v7931_v59 = vpack.c.bf16 %v1518_v40, %v1514_v56  ;;  %v1520_v16 = vpop.f32.mrb[71].mxu1 }
 0x35e   :  { %v7933_v30 = vpack.c.bf16 %v1520_v16, %v1516_v39 }
 0x35f   :  { %8709 = vst [vmem:[#allocation34_spill] sm:$0xff] %v7931_v59 }
 0x363   :  { %6375 = vmatpush1.bf16.xpose.msra.mxu1 %v7885_v28 }
 0x364   :  { %6377 = vmatprep.subr.bf16.mxu1 %v7898_v1 }
 0x36b   :  { %6379 = vmatpush1.bf16.xpose.msra.mxu1 %v7894_v13 }
 0x36c   :  { %6397 = vmatprep.subr.bf16.mxu1 %v7906_v41 }
 0x428   :  { %v1807_v8 = vpop.f32.mrb[72].mxu1 }
 0x429   :  { %v1813_v19 = vsel %vm1812_vm3, %v1807_v8, -inf  ;;  %v1809_v9 = vpop.f32.mrb[73].mxu1 }
 0x42a   :  { %v1814_v52 = vrot.slane %v1813_v19, 4  ;;  %v1820_v50 = vsel %vm1812_vm3, %v1809_v9, -inf }
 0x42b   :  { %v1821_v44 = vrot.slane %v1820_v50, 4 }
 0x42c   :  { %v1815_v6 = vmax.f32 %v1813_v19, %v1814_v52 }
 0x42d   :  { %v1822_v33 = vmax.f32 %v1820_v50, %v1821_v44 }
 0x42e   :  { %v1816_v3 = vrot.slane %v1815_v6, 2 }
 0x42f   :  { %v1823_v5 = vrot.slane %v1822_v33, 2 }
 0x430   :  { %v1817_v36 = vmax.f32 %v1815_v6, %v1816_v3  ;;  %v2016_v46 = vpop.f32.mrb[74].mxu1 }
 0x431   :  { %v1824_v27 = vmax.f32 %v1822_v33, %v1823_v5  ;;  %v2021_v45 = vsel %vm1812_vm3, %v2016_v46, -inf  ;;  %v2018_v0 = vpop.f32.mrb[75].mxu1 }
 0x432   :  { %v1818_v37 = vrot.slane %v1817_v36, 1  ;;  %v2022_v14 = vrot.slane %v2021_v45, 4  ;;  %v2028_v53 = vsel %vm1812_vm3, %v2018_v0, -inf }
 0x433   :  { %v1825_v38 = vrot.slane %v1824_v27, 1  ;;  %v2029_v55 = vrot.slane %v2028_v53, 4 }
 0x434   :  { %v1819_v2 = vmax.f32 %v1817_v36, %v1818_v37  ;;  %v2023_v43 = vmax.f32 %v2021_v45, %v2022_v14 }
 0x435   :  { %v1826_v22 = vmax.f32 %v1824_v27, %v1825_v38  ;;  %v2030_v56 = vmax.f32 %v2028_v53, %v2029_v55 }
 0x436   :  { %v1827_v10 = vsub.f32 %v1807_v8, %v1819_v2  ;;  %v2024_v39 = vrot.slane %v2023_v43, 2 }
 0x437   :  { %v1828_v40 = vsub.f32 %v1809_v9, %v1826_v22  ;;  %v2031_v16 = vrot.slane %v2030_v56, 2 }
 0x438   :  { %v1829_v19 = vmul.f32 1.442695, %v1827_v10  ;;  %v2025_v52 = vmax.f32 %v2023_v43, %v2024_v39 }
 0x439   :  { %v1831_v50 = vmul.f32 1.442695, %v1828_v40  ;;  %v2032_v44 = vmax.f32 %v2030_v56, %v2031_v16 }
 0x43a   :  { %6776 = vpow2.f32 %v1829_v19  ;;  %v2026_v6 = vrot.slane %v2025_v52, 1 }
 0x43b   :  { %6778 = vpow2.f32 %v1831_v50  ;;  %v2033_v33 = vrot.slane %v2032_v44, 1 }
 0x43c   :  { %v2027_v3 = vmax.f32 %v2025_v52, %v2026_v6 }
 0x43d   :  { %v2034_v5 = vmax.f32 %v2032_v44, %v2033_v33 }
 0x43e   :  { %v2035_v51 = vsub.f32 %v2016_v46, %v2027_v3 }
 0x43f   :  { %v2036_v41 = vsub.f32 %v2018_v0, %v2034_v5 }
 0x440   :  { %v2037_v36 = vmul.f32 1.442695, %v2035_v51 }
 0x441   :  { %v2039_v45 = vmul.f32 1.442695, %v2036_v41 }
 0x442   :  { %6780 = vpow2.f32 %v2037_v36 }
 0x443   :  { %6782 = vpow2.f32 %v2039_v45 }
 0x444   :  { %v6777_v8 = vpop.eup %6776 }
 0x445   :  { %v6779_v27 = vpop.eup %6778  ;;  %v1833_v9 = vsel %vm1812_vm3, %v6777_v8, 0.0 }
 0x446   :  { %v1834_v37 = vrot.slane %v1833_v9, 4  ;;  %v1840_v14 = vsel %vm1812_vm3, %v6779_v27, 0.0 }
 0x447   :  { %v1841_v53 = vrot.slane %v1840_v14, 4 }
 0x448   :  { %v1835_v38 = vadd.f32 %v1834_v37, %v1833_v9 }
 0x449   :  { %v1842_v55 = vadd.f32 %v1841_v53, %v1840_v14 }
 0x44a   :  { %v1836_v2 = vrot.slane %v1835_v38, 2 }
 0x44b   :  { %v1843_v43 = vrot.slane %v1842_v55, 2 }
 0x44c   :  { %v6781_v22 = vpop.eup %6780  ;;  %v1837_v56 = vadd.f32 %v1836_v2, %v1835_v38 }
 0x44d   :  { %v6783_v46 = vpop.eup %6782  ;;  %v1844_v0 = vadd.f32 %v1843_v43, %v1842_v55  ;;  %v2041_v51 = vsel %vm1812_vm3, %v6781_v22, 0.0 }
 0x44e   :  { %v2042_v41 = vrot.slane %v2041_v51, 4  ;;  %v2048_v10 = vsel %vm1812_vm3, %v6783_v46, 0.0  ;;  %v1838_v39 = vrot.slane %v1837_v56, 1 }
 0x44f   :  { %v2049_v40 = vrot.slane %v2048_v10, 4  ;;  %v1845_v16 = vrot.slane %v1844_v0, 1 }
 0x450   :  { %v2043_v19 = vadd.f32 %v2042_v41, %v2041_v51  ;;  %v1839_v52 = vadd.f32 %v1838_v39, %v1837_v56 }
 0x451   :  { %v2050_v50 = vadd.f32 %v2049_v40, %v2048_v10  ;;  %v1846_v44 = vadd.f32 %v1845_v16, %v1844_v0 }
 0x452   :  { %v2044_v6 = vrot.slane %v2043_v19, 2  ;;  %6784 = vrcp.f32 %v1839_v52 }
 0x453   :  { %v2051_v33 = vrot.slane %v2050_v50, 2  ;;  %6786 = vrcp.f32 %v1846_v44 }
 0x454   :  { %v2045_v3 = vadd.f32 %v2044_v6, %v2043_v19 }
 0x455   :  { %v2052_v5 = vadd.f32 %v2051_v33, %v2050_v50 }
 0x456   :  { %v2046_v36 = vrot.slane %v2045_v3, 1 }
 0x457   :  { %v2053_v45 = vrot.slane %v2052_v5, 1 }
 0x458   :  { %v2047_v9 = vadd.f32 %v2046_v36, %v2045_v3 }
 0x459   :  { %v2054_v37 = vadd.f32 %v2053_v45, %v2052_v5  ;;  %v2363_v45 = vrot.slane %v7918_v7, 4 }
 0x45a   :  { %6788 = vrcp.f32 %v2047_v9 }
 0x45b   :  { %6790 = vrcp.f32 %v2054_v37 }
 0x45c   :  { %v6785_v14 = vpop.eup %6784 }
 0x45d   :  { %v6787_v53 = vpop.eup %6786  ;;  %v1849_v38 = vmul.f32 %v6785_v14, %v6777_v8 }
 0x45e   :  { %v1850_v55 = vmul.f32 %v6787_v53, %v6779_v27 }
 0x45f   :  { %v1851_v2 = vadd.f32 1e-08, %v1849_v38 }
 0x460   :  { %v1852_v43 = vadd.f32 1e-08, %v1850_v55 }
 0x461   :  { %v1853_v56 = vsel %vm1812_vm3, %v1851_v2, 0.0 }
 0x462   :  { %v1854_v0 = vsel %vm1812_vm3, %v1852_v43, 0.0 }
 0x463   :  { %v1855_v51 = vadd.f32 %v1854_v0, %v1853_v56 }
 0x464   :  { %v6789_v41 = vpop.eup %6788 }
 0x465   :  { %v6791_v10 = vpop.eup %6790  ;;  %1856 = vadd.xlane.f32.xlu1 %v1855_v51  ;;  %v2057_v39 = vmul.f32 %v6789_v41, %v6781_v22  ;;  %v8710_v22 = vmov 0.0  }
 0x466   :  { %v2058_v40 = vmul.f32 %v6791_v10, %v6783_v46 }
 0x467   :  { %v2059_v16 = vadd.f32 1e-08, %v2057_v39 }
 0x468   :  { %v2060_v19 = vadd.f32 1e-08, %v2058_v40 }
 0x469   :  { %v2061_v52 = vsel %vm1812_vm3, %v2059_v16, 0.0 }
 0x46a   :  { %v2062_v50 = vsel %vm1812_vm3, %v2060_v19, 0.0 }
 0x46b   :  { %v2063_v8 = vadd.f32 %v2062_v50, %v2061_v52 }
 0x46d   :  { %2064 = vadd.xlane.f32.xlu0 %v2063_v8 }
 0x4f2   :  { %v1857_v27 = vpop.xlane.xlu1 %1856 }
 0x4f3   :  { %6792 = vrcp.f32 %v1857_v27 }
 0x4fa   :  { %v2065_v44 = vpop.xlane.xlu0 %2064 }
 0x4fb   :  { %6794 = vrcp.f32 %v2065_v44 }
 0x4fd   :  { %v6793_v6 = vpop.eup %6792 }
 0x4fe   :  { %v1860_v33 = vmul.f32 %v6793_v6, %v1852_v43  ;;  %v1859_v3 = vmul.f32 %v6793_v6, %v1851_v2 }
 0x500   :  { %1925 = vmatprep.mubr.f32.mxu0 %v1860_v33 }
 0x501   :  { %1926 = vmatmul.mubr.f32.vlgmr.msra.gmra.mrb[58].mxu0 %v1859_v3 }
 0x502   :  { %6383 = vmatpush1.bf16.msra.mxu0 %v7887_v58  ;;  %2222 = vmatprep.mubr.f32.mxu0 %v8710_v22 }
 0x503   :  { %6385 = vmatprep.subr.bf16.mxu0 %v7900_v15 }
 0x505   :  { %v6795_v46 = vpop.eup %6794 }
 0x506   :  { %6387 = vmatpush1.bf16.msra.mxu0 %v7896_v57  ;;  %v2068_v5 = vmul.f32 %v6795_v46, %v2060_v19  ;;  %v2067_v36 = vmul.f32 %v6795_v46, %v2059_v16 }
 0x507   :  { %6389 = vmatprep.subr.bf16.mxu0 %v7908_v18 }
 0x508   :  { %2133 = vmatprep.mubr.f32.mxu1 %v2068_v5 }
 0x509   :  { %2134 = vmatmul.mubr.f32.vlgmr.msra.gmra.mrb[76].mxu1 %v2067_v36  ;;  %5933 = vmatmul.mubr.msk.f32.vlgmr.msra.gmra.mrb[60].mxu0 %vm239_vm0, %v7918_v7 }
 0x50a   :  { %6399 = vmatpush1.bf16.msra.mxu1 %v7902_v26  ;;  %2430 = vmatprep.mubr.f32.mxu1 %v8710_v22 }
 0x50b   :  { %6401 = vmatprep.subr.bf16.mxu1 %v7914_v24 }
 0x50e   :  { %6403 = vmatpush1.bf16.msra.mxu1 %v7910_v47 }
 0x50f   :  { %6405 = vmatprep.subr.bf16.mxu1 %v7925_v12  ;;  %6391 = vmatpush1.bf16.xpose.msra.mxu0 %v7904_v63 }
 0x510   :  { %6393 = vmatprep.subr.bf16.mxu0 %v7916_v60 }
 0x511   :  { %5934 = vmatmul.mubr.msk.f32.vlgmr.msra.gmra.mrb[78].mxu1 %vm239_vm0, %v2363_v45 }
 0x517   :  { %6407 = vmatpush1.bf16.xpose.msra.mxu1 %v7921_v4  ;;  %6395 = vmatpush1.bf16.xpose.msra.mxu0 %v7912_v25 }
 0x518   :  { %6409 = vmatprep.subr.bf16.mxu1 %v7933_v30 }
 0x51f   :  { %6411 = vmatpush1.bf16.xpose.msra.mxu1 %v7931_v59 }
 0x5d4   :  { %v1927_v9 = vpop.f32.mrb[58].mxu0 }
 0x5d5   :  { %v1929_v37 = vpop.f32.mrb[59].mxu0 }
 0x5dc   :  { %v2135_v14 = vpop.f32.mrb[76].mxu1  ;;  %v2224_v7 = vpop.f32.mrb[60].mxu0 }
 0x5dd   :  { %v2556_v53 = vrot.slane %v2135_v14, 4  ;;  %v2229_v38 = vsel %vm1812_vm3, %v2224_v7, -inf  ;;  %v2137_v55 = vpop.f32.mrb[77].mxu1  ;;  %v2226_v2 = vpop.f32.mrb[61].mxu0 }
 0x5de   :  { %v2230_v43 = vrot.slane %v2229_v38, 4  ;;  %v2236_v56 = vsel %vm1812_vm3, %v2226_v2, -inf }
 0x5df   :  { %v2237_v0 = vrot.slane %v2236_v56, 4  ;;  %v7974_v51 = vsel %vm1812_vm3, %v1927_v9, %v2556_v53 }
 0x5e0   :  { %v2231_v41 = vmax.f32 %v2229_v38, %v2230_v43 }
 0x5e1   :  { %v2238_v10 = vmax.f32 %v2236_v56, %v2237_v0 }
 0x5e2   :  { %v2232_v39 = vrot.slane %v2231_v41, 2 }
 0x5e3   :  { %v2239_v40 = vrot.slane %v2238_v10, 2 }
 0x5e4   :  { %v2233_v16 = vmax.f32 %v2231_v41, %v2232_v39  ;;  %v2432_v19 = vpop.f32.mrb[78].mxu1 }
 0x5e5   :  { %v2240_v52 = vmax.f32 %v2238_v10, %v2239_v40  ;;  %v2437_v50 = vsel %vm1812_vm3, %v2432_v19, -inf  ;;  %v2434_v8 = vpop.f32.mrb[79].mxu1 }
 0x5e6   :  { %v2234_v27 = vrot.slane %v2233_v16, 1  ;;  %v2438_v44 = vrot.slane %v2437_v50, 4  ;;  %v2444_v6 = vsel %vm1812_vm3, %v2434_v8, -inf }
 0x5e7   :  { %v2241_v33 = vrot.slane %v2240_v52, 1  ;;  %v2445_v3 = vrot.slane %v2444_v6, 4 }
 0x5e8   :  { %v2235_v46 = vmax.f32 %v2233_v16, %v2234_v27  ;;  %v2439_v5 = vmax.f32 %v2437_v50, %v2438_v44 }
 0x5e9   :  { %v2242_v36 = vmax.f32 %v2240_v52, %v2241_v33  ;;  %v2446_v45 = vmax.f32 %v2444_v6, %v2445_v3 }
 0x5ea   :  { %v2243_v9 = vsub.f32 %v2224_v7, %v2235_v46  ;;  %v2440_v37 = vrot.slane %v2439_v5, 2 }
 0x5eb   :  { %v2244_v14 = vsub.f32 %v2226_v2, %v2242_v36  ;;  %v2447_v53 = vrot.slane %v2446_v45, 2 }
 0x5ec   :  { %v2245_v38 = vmul.f32 1.442695, %v2243_v9  ;;  %v2441_v55 = vmax.f32 %v2439_v5, %v2440_v37 }
 0x5ed   :  { %v2247_v43 = vmul.f32 1.442695, %v2244_v14  ;;  %v2448_v56 = vmax.f32 %v2446_v45, %v2447_v53 }
 0x5ee   :  { %6796 = vpow2.f32 %v2245_v38  ;;  %v2442_v0 = vrot.slane %v2441_v55, 1 }
 0x5ef   :  { %6798 = vpow2.f32 %v2247_v43  ;;  %v2449_v41 = vrot.slane %v2448_v56, 1 }
 0x5f0   :  { %v2443_v10 = vmax.f32 %v2441_v55, %v2442_v0 }
 0x5f1   :  { %v2450_v39 = vmax.f32 %v2448_v56, %v2449_v41 }
 0x5f2   :  { %v2451_v40 = vsub.f32 %v2432_v19, %v2443_v10 }
 0x5f3   :  { %v2452_v59 = vsub.f32 %v2434_v8, %v2450_v39 }
 0x5f4   :  { %v2453_v16 = vmul.f32 1.442695, %v2451_v40 }
 0x5f5   :  { %v2455_v50 = vmul.f32 1.442695, %v2452_v59 }
 0x5f6   :  { %6800 = vpow2.f32 %v2453_v16 }
 0x5f7   :  { %6802 = vpow2.f32 %v2455_v50 }
 0x5f8   :  { %v6797_v7 = vpop.eup %6796 }
 0x5f9   :  { %v6799_v52 = vpop.eup %6798  ;;  %v2249_v2 = vsel %vm1812_vm3, %v6797_v7, 0.0 }
 0x5fa   :  { %v2250_v27 = vrot.slane %v2249_v2, 4  ;;  %v2256_v44 = vsel %vm1812_vm3, %v6799_v52, 0.0 }
 0x5fb   :  { %v2257_v6 = vrot.slane %v2256_v44, 4 }
 0x5fc   :  { %v2251_v33 = vadd.f32 %v2250_v27, %v2249_v2 }
 0x5fd   :  { %v2258_v3 = vadd.f32 %v2257_v6, %v2256_v44 }
 0x5fe   :  { %v2252_v46 = vrot.slane %v2251_v33, 2 }
 0x5ff   :  { %v2259_v5 = vrot.slane %v2258_v3, 2 }
 0x600   :  { %v6801_v36 = vpop.eup %6800  ;;  %v2253_v45 = vadd.f32 %v2252_v46, %v2251_v33 }
 0x601   :  { %v6803_v19 = vpop.eup %6802  ;;  %v2260_v8 = vadd.f32 %v2259_v5, %v2258_v3  ;;  %v2457_v59 = vsel %vm1812_vm3, %v6801_v36, 0.0 }
 0x602   :  { %v2458_v9 = vrot.slane %v2457_v59, 4  ;;  %v2464_v37 = vsel %vm1812_vm3, %v6803_v19, 0.0  ;;  %v2254_v14 = vrot.slane %v2253_v45, 1 }
 0x603   :  { %v2465_v53 = vrot.slane %v2464_v37, 4  ;;  %v2261_v38 = vrot.slane %v2260_v8, 1 }
 0x604   :  { %v2459_v55 = vadd.f32 %v2458_v9, %v2457_v59  ;;  %v2255_v43 = vadd.f32 %v2254_v14, %v2253_v45 }
 0x605   :  { %v2466_v56 = vadd.f32 %v2465_v53, %v2464_v37  ;;  %v2262_v0 = vadd.f32 %v2261_v38, %v2260_v8 }
 0x606   :  { %v2460_v41 = vrot.slane %v2459_v55, 2  ;;  %6804 = vrcp.f32 %v2255_v43 }
 0x607   :  { %v2467_v10 = vrot.slane %v2466_v56, 2  ;;  %6806 = vrcp.f32 %v2262_v0 }
 0x608   :  { %v2461_v39 = vadd.f32 %v2460_v41, %v2459_v55 }
 0x609   :  { %v2468_v40 = vadd.f32 %v2467_v10, %v2466_v56 }
 0x60a   :  { %v2462_v16 = vrot.slane %v2461_v39, 1 }
 0x60b   :  { %v2469_v50 = vrot.slane %v2468_v40, 1 }
 0x60c   :  { %v2463_v2 = vadd.f32 %v2462_v16, %v2461_v39  ;;  %v85_v16 = vld [vmem:[%s8621_s4] sm:$0xff] }
 0x60d   :  { %v2470_v27 = vadd.f32 %v2469_v50, %v2468_v40  ;;  %v86_v50 = vld [vmem:[%s8621_s4 + $0x8] sm:$0xff] }
 0x60e   :  { %6808 = vrcp.f32 %v2463_v2  ;;  %v87_v2 = vld [vmem:[%s8621_s4 + $0x10] sm:$0xff] }
 0x60f   :  { %6810 = vrcp.f32 %v2470_v27  ;;  %v7997_v27 = vpack.c.bf16 %v86_v50, %v85_v16  ;;  %v105_v50 = vld [vmem:[%s8624_s7 + $0x40] sm:$0xff] }
 0x610   :  { %v6805_v44 = vpop.eup %6804 }
 0x611   :  { %v6807_v6 = vpop.eup %6806  ;;  %v2265_v33 = vmul.f32 %v6805_v44, %v6797_v7  ;;  %6413 = vmatprep.subr.bf16.mxu0 %v7997_v27 }
 0x612   :  { %v2266_v3 = vmul.f32 %v6807_v6, %v6799_v52  ;;  %v89_v6 = vld [vmem:[%s8622_s5] sm:$0xff] }
 0x613   :  { %v2267_v46 = vadd.f32 1e-08, %v2265_v33  ;;  %v90_v33 = vld [vmem:[%s8622_s5 + $0x8] sm:$0xff] }
 0x614   :  { %v2268_v5 = vadd.f32 1e-08, %v2266_v3  ;;  %v8014_v3 = vpack.c.bf16 %v90_v33, %v89_v6  ;;  %v107_v6 = vld [vmem:[%s8624_s7 + $0x50] sm:$0xff]  ;;  %v108_v33 = vld [vmem:[%s8624_s7 + $0x58] sm:$0xff] }
 0x615   :  { %v2269_v45 = vsel %vm1812_vm3, %v2267_v46, 0.0 }
 0x616   :  { %v2270_v8 = vsel %vm1812_vm3, %v2268_v5, 0.0 }
 0x617   :  { %v2271_v59 = vadd.f32 %v2270_v8, %v2269_v45  ;;  %v91_v45 = vld [vmem:[%s8622_s5 + $0x10] sm:$0xff]  ;;  %v92_v8 = vld [vmem:[%s8622_s5 + $0x18] sm:$0xff] }
 0x618   :  { %v6809_v9 = vpop.eup %6808 }
 0x619   :  { %v6811_v37 = vpop.eup %6810  ;;  %2272 = vadd.xlane.f32.xlu1 %v2271_v59  ;;  %v2473_v14 = vmul.f32 %v6809_v9, %v6801_v36 }
 0x61a   :  { %v2474_v53 = vmul.f32 %v6811_v37, %v6803_v19 }
 0x61b   :  { %v2475_v38 = vadd.f32 1e-08, %v2473_v14  ;;  %v8023_v14 = vpack.c.bf16 %v92_v8, %v91_v45  ;;  %v110_v45 = vld [vmem:[%s8624_s7 + $0x68] sm:$0xff] }
 0x61c   :  { %v2476_v55 = vadd.f32 1e-08, %v2474_v53 }
 0x61d   :  { %v2477_v43 = vsel %vm1812_vm3, %v2475_v38, 0.0 }
 0x61e   :  { %v2478_v56 = vsel %vm1812_vm3, %v2476_v55, 0.0 }
 0x61f   :  { %v2479_v7 = vadd.f32 %v2478_v56, %v2477_v43  ;;  %v8711_v43 = vld [vmem:[#allocation10_spill] sm:$0xff] }
 0x621   :  { %2480 = vadd.xlane.f32.xlu0 %v2479_v7  ;;  %v99_v7 = vld [vmem:[%s8624_s7 + $0x10] sm:$0xff] }
 0x6a6   :  { %v2273_v52 = vpop.xlane.xlu1 %2272 }
 0x6a7   :  { %6812 = vrcp.f32 %v2273_v52  ;;  %v100_v52 = vld [vmem:[%s8624_s7 + $0x18] sm:$0xff] }
 0x6ae   :  { %v2481_v0 = vpop.xlane.xlu0 %2480 }
 0x6af   :  { %6814 = vrcp.f32 %v2481_v0  ;;  %v8047_v0 = vpack.c.bf16 %v100_v52, %v99_v7 }
 0x6b1   :  { %v6813_v41 = vpop.eup %6812 }
 0x6b2   :  { %v2276_v10 = vmul.f32 %v6813_v41, %v2268_v5  ;;  %v2275_v39 = vmul.f32 %v6813_v41, %v2267_v46  ;;  %v101_v41 = vld [vmem:[%s8624_s7 + $0x20] sm:$0xff] }
 0x6b4   :  { %2341 = vmatprep.mubr.f32.mxu0 %v2276_v10  ;;  %v102_v10 = vld [vmem:[%s8624_s7 + $0x28] sm:$0xff] }
 0x6b5   :  { %2342 = vmatmul.mubr.f32.vlgmr.msra.gmra.mrb[62].mxu0 %v2275_v39  ;;  %v8712_v39 = vld [vmem:[#allocation9_spill] sm:$0xff] }
 0x6b6   :  { %6122 = vmatprep.mubr.msk.f32.mxu0 %vm239_vm0, %v7974_v51  ;;  %v88_v51 = vld [vmem:[%s8621_s4 + $0x18] sm:$0xff]  ;;  %6415 = vmatpush3.bf16.msra.mxu0 %v7997_v27 }
 0x6b7   :  { %v8002_v44 = vpack.c.bf16 %v88_v51, %v87_v2  ;;  %v106_v2 = vld [vmem:[%s8624_s7 + $0x48] sm:$0xff] }
 0x6b8   :  { %v8079_v51 = vpack.c.bf16 %v106_v2, %v105_v50 }
 0x6b9   :  { %v6815_v36 = vpop.eup %6814  ;;  %6417 = vmatprep.subr.bf16.mxu0 %v8002_v44 }
 0x6ba   :  { %v2484_v19 = vmul.f32 %v6815_v36, %v2476_v55  ;;  %v2483_v40 = vmul.f32 %v6815_v36, %v2475_v38  ;;  %6419 = vmatpush3.bf16.msra.mxu0 %v8002_v44  ;;  %v97_v38 = vld [vmem:[%s8624_s7] sm:$0xff]  ;;  %v98_v55 = vld [vmem:[%s8624_s7 + $0x8] sm:$0xff]  ;;  %v8059_v36 = vpack.c.bf16 %v102_v10, %v101_v41 }
 0x6bb   :  { %6421 = vmatprep.subr.bf16.mxu0 %v8014_v3  ;;  %v8037_v56 = vpack.c.bf16 %v98_v55, %v97_v38  ;;  %v5938_v55 = vld [vmem:[%s8625_s8 + $0x5] ss:$0 sm:$0xff] }
 0x6bc   :  { %2549 = vmatprep.mubr.f32.mxu1 %v2484_v19  ;;  %v103_v19 = vld [vmem:[%s8624_s7 + $0x30] sm:$0xff] }
 0x6bd   :  { %2550 = vmatmul.mubr.f32.vlgmr.msra.gmra.mrb[80].mxu1 %v2483_v40  ;;  %v104_v40 = vld [vmem:[%s8624_s7 + $0x38] sm:$0xff] }
 0x6be   :  { %v8069_v16 = vpack.c.bf16 %v104_v40, %v103_v19  ;;  %v8123_v19 = vld [vmem:[%s8625_s8 + $0x4] ss:$0 sm:$0xff] }
 0x788   :  { %v2343_v46 = vpop.f32.mrb[62].mxu0 }
 0x789   :  { %v2345_v5 = vpop.f32.mrb[63].mxu0 }
 0x78a   :  { %v109_v5 = vld [vmem:[%s8624_s7 + $0x60] sm:$0xff] }
 0x78b   :  { %v8099_v8 = vpack.c.bf16 %v110_v45, %v109_v5 }
 0x78d   :  { %8713 = vst [vmem:[#allocation10_spill] sm:$0xff] %v8099_v8 }
 0x790   :  { %v2551_v59 = vpop.f32.mrb[80].mxu1 }
 0x791   :  { %v2559_v9 = vrot.slane %v2551_v59, 4  ;;  %v2553_v37 = vpop.f32.mrb[81].mxu1  ;;  %v111_v59 = vld [vmem:[%s8624_s7 + $0x70] sm:$0xff] }
 0x793   :  { %v2562_v53 = vsel %vm1812_vm3, %v2343_v46, %v2559_v9  ;;  %v8089_v46 = vpack.c.bf16 %v108_v33, %v107_v6  ;;  %v112_v9 = vld [vmem:[%s8624_s7 + $0x78] sm:$0xff]  ;;  %s7014_s7 = smov 64  }
 0x794   :  { %6123 = vmatmul.mubr.msk.f32.vlgmr.msra.gmra.mrb[64].mxu0 %vm239_vm0, %v2562_v53  ;;  %v8109_v37 = vpack.c.bf16 %v112_v9, %v111_v59 }
 0x795   :  { %6423 = vmatpush3.bf16.msra.mxu0 %v8014_v3  ;;  %6133 = vmatprep.mubr.msk.f32.mxu0 %vm239_vm0, %v8711_v43 }
 0x796   :  { %6425 = vmatprep.subr.bf16.mxu0 %v8023_v14  ;;  %8714 = vst [vmem:[#allocation9_spill] sm:$0xff] %v8109_v37 }
 0x799   :  { %6427 = vmatpush3.bf16.msra.mxu0 %v8023_v14 }
 0x79a   :  { %6437 = vmatprep.subr.bf16.mxu0 %v8037_v56 }
 0x79c   :  { %6134 = vmatmul.mubr.msk.f32.vlgmr.msra.gmra.mrb[66].mxu0 %vm239_vm0, %v8712_v39 }
 0x79d   :  { %6439 = vmatpush3.bf16.msra.mxu0 %v8037_v56 }
 0x79e   :  { %6441 = vmatprep.subr.bf16.mxu0 %v8047_v0 }
 0x7a1   :  { %6443 = vmatpush3.bf16.msra.mxu0 %v8047_v0 }
 0x7a2   :  { %6445 = vmatprep.subr.bf16.mxu0 %v8059_v36 }
 0x7a5   :  { %6447 = vmatpush3.bf16.msra.mxu0 %v8059_v36 }
 0x7a6   :  { %6449 = vmatprep.subr.bf16.mxu0 %v8069_v16 }
 0x7a9   :  { %6451 = vmatpush3.bf16.msra.mxu0 %v8069_v16 }
 0x7aa   :  { %6453 = vmatprep.subr.bf16.mxu0 %v8079_v51 }
 0x7ad   :  { %6455 = vmatpush3.bf16.msra.mxu0 %v8079_v51 }
 0x7ae   :  { %6457 = vmatprep.subr.bf16.mxu0 %v8089_v46 }
 0x7b1   :  { %6459 = vmatpush3.bf16.msra.mxu0 %v8089_v46 }
 0x7b2   :  { %6461 = vmatprep.subr.bf16.mxu0 %v8099_v8 }
 0x7b5   :  { %6463 = vmatpush3.bf16.msra.mxu0 %v8099_v8 }
 0x7b6   :  { %6465 = vmatprep.subr.bf16.mxu0 %v8109_v37 }
 0x7b9   :  { %6467 = vmatpush3.bf16.msra.mxu0 %v8109_v37 }
 0x7ba   :  { %6493 = vmatprep.subr.bf16.mxu0 %v7868_v35 }
 0x867   :  { %v6124_v53 = vpop.f32.mrb[64].mxu0 }
 0x868   :  { %v2639_v38 = vpop.f32.mrb[65].mxu0  ;;  %v2645_v40 = vadd.f32 %v6124_v53, %v8123_v19 }
 0x869   :  { %v2640_v50 = vadd.f32 %v8123_v19, %v2639_v38 }
 0x86f   :  { %v6135_v7 = vpop.f32.mrb[66].mxu0 }
 0x870   :  { %v2730_v52 = vadd.f32 %v6135_v7, %v5938_v55  ;;  %v2724_v41 = vpop.f32.mrb[67].mxu0 }
 0x871   :  { %v2725_v10 = vadd.f32 %v5938_v55, %v2724_v41 }
 0x872   :  { %2751 = vrot.lane.b32.xlu1 %v2730_v52, %s7014_s7  ;;  %v2734_v2 = vadd.f32 %v2730_v52, %v2645_v40 }
 0x873   :  { %2749 = vrot.lane.b32.xlu0 %v2725_v10, %s7014_s7  ;;  %v2733_v6 = vadd.f32 %v2725_v10, %v2640_v50 }
 0x874   :  { %v5942_v33 = vmul.f32 -1.442695, %v2734_v2 }
 0x875   :  { %v5941_v5 = vmul.f32 -1.442695, %v2733_v6 }
 0x876   :  { %6816 = vpow2.f32 %v5942_v33 }
 0x877   :  { %6818 = vpow2.f32 %v5941_v5 }
 0x880   :  { %v6817_v45 = vpop.eup %6816 }
 0x881   :  { %v6819_v59 = vpop.eup %6818  ;;  %v2742_v9 = vadd.f32 1.0, %v6817_v45 }
 0x882   :  { %v2741_v55 = vadd.f32 1.0, %v6819_v59 }
 0x883   :  { %6820 = vrcp.f32 %v2742_v9 }
 0x884   :  { %6822 = vrcp.f32 %v2741_v55 }
 0x88d   :  { %v6821_v7 = vpop.eup %6820 }
 0x88e   :  { %v6823_v35 = vpop.eup %6822  ;;  %v2770_v9 = vsub.f32 1.0, %v6821_v7 }
 0x88f   :  { %v2769_v33 = vsub.f32 1.0, %v6823_v35 }
 0x8e4   :  { %v2752_v41 = vpop.permute.xlu1 %2751 }
 0x8e5   :  { %v2756_v37 = vmul.f32 %v6821_v7, %v2752_v41  ;;  %v2750_v8 = vpop.permute.xlu0 %2749 }
 0x8e6   :  { %v2755_v53 = vmul.f32 %v6823_v35, %v2750_v8 }
 0x8e7   :  { %2761 = vrot.lane.b32.xlu0 %v2756_v37, %s7014_s7 }
 0x8e8   :  { %2759 = vrot.lane.b32.xlu1 %v2755_v53, %s7014_s7 }
 0x8eb   :  { %2781 = vrot.lane.b32.xlu0 %v8711_v43, %s7015_s17 }
 0x8ef   :  { %2783 = vrot.lane.b32.xlu0 %v8712_v39, %s7015_s17 }
 0x959   :  { %v2762_v38 = vpop.permute.xlu0 %2761 }
 0x95a   :  { %v2760_v52 = vpop.permute.xlu1 %2759  ;;  %v2766_v2 = vadd.f32 %v2762_v38, %v2645_v40 }
 0x95b   :  { %v2765_v10 = vadd.f32 %v2760_v52, %v2640_v50 }
 0x95d   :  { %6824 = vtanh.f32 %v2765_v10  ;;  %v2782_v37 = vpop.permute.xlu0 %2781 }
 0x95e   :  { %6826 = vtanh.f32 %v2766_v2  ;;  %v2787_v43 = vmul.f32 %v6823_v35, %v2782_v37 }
 0x961   :  { %v2784_v59 = vpop.permute.xlu0 %2783 }
 0x962   :  { %v2788_v40 = vmul.f32 %v6821_v7, %v2784_v59 }
 0x967   :  { %v6825_v6 = vpop.eup %6824 }
 0x968   :  { %2773 = vrot.lane.b32.xlu1 %v6825_v6, %s7016_s18  ;;  %v6827_v8 = vpop.eup %6826 }
 0x96c   :  { %2775 = vrot.lane.b32.xlu1 %v6827_v8, %s7016_s18 }
 0x9da   :  { %v2774_v5 = vpop.permute.xlu1 %2773 }
 0x9db   :  { %v2779_v45 = vmul.f32 %v2774_v5, %v2769_v33 }
 0x9dd   :  { %v8135_v39 = vadd.f32 %v2787_v43, %v2779_v45 }
 0x9de   :  { %v2776_v50 = vpop.permute.xlu1 %2775 }
 0x9df   :  { %v2780_v55 = vmul.f32 %v2776_v50, %v2770_v9  ;;  %2793 = vrot.lane.b32.xlu1 %v8135_v39, %s7016_s18  ;;  %v5944_v50 = vld [vmem:[%s8625_s8 + $0x3] ss:$0 sm:$0xff] }
 0x9e1   :  { %v8139_v41 = vadd.f32 %v2788_v40, %v2780_v55  ;;  %v5943_v40 = vld [vmem:[%s8625_s8 + $0x2] ss:$0 sm:$0xff] }
 0x9e2   :  { %v93_v55 = vld [vmem:[%s8623_s6] sm:$0xff] }
 0x9e3   :  { %2795 = vrot.lane.b32.xlu0 %v8139_v41, %s7016_s18 }
 0xa51   :  { %v2794_v53 = vpop.permute.xlu1 %2793 }
 0xa52   :  { %v2799_v38 = vsel %vm239_vm0, %v2794_v53, 0.0  ;;  %v94_v53 = vld [vmem:[%s8623_s6 + $0x8] sm:$0xff] }
 0xa53   :  { %2800 = vadd.xlane.f32.xlu1 %v2799_v38  ;;  %v95_v38 = vld [vmem:[%s8623_s6 + $0x10] sm:$0xff] }
 0xa55   :  { %v2796_v35 = vpop.permute.xlu0 %2795 }
 0xa56   :  { %v2802_v52 = vsel %vm239_vm0, %v2796_v35, 0.0  ;;  %v8168_v35 = vpack.c.bf16 %v94_v53, %v93_v55 }
 0xa57   :  { %2803 = vadd.xlane.f32.xlu0 %v2802_v52  ;;  %v96_v52 = vld [vmem:[%s8623_s6 + $0x18] sm:$0xff] }
 0xa58   :  { %6429 = vmatprep.subr.bf16.mxu1 %v8168_v35 }
 0xa59   :  { %6431 = vmatpush3.bf16.msra.mxu1 %v8168_v35 }
 0xae0   :  { %v2801_v10 = vpop.xlane.xlu1 %2800 }
 0xae1   :  { %v2805_v2 = vmul.f32 0.03125, %v2801_v10  ;;  %v8173_v10 = vpack.c.bf16 %v96_v52, %v95_v38 }
 0xae3   :  { %v2807_v7 = vsub.f32 %v8135_v39, %v2805_v2  ;;  %6433 = vmatprep.subr.bf16.mxu1 %v8173_v10 }
 0xae4   :  { %v2804_v6 = vpop.xlane.xlu0 %2803  ;;  %6435 = vmatpush3.bf16.msra.mxu1 %v8173_v10 }
 0xae5   :  { %v2806_v8 = vmul.f32 0.03125, %v2804_v6  ;;  %v2809_v37 = vmul.f32 %v2807_v7, %v2807_v7  ;;  %6469 = vmatprep.subr.bf16.mxu1 %v7759_v11 }
 0xae7   :  { %v2808_v33 = vsub.f32 %v8139_v41, %v2806_v8  ;;  %2813 = vrot.lane.b32.xlu0 %v2809_v37, %s7016_s18 }
 0xae9   :  { %v2810_v5 = vmul.f32 %v2808_v33, %v2808_v33 }
 0xaeb   :  { %2815 = vrot.lane.b32.xlu1 %v2810_v5, %s7016_s18 }
 0xb59   :  { %v2814_v43 = vpop.permute.xlu0 %2813 }
 0xb5a   :  { %v2819_v45 = vsel %vm239_vm0, %v2814_v43, 0.0 }
 0xb5b   :  { %2820 = vadd.xlane.f32.xlu1 %v2819_v45 }
 0xb5d   :  { %v2816_v59 = vpop.permute.xlu1 %2815 }
 0xb5e   :  { %v2822_v9 = vsel %vm239_vm0, %v2816_v59, 0.0 }
 0xb5f   :  { %2823 = vadd.xlane.f32.xlu0 %v2822_v9 }
 0xb6c   :  { %2848 = vrot.lane.b32.xlu1 %v5944_v50, %s7015_s17 }
 0xb75   :  { %2838 = vrot.lane.b32.xlu0 %v5943_v40, %s7015_s17 }
 0xbe8   :  { %v2821_v2 = vpop.xlane.xlu1 %2820 }
 0xbe9   :  { %v2825_v6 = vmul.f32 0.03125, %v2821_v2 }
 0xbeb   :  { %v2827_v8 = vadd.f32 1e-05, %v2825_v6 }
 0xbec   :  { %v2824_v37 = vpop.xlane.xlu0 %2823  ;;  %v8182_v50 = vpop.permute.xlu1 %2848 }
 0xbed   :  { %6828 = vrsqrt.f32 %v2827_v8  ;;  %v2826_v5 = vmul.f32 0.03125, %v2824_v37  ;;  %8716 = vst [vmem:[#allocation36_spill] sm:$0xff] %v8182_v50 }
 0xbef   :  { %v2828_v43 = vadd.f32 1e-05, %v2826_v5 }
 0xbf0   :  { %v8180_v59 = vpop.permute.xlu0 %2838 }
 0xbf1   :  { %6830 = vrsqrt.f32 %v2828_v43  ;;  %8715 = vst [vmem:[#allocation35_spill] sm:$0xff] %v8180_v59 }
 0xbf7   :  { %v6829_v45 = vpop.eup %6828 }
 0xbf8   :  { %v2831_v9 = vmul.f32 %v6829_v45, %v2807_v7 }
 0xbfa   :  { %v2841_v40 = vmul.f32 %v8180_v59, %v2831_v9 }
 0xbfb   :  { %v6831_v55 = vpop.eup %6830 }
 0xbfc   :  { %v2851_v53 = vadd.f32 %v8182_v50, %v2841_v40  ;;  %v2832_v38 = vmul.f32 %v6831_v55, %v2808_v33  ;;  %v8199_v33 = vld [vmem:[%s8625_s8 + $0x6] ss:$0 sm:$0xff]  ;;  %v8211_v40 = vld [vmem:[%s8625_s8 + $0x7] ss:$0 sm:$0xff] }
 0xbfd   :  { %8717 = vst [vmem:[#allocation37_spill] sm:$0xff] %v8199_v33  ;;  %8718 = vst [vmem:[#allocation38_spill] sm:$0xff] %v8211_v40 }
 0xbfe   :  { %2859 = vrot.lane.b32.xlu1 %v2851_v53, %s7016_s18  ;;  %v2842_v52 = vmul.f32 %v8180_v59, %v2832_v38 }
 0xc00   :  { %v2852_v2 = vadd.f32 %v8182_v50, %v2842_v52 }
 0xc02   :  { %2861 = vrot.lane.b32.xlu0 %v2852_v2, %s7016_s18 }
 0xc70   :  { %v2860_v6 = vpop.permute.xlu1 %2859 }
 0xc71   :  { %6144 = vmatprep.mubr.msk.f32.mxu1 %vm239_vm0, %v2860_v6 }
 0xc74   :  { %v2862_v7 = vpop.permute.xlu0 %2861 }
 0xc75   :  { %6145 = vmatmul.mubr.msk.f32.vlgmr.msra.gmra.mrb[82].mxu1 %vm239_vm0, %v2862_v7 }
 0xc76   :  { %6471 = vmatpush3.bf16.msra.mxu1 %v7759_v11 }
 0xc77   :  { %6473 = vmatprep.subr.bf16.mxu1 %v7811_v49 }
 0xc7a   :  { %6475 = vmatpush3.bf16.msra.mxu1 %v7811_v49 }
 0xc7b   :  { %6477 = vmatprep.subr.bf16.mxu1 %v7854_v20 }
 0xd48   :  { %v6146_v8 = vpop.f32.mrb[82].mxu1 }
 0xd49   :  { %v2939_v37 = vadd.f32 %v6146_v8, %v8199_v33  ;;  %v2933_v5 = vpop.f32.mrb[83].mxu1 }
 0xd4a   :  { %v2934_v43 = vadd.f32 %v8199_v33, %v2933_v5 }
 0xd4b   :  { %v2943_v9 = vmax.f32 %v2939_v37, 0.0 }
 0xd4c   :  { %v2942_v45 = vmax.f32 %v2934_v43, 0.0 }
 0xd4e   :  { %6179 = vmatprep.mubr.f32.mxu0 %v2942_v45 }
 0xd4f   :  { %6180 = vmatmul.mubr.f32.vlgmr.msra.gmra.mrb[68].mxu0 %v2943_v9 }
 0xd50   :  { %6495 = vmatpush1.bf16.msra.mxu0 %v7864_v42  ;;  %3463 = vmatprep.mubr.f32.mxu0 %v8710_v22 }
 0xd51   :  { %6497 = vmatprep.subr.bf16.mxu0 %v7879_v62 }
 0xd54   :  { %6499 = vmatpush1.bf16.msra.mxu0 %v7875_v61 }
 0xd55   :  { %6509 = vmatprep.subr.bf16.mxu0 %v7891_v48 }
 0xe22   :  { %v6181_v55 = vpop.f32.mrb[68].mxu0 }
 0xe23   :  { %v3020_v53 = vadd.f32 %v6181_v55, %v8211_v40  ;;  %v3014_v38 = vpop.f32.mrb[69].mxu0 }
 0xe24   :  { %v3015_v52 = vadd.f32 %v8211_v40, %v3014_v38 }
 0xe25   :  { %3027 = vrot.lane.b32.xlu0 %v3020_v53, %s7015_s17 }
 0xe26   :  { %3025 = vrot.lane.b32.xlu1 %v3015_v52, %s7015_s17 }
 0xe97   :  { %v3028_v2 = vpop.permute.xlu0 %3027 }
 0xe98   :  { %v8218_v6 = vadd.f32 %v3028_v2, %v8139_v41  ;;  %v3026_v7 = vpop.permute.xlu1 %3025 }
 0xe99   :  { %v8221_v8 = vadd.f32 %v3026_v7, %v8135_v39 }
 0xe9a   :  { %3037 = vrot.lane.b32.xlu0 %v8218_v6, %s7016_s18 }
 0xe9b   :  { %3035 = vrot.lane.b32.xlu1 %v8221_v8, %s7016_s18 }
 0xf0c   :  { %v8227_v37 = vpop.permute.xlu0 %3037 }
 0xf0d   :  { %v8229_v5 = vpop.permute.xlu1 %3035  ;;  %v3044_v43 = vsel %vm239_vm0, %v8227_v37, 0.0 }
 0xf0e   :  { %3045 = vadd.xlane.f32.xlu0 %v3044_v43  ;;  %v3041_v41 = vsel %vm239_vm0, %v8229_v5, 0.0 }
 0xf0f   :  { %3042 = vadd.xlane.f32.xlu1 %v3041_v41 }
 0xf9b   :  { %v3046_v39 = vpop.xlane.xlu0 %3045 }
 0xf9c   :  { %v3048_v45 = vmul.f32 0.03125, %v3046_v39  ;;  %v3043_v9 = vpop.xlane.xlu1 %3042  ;;  %v6952_v39 = vld [vmem:[%s8625_s8 + $0x1] ss:$0 sm:$0xff] }
 0xf9d   :  { %v3047_v55 = vmul.f32 0.03125, %v3043_v9 }
 0xf9e   :  { %v3050_v53 = vsub.f32 %v8218_v6, %v3048_v45  ;;  %v6953_v45 = vld [vmem:[%s8625_s8] ss:$0 sm:$0xff] }
 0xf9f   :  { %v3049_v38 = vsub.f32 %v8221_v8, %v3047_v55 }
 0xfa0   :  { %v3052_v52 = vmul.f32 %v3050_v53, %v3050_v53 }
 0xfa1   :  { %v3051_v2 = vmul.f32 %v3049_v38, %v3049_v38 }
 0xfa2   :  { %3057 = vrot.lane.b32.xlu1 %v3052_v52, %s7016_s18 }
 0xfa3   :  { %3055 = vrot.lane.b32.xlu0 %v3051_v2, %s7016_s18 }
0x1014   :  { %v3058_v7 = vpop.permute.xlu1 %3057 }
0x1015   :  { %v3056_v43 = vpop.permute.xlu0 %3055  ;;  %v3064_v40 = vsel %vm239_vm0, %v3058_v7, 0.0 }
0x1016   :  { %3065 = vadd.xlane.f32.xlu0 %v3064_v40  ;;  %v3061_v41 = vsel %vm239_vm0, %v3056_v43, 0.0 }
0x1017   :  { %3062 = vadd.xlane.f32.xlu1 %v3061_v41 }
0x1028   :  { %3082 = vrot.lane.b32.xlu1 %v6952_v39, %s7015_s17 }
0x102c   :  { %3076 = vrot.lane.b32.xlu0 %v6953_v45, %s7015_s17 }
0x10a3   :  { %v3066_v9 = vpop.xlane.xlu0 %3065 }
0x10a4   :  { %v3068_v55 = vmul.f32 0.03125, %v3066_v9  ;;  %v3063_v52 = vpop.xlane.xlu1 %3062 }
0x10a5   :  { %v3067_v2 = vmul.f32 0.03125, %v3063_v52 }
0x10a6   :  { %v3070_v40 = vadd.f32 1e-05, %v3068_v55 }
0x10a7   :  { %v3069_v7 = vadd.f32 1e-05, %v3067_v2  ;;  %v8249_v41 = vpop.permute.xlu0 %3076 }
0x10a8   :  { %6832 = vrsqrt.f32 %v3070_v40  ;;  %8719 = vst [vmem:[#allocation39_spill] sm:$0xff] %v8249_v41  ;;  %v8251_v62 = vpop.permute.xlu1 %3082 }
0x10a9   :  { %6834 = vrsqrt.f32 %v3069_v7  ;;  %8720 = vst [vmem:[#allocation40_spill] sm:$0xff] %v8251_v62 }
0x10b2   :  { %v6833_v43 = vpop.eup %6832 }
0x10b3   :  { %v6835_v48 = vpop.eup %6834  ;;  %v3074_v61 = vmul.f32 %v6833_v43, %v3050_v53 }
0x10b4   :  { %v3073_v39 = vmul.f32 %v6835_v48, %v3049_v38 }
0x10b5   :  { %v3080_v42 = vmul.f32 %v8249_v41, %v3074_v61 }
0x10b6   :  { %v3079_v45 = vmul.f32 %v8249_v41, %v3073_v39 }
0x10b7   :  { %v3086_v9 = vadd.f32 %v8251_v62, %v3080_v42 }
0x10b8   :  { %v3085_v52 = vadd.f32 %v8251_v62, %v3079_v45 }
0x10b9   :  { %3091 = vrot.lane.b32.xlu0 %v3086_v9, %s7016_s18 }
0x10ba   :  { %3089 = vrot.lane.b32.xlu1 %v3085_v52, %s7016_s18 }
0x112b   :  { %v3092_v2 = vpop.permute.xlu0 %3091 }
0x112c   :  { %v3090_v55 = vpop.permute.xlu1 %3089 }
0x112d   :  { %6190 = vmatprep.mubr.msk.f32.mxu1 %vm239_vm0, %v3090_v55 }
0x112e   :  { %6191 = vmatmul.mubr.msk.f32.vlgmr.msra.gmra.mrb[84].mxu1 %vm239_vm0, %v3092_v2 }
0x112f   :  { %6479 = vmatpush1.bf16.msra.mxu1 %v7852_v17  ;;  %3255 = vmatprep.mubr.f32.mxu1 %v8710_v22 }
0x1130   :  { %6481 = vmatprep.subr.bf16.mxu1 %v7860_v34 }
0x1133   :  { %6483 = vmatpush1.bf16.msra.mxu1 %v7858_v32 }
0x1134   :  { %6485 = vmatprep.subr.bf16.mxu1 %v7870_v23 }
0x1201   :  { %v8266_v42 = vpop.f32.mrb[84].mxu1 }
0x1202   :  { %v3163_v61 = vpop.f32.mrb[85].mxu1 }
0x1203   :  { %v3396_v48 = vrot.slane %v3163_v61, 4  ;;  %5951 = vmatmul.mubr.msk.f32.vlgmr.msra.gmra.mrb[86].mxu1 %vm239_vm0, %v3163_v61 }
0x1204   :  { %6487 = vmatpush1.bf16.xpose.msra.mxu1 %v7866_v29 }
0x1205   :  { %6489 = vmatprep.subr.bf16.mxu1 %v7881_v54  ;;  %5952 = vmatmul.mubr.msk.f32.vlgmr.msra.gmra.mrb[70].mxu0 %vm239_vm0, %v3396_v48 }
0x1206   :  { %6511 = vmatpush1.bf16.msra.mxu0 %v7887_v58  ;;  %3671 = vmatprep.mubr.f32.mxu0 %v8710_v22 }
0x1207   :  { %6513 = vmatprep.subr.bf16.mxu0 %v7900_v15 }
0x120a   :  { %6515 = vmatpush1.bf16.msra.mxu0 %v7896_v57 }
0x120b   :  { %6517 = vmatprep.subr.bf16.mxu0 %v7908_v18 }
0x120c   :  { %6491 = vmatpush1.bf16.xpose.msra.mxu1 %v7877_v31 }
0x120d   :  { %6501 = vmatprep.subr.bf16.mxu1 %v7889_v21  ;;  %5953 = vmatmul.mubr.msk.f32.vlgmr.msra.gmra.mrb[72].mxu0 %vm239_vm0, %v8266_v42 }
0x1213   :  { %6519 = vmatpush1.bf16.xpose.msra.mxu0 %v7904_v63 }
0x1214   :  { %6521 = vmatprep.subr.bf16.mxu0 %v7916_v60 }
0x121b   :  { %6523 = vmatpush1.bf16.xpose.msra.mxu0 %v7912_v25 }
0x121c   :  { %6541 = vmatprep.subr.bf16.mxu0 %v7997_v27 }
0x12d6   :  { %v3257_v53 = vpop.f32.mrb[86].mxu1 }
0x12d7   :  { %v3262_v38 = vsel %vm1812_vm3, %v3257_v53, -inf  ;;  %v3259_v40 = vpop.f32.mrb[87].mxu1 }
0x12d8   :  { %v3263_v7 = vrot.slane %v3262_v38, 4  ;;  %v3269_v43 = vsel %vm1812_vm3, %v3259_v40, -inf  ;;  %v3465_v39 = vpop.f32.mrb[70].mxu0 }
0x12d9   :  { %v3270_v45 = vrot.slane %v3269_v43, 4  ;;  %v3470_v9 = vsel %vm1812_vm3, %v3465_v39, -inf  ;;  %v3467_v52 = vpop.f32.mrb[71].mxu0 }
0x12da   :  { %v3264_v55 = vmax.f32 %v3262_v38, %v3263_v7  ;;  %v3471_v2 = vrot.slane %v3470_v9, 4  ;;  %v3477_v61 = vsel %vm1812_vm3, %v3467_v52, -inf }
0x12db   :  { %v3271_v48 = vmax.f32 %v3269_v43, %v3270_v45  ;;  %v3478_v25 = vrot.slane %v3477_v61, 4 }
0x12dc   :  { %v3265_v60 = vrot.slane %v3264_v55, 2  ;;  %v3472_v63 = vmax.f32 %v3470_v9, %v3471_v2 }
0x12dd   :  { %v3272_v21 = vrot.slane %v3271_v48, 2  ;;  %v3479_v31 = vmax.f32 %v3477_v61, %v3478_v25 }
0x12de   :  { %v3266_v18 = vmax.f32 %v3264_v55, %v3265_v60  ;;  %v3473_v57 = vrot.slane %v3472_v63, 2 }
0x12df   :  { %v3273_v15 = vmax.f32 %v3271_v48, %v3272_v21  ;;  %v3480_v58 = vrot.slane %v3479_v31, 2 }
0x12e0   :  { %v3267_v54 = vrot.slane %v3266_v18, 1  ;;  %v3474_v29 = vmax.f32 %v3472_v63, %v3473_v57  ;;  %v3673_v23 = vpop.f32.mrb[72].mxu0 }
0x12e1   :  { %v3274_v32 = vrot.slane %v3273_v15, 1  ;;  %v3481_v34 = vmax.f32 %v3479_v31, %v3480_v58  ;;  %v3678_v38 = vsel %vm1812_vm3, %v3673_v23, -inf  ;;  %v3675_v7 = vpop.f32.mrb[73].mxu0 }
0x12e2   :  { %v3268_v17 = vmax.f32 %v3266_v18, %v3267_v54  ;;  %v3475_v62 = vrot.slane %v3474_v29, 1  ;;  %v3679_v43 = vrot.slane %v3678_v38, 4  ;;  %v3685_v45 = vsel %vm1812_vm3, %v3675_v7, -inf }
0x12e3   :  { %v3275_v9 = vmax.f32 %v3273_v15, %v3274_v32  ;;  %v3482_v2 = vrot.slane %v3481_v34, 1  ;;  %v3686_v25 = vrot.slane %v3685_v45, 4 }
0x12e4   :  { %v3276_v60 = vsub.f32 %v3257_v53, %v3268_v17  ;;  %v3476_v55 = vmax.f32 %v3474_v29, %v3475_v62  ;;  %v3680_v21 = vmax.f32 %v3678_v38, %v3679_v43 }
0x12e5   :  { %v3277_v61 = vsub.f32 %v3259_v40, %v3275_v9  ;;  %v3483_v48 = vmax.f32 %v3481_v34, %v3482_v2  ;;  %v3687_v57 = vmax.f32 %v3685_v45, %v3686_v25 }
0x12e6   :  { %v3278_v63 = vmul.f32 1.442695, %v3276_v60  ;;  %v3484_v41 = vsub.f32 %v3465_v39, %v3476_v55  ;;  %v3681_v31 = vrot.slane %v3680_v21, 2 }
0x12e7   :  { %v3280_v58 = vmul.f32 1.442695, %v3277_v61  ;;  %v3485_v33 = vsub.f32 %v3467_v52, %v3483_v48  ;;  %v3688_v20 = vrot.slane %v3687_v57, 2 }
0x12e8   :  { %6836 = vpow2.f32 %v3278_v63  ;;  %v3486_v54 = vmul.f32 1.442695, %v3484_v41  ;;  %v3682_v18 = vmax.f32 %v3680_v21, %v3681_v31 }
0x12e9   :  { %6838 = vpow2.f32 %v3280_v58  ;;  %v3488_v49 = vmul.f32 1.442695, %v3485_v33  ;;  %v3689_v32 = vmax.f32 %v3687_v57, %v3688_v20 }
0x12ea   :  { %6840 = vpow2.f32 %v3486_v54  ;;  %v3683_v15 = vrot.slane %v3682_v18, 1 }
0x12eb   :  { %6842 = vpow2.f32 %v3488_v49  ;;  %v3690_v17 = vrot.slane %v3689_v32, 1 }
0x12ec   :  { %v3684_v29 = vmax.f32 %v3682_v18, %v3683_v15 }
0x12ed   :  { %v3691_v62 = vmax.f32 %v3689_v32, %v3690_v17 }
0x12ee   :  { %v3692_v34 = vsub.f32 %v3673_v23, %v3684_v29 }
0x12ef   :  { %v3693_v53 = vsub.f32 %v3675_v7, %v3691_v62 }
0x12f0   :  { %v3694_v40 = vmul.f32 1.442695, %v3692_v34 }
0x12f1   :  { %v3696_v39 = vmul.f32 1.442695, %v3693_v53 }
0x12f2   :  { %v6837_v38 = vpop.eup %6836  ;;  %6844 = vpow2.f32 %v3694_v40 }
0x12f3   :  { %v6839_v52 = vpop.eup %6838  ;;  %v3282_v43 = vsel %vm1812_vm3, %v6837_v38, 0.0  ;;  %6846 = vpow2.f32 %v3696_v39 }
0x12f4   :  { %v6841_v41 = vpop.eup %6840  ;;  %v3283_v45 = vrot.slane %v3282_v43, 4  ;;  %v3289_v20 = vsel %vm1812_vm3, %v6839_v52, 0.0 }
0x12f5   :  { %v6843_v33 = vpop.eup %6842  ;;  %v3290_v9 = vrot.slane %v3289_v20, 4  ;;  %v3490_v49 = vsel %vm1812_vm3, %v6841_v41, 0.0 }
0x12f6   :  { %v3284_v2 = vadd.f32 %v3283_v45, %v3282_v43  ;;  %v3491_v25 = vrot.slane %v3490_v49, 4  ;;  %v3497_v23 = vsel %vm1812_vm3, %v6843_v33, 0.0 }
0x12f7   :  { %v3291_v7 = vadd.f32 %v3290_v9, %v3289_v20  ;;  %v3498_v60 = vrot.slane %v3497_v23, 4 }
0x12f8   :  { %v3285_v55 = vrot.slane %v3284_v2, 2  ;;  %v3492_v21 = vadd.f32 %v3491_v25, %v3490_v49 }
0x12f9   :  { %v3292_v61 = vrot.slane %v3291_v7, 2  ;;  %v3499_v48 = vadd.f32 %v3498_v60, %v3497_v23 }
0x12fa   :  { %v3286_v57 = vadd.f32 %v3285_v55, %v3284_v2  ;;  %v3493_v63 = vrot.slane %v3492_v21, 2 }
0x12fb   :  { %v3293_v31 = vadd.f32 %v3292_v61, %v3291_v7  ;;  %v3500_v58 = vrot.slane %v3499_v48, 2 }
0x12fc   :  { %v6845_v54 = vpop.eup %6844  ;;  %v3494_v18 = vadd.f32 %v3493_v63, %v3492_v21  ;;  %v3287_v32 = vrot.slane %v3286_v57, 1 }
0x12fd   :  { %v6847_v15 = vpop.eup %6846  ;;  %v3501_v17 = vadd.f32 %v3500_v58, %v3499_v48  ;;  %v3698_v29 = vsel %vm1812_vm3, %v6845_v54, 0.0  ;;  %v3294_v62 = vrot.slane %v3293_v31, 1 }
0x12fe   :  { %v3699_v34 = vrot.slane %v3698_v29, 4  ;;  %v3705_v53 = vsel %vm1812_vm3, %v6847_v15, 0.0  ;;  %v3288_v40 = vadd.f32 %v3287_v32, %v3286_v57  ;;  %v3495_v39 = vrot.slane %v3494_v18, 1 }
0x12ff   :  { %v3706_v43 = vrot.slane %v3705_v53, 4  ;;  %v3295_v45 = vadd.f32 %v3294_v62, %v3293_v31  ;;  %v3502_v20 = vrot.slane %v3501_v17, 1 }
0x1300   :  { %v3700_v9 = vadd.f32 %v3699_v34, %v3698_v29  ;;  %6848 = vrcp.f32 %v3288_v40  ;;  %v3496_v49 = vadd.f32 %v3495_v39, %v3494_v18 }
0x1301   :  { %v3707_v2 = vadd.f32 %v3706_v43, %v3705_v53  ;;  %6850 = vrcp.f32 %v3295_v45  ;;  %v3503_v25 = vadd.f32 %v3502_v20, %v3501_v17 }
0x1302   :  { %v3701_v23 = vrot.slane %v3700_v9, 2  ;;  %6852 = vrcp.f32 %v3496_v49 }
0x1303   :  { %v3708_v7 = vrot.slane %v3707_v2, 2  ;;  %6854 = vrcp.f32 %v3503_v25 }
0x1304   :  { %v3702_v60 = vadd.f32 %v3701_v23, %v3700_v9 }
0x1305   :  { %v3709_v55 = vadd.f32 %v3708_v7, %v3707_v2 }
0x1306   :  { %v3703_v21 = vrot.slane %v3702_v60, 1 }
0x1307   :  { %v3710_v61 = vrot.slane %v3709_v55, 1 }
0x1308   :  { %v3704_v48 = vadd.f32 %v3703_v21, %v3702_v60 }
0x1309   :  { %v3711_v57 = vadd.f32 %v3710_v61, %v3709_v55 }
0x130a   :  { %v6849_v63 = vpop.eup %6848  ;;  %6856 = vrcp.f32 %v3704_v48 }
0x130b   :  { %v6851_v31 = vpop.eup %6850  ;;  %v3298_v58 = vmul.f32 %v6849_v63, %v6837_v38  ;;  %6858 = vrcp.f32 %v3711_v57 }
0x130c   :  { %v6853_v32 = vpop.eup %6852  ;;  %v3299_v18 = vmul.f32 %v6851_v31, %v6839_v52 }
0x130d   :  { %v6855_v29 = vpop.eup %6854  ;;  %v3300_v62 = vadd.f32 1e-08, %v3298_v58  ;;  %v3506_v17 = vmul.f32 %v6853_v32, %v6841_v41 }
0x130e   :  { %v3301_v34 = vadd.f32 1e-08, %v3299_v18  ;;  %v3507_v53 = vmul.f32 %v6855_v29, %v6843_v33  ;;  %v8721_v29 = vld [vmem:[#allocation30_spill] sm:$0xff] }
0x130f   :  { %v3302_v40 = vsel %vm1812_vm3, %v3300_v62, 0.0  ;;  %v3508_v39 = vadd.f32 1e-08, %v3506_v17  ;;  %v3812_v17 = vrot.slane %v8266_v42, 4 }
0x1310   :  { %v3303_v43 = vsel %vm1812_vm3, %v3301_v34, 0.0  ;;  %v3509_v45 = vadd.f32 1e-08, %v3507_v53 }
0x1311   :  { %v3304_v20 = vadd.f32 %v3303_v43, %v3302_v40  ;;  %v3510_v9 = vsel %vm1812_vm3, %v3508_v39, 0.0 }
0x1312   :  { %v3511_v49 = vsel %vm1812_vm3, %v3509_v45, 0.0 }
0x1313   :  { %3305 = vadd.xlane.f32.xlu1 %v3304_v20  ;;  %v3512_v38 = vadd.f32 %v3511_v49, %v3510_v9 }
0x1314   :  { %v6857_v2 = vpop.eup %6856 }
0x1315   :  { %v6859_v52 = vpop.eup %6858  ;;  %3513 = vadd.xlane.f32.xlu0 %v3512_v38  ;;  %v3714_v25 = vmul.f32 %v6857_v2, %v6845_v54 }
0x1316   :  { %v3715_v41 = vmul.f32 %v6859_v52, %v6847_v15 }
0x1317   :  { %v3716_v23 = vadd.f32 1e-08, %v3714_v25 }
0x1318   :  { %v3717_v33 = vadd.f32 1e-08, %v3715_v41 }
0x1319   :  { %v3718_v7 = vsel %vm1812_vm3, %v3716_v23, 0.0 }
0x131a   :  { %v3719_v60 = vsel %vm1812_vm3, %v3717_v33, 0.0 }
0x131b   :  { %v3720_v55 = vadd.f32 %v3719_v60, %v3718_v7 }
0x131d   :  { %3721 = vadd.xlane.f32.xlu1 %v3720_v55 }
0x13a0   :  { %v3306_v21 = vpop.xlane.xlu1 %3305 }
0x13a1   :  { %6860 = vrcp.f32 %v3306_v21 }
0x13a2   :  { %v3514_v61 = vpop.xlane.xlu0 %3513 }
0x13a3   :  { %6862 = vrcp.f32 %v3514_v61 }
0x13aa   :  { %v3722_v48 = vpop.xlane.xlu1 %3721 }
0x13ab   :  { %v6861_v57 = vpop.eup %6860  ;;  %6864 = vrcp.f32 %v3722_v48 }
0x13ac   :  { %v3309_v63 = vmul.f32 %v6861_v57, %v3301_v34  ;;  %v3308_v31 = vmul.f32 %v6861_v57, %v3300_v62  ;;  %v8722_v34 = vld [vmem:[#allocation34_spill] sm:$0xff] }
0x13ad   :  { %v6863_v58 = vpop.eup %6862 }
0x13ae   :  { %3374 = vmatprep.mubr.f32.mxu1 %v3309_v63  ;;  %v3517_v54 = vmul.f32 %v6863_v58, %v3509_v45  ;;  %v3516_v62 = vmul.f32 %v6863_v58, %v3508_v39 }
0x13af   :  { %3375 = vmatmul.mubr.f32.vlgmr.msra.gmra.mrb[88].mxu1 %v3308_v31 }
0x13b0   :  { %6503 = vmatpush1.bf16.xpose.msra.mxu1 %v7885_v28  ;;  %3582 = vmatprep.mubr.f32.mxu1 %v3517_v54 }
0x13b1   :  { %6505 = vmatprep.subr.bf16.mxu1 %v7898_v1 }
0x13b5   :  { %v6865_v15 = vpop.eup %6864 }
0x13b6   :  { %v3725_v32 = vmul.f32 %v6865_v15, %v3717_v33  ;;  %v3724_v18 = vmul.f32 %v6865_v15, %v3716_v23 }
0x13b8   :  { %6507 = vmatpush1.bf16.xpose.msra.mxu1 %v7894_v13  ;;  %3790 = vmatprep.mubr.f32.mxu0 %v3725_v32 }
0x13b9   :  { %3791 = vmatmul.mubr.f32.vlgmr.msra.gmra.mrb[74].mxu0 %v3724_v18  ;;  %6525 = vmatprep.subr.bf16.mxu1 %v8721_v29 }
0x13ba   :  { %6543 = vmatpush3.bf16.msra.mxu0 %v7997_v27 }
0x13bb   :  { %6545 = vmatprep.subr.bf16.mxu0 %v8002_v44 }
0x13be   :  { %6547 = vmatpush3.bf16.msra.mxu0 %v8002_v44 }
0x13bf   :  { %3583 = vmatmul.mubr.f32.vlgmr.msra.gmra.mrb[90].mxu1 %v3516_v62  ;;  %6549 = vmatprep.subr.bf16.mxu0 %v8014_v3 }
0x13c0   :  { %6527 = vmatpush1.bf16.msra.mxu1 %v7902_v26  ;;  %3879 = vmatprep.mubr.f32.mxu1 %v8710_v22 }
0x13c1   :  { %6529 = vmatprep.subr.bf16.mxu1 %v7914_v24 }
0x13c4   :  { %6531 = vmatpush1.bf16.msra.mxu1 %v7910_v47 }
0x13c5   :  { %6533 = vmatprep.subr.bf16.mxu1 %v7925_v12 }
0x13c7   :  { %5954 = vmatmul.mubr.msk.f32.vlgmr.msra.gmra.mrb[92].mxu1 %vm239_vm0, %v3812_v17 }
0x13cd   :  { %6535 = vmatpush1.bf16.xpose.msra.mxu1 %v7921_v4 }
0x13ce   :  { %6537 = vmatprep.subr.bf16.mxu1 %v7933_v30 }
0x13d5   :  { %6539 = vmatpush1.bf16.xpose.msra.mxu1 %v8722_v34 }
0x13d6   :  { %6557 = vmatprep.subr.bf16.mxu1 %v8168_v35 }
0x1482   :  { %v3376_v53 = vpop.f32.mrb[88].mxu1 }
0x1483   :  { %v3378_v40 = vpop.f32.mrb[89].mxu1 }
0x148c   :  { %v8322_v39 = vpop.f32.mrb[74].mxu0 }
0x148d   :  { %v3794_v43 = vpop.f32.mrb[75].mxu0 }
0x1492   :  { %v3584_v45 = vpop.f32.mrb[90].mxu1 }
0x1493   :  { %v4005_v20 = vrot.slane %v3584_v45, 4  ;;  %v3586_v42 = vpop.f32.mrb[91].mxu1 }
0x1495   :  { %v4010_v9 = vsel %vm1812_vm3, %v3376_v53, %v4005_v20 }
0x1496   :  { %6201 = vmatprep.mubr.msk.f32.mxu0 %vm239_vm0, %v4010_v9 }
0x149a   :  { %v3881_v49 = vpop.f32.mrb[92].mxu1 }
0x149b   :  { %v3886_v38 = vsel %vm1812_vm3, %v3881_v49, -inf  ;;  %v3883_v2 = vpop.f32.mrb[93].mxu1 }
0x149c   :  { %v3887_v52 = vrot.slane %v3886_v38, 4  ;;  %v3893_v25 = vsel %vm1812_vm3, %v3883_v2, -inf }
0x149d   :  { %v3894_v41 = vrot.slane %v3893_v25, 4 }
0x149e   :  { %v3888_v23 = vmax.f32 %v3886_v38, %v3887_v52 }
0x149f   :  { %v3895_v33 = vmax.f32 %v3893_v25, %v3894_v41 }
0x14a0   :  { %v3889_v7 = vrot.slane %v3888_v23, 2 }
0x14a1   :  { %v3896_v60 = vrot.slane %v3895_v33, 2 }
0x14a2   :  { %v3890_v55 = vmax.f32 %v3888_v23, %v3889_v7 }
0x14a3   :  { %v3897_v21 = vmax.f32 %v3895_v33, %v3896_v60 }
0x14a4   :  { %v3891_v61 = vrot.slane %v3890_v55, 1 }
0x14a5   :  { %v3898_v48 = vrot.slane %v3897_v21, 1 }
0x14a6   :  { %v3892_v57 = vmax.f32 %v3890_v55, %v3891_v61 }
0x14a7   :  { %v3899_v63 = vmax.f32 %v3897_v21, %v3898_v48 }
0x14a8   :  { %v3900_v31 = vsub.f32 %v3881_v49, %v3892_v57 }
0x14a9   :  { %v3901_v58 = vsub.f32 %v3883_v2, %v3899_v63 }
0x14aa   :  { %v3902_v54 = vmul.f32 1.442695, %v3900_v31 }
0x14ab   :  { %v3904_v15 = vmul.f32 1.442695, %v3901_v58 }
0x14ac   :  { %6866 = vpow2.f32 %v3902_v54 }
0x14ad   :  { %6868 = vpow2.f32 %v3904_v15 }
0x14b6   :  { %v6867_v32 = vpop.eup %6866 }
0x14b7   :  { %v6869_v18 = vpop.eup %6868  ;;  %v3906_v62 = vsel %vm1812_vm3, %v6867_v32, 0.0 }
0x14b8   :  { %v3907_v17 = vrot.slane %v3906_v62, 4  ;;  %v3913_v53 = vsel %vm1812_vm3, %v6869_v18, 0.0 }
0x14b9   :  { %v3914_v40 = vrot.slane %v3913_v53, 4 }
0x14ba   :  { %v3908_v43 = vadd.f32 %v3907_v17, %v3906_v62 }
0x14bb   :  { %v3915_v45 = vadd.f32 %v3914_v40, %v3913_v53  ;;  %v8366_v40 = vld [vmem:[%s8625_s8 + $0x5] ss:$0 sm:$0xff] }
0x14bc   :  { %v3909_v20 = vrot.slane %v3908_v43, 2 }
0x14bd   :  { %v3916_v42 = vrot.slane %v3915_v45, 2 }
0x14be   :  { %v3910_v9 = vadd.f32 %v3909_v20, %v3908_v43 }
0x14bf   :  { %v3917_v38 = vadd.f32 %v3916_v42, %v3915_v45 }
0x14c0   :  { %v3911_v49 = vrot.slane %v3910_v9, 1 }
0x14c1   :  { %v3918_v2 = vrot.slane %v3917_v38, 1 }
0x14c2   :  { %v3912_v52 = vadd.f32 %v3911_v49, %v3910_v9 }
0x14c3   :  { %v3919_v25 = vadd.f32 %v3918_v2, %v3917_v38 }
0x14c4   :  { %6870 = vrcp.f32 %v3912_v52 }
0x14c5   :  { %6872 = vrcp.f32 %v3919_v25 }
0x14ce   :  { %v6871_v41 = vpop.eup %6870 }
0x14cf   :  { %v6873_v23 = vpop.eup %6872  ;;  %v3922_v33 = vmul.f32 %v6871_v41, %v6867_v32 }
0x14d0   :  { %v3923_v7 = vmul.f32 %v6873_v23, %v6869_v18 }
0x14d1   :  { %v3924_v60 = vadd.f32 1e-08, %v3922_v33 }
0x14d2   :  { %v3925_v55 = vadd.f32 1e-08, %v3923_v7 }
0x14d3   :  { %v3926_v21 = vsel %vm1812_vm3, %v3924_v60, 0.0 }
0x14d4   :  { %v3927_v61 = vsel %vm1812_vm3, %v3925_v55, 0.0 }
0x14d5   :  { %v3928_v48 = vadd.f32 %v3927_v61, %v3926_v21 }
0x14d7   :  { %3929 = vadd.xlane.f32.xlu0 %v3928_v48 }
0x1564   :  { %v3930_v57 = vpop.xlane.xlu0 %3929 }
0x1565   :  { %6874 = vrcp.f32 %v3930_v57 }
0x156f   :  { %v6875_v63 = vpop.eup %6874 }
0x1570   :  { %v3933_v31 = vmul.f32 %v6875_v63, %v3925_v55  ;;  %v3932_v58 = vmul.f32 %v6875_v63, %v3924_v60 }
0x1572   :  { %3998 = vmatprep.mubr.f32.mxu1 %v3933_v31 }
0x1573   :  { %3999 = vmatmul.mubr.f32.vlgmr.msra.gmra.mrb[94].mxu1 %v3932_v58 }
0x1574   :  { %6559 = vmatpush3.bf16.msra.mxu1 %v8168_v35 }
0x1575   :  { %6561 = vmatprep.subr.bf16.mxu1 %v8173_v10 }
0x1578   :  { %6563 = vmatpush3.bf16.msra.mxu1 %v8173_v10 }
0x1579   :  { %6597 = vmatprep.subr.bf16.mxu1 %v7759_v11 }
0x1646   :  { %v4000_v54 = vpop.f32.mrb[94].mxu1 }
0x1647   :  { %v4008_v15 = vrot.slane %v4000_v54, 4  ;;  %v4002_v32 = vpop.f32.mrb[95].mxu1 }
0x1649   :  { %v4011_v18 = vsel %vm1812_vm3, %v8322_v39, %v4008_v15  ;;  %v8725_v39 = vld [vmem:[#allocation18_spill] sm:$0xff] }
0x164a   :  { %6202 = vmatmul.mubr.msk.f32.vlgmr.msra.gmra.mrb[76].mxu0 %vm239_vm0, %v4011_v18 }
0x164b   :  { %6551 = vmatpush3.bf16.msra.mxu0 %v8014_v3  ;;  %6212 = vmatprep.mubr.msk.f32.mxu0 %vm239_vm0, %v8229_v5  ;;  %v8724_v5 = vld [vmem:[#allocation9_spill] sm:$0xff] }
0x164c   :  { %6553 = vmatprep.subr.bf16.mxu0 %v8023_v14 }
0x164f   :  { %6555 = vmatpush3.bf16.msra.mxu0 %v8023_v14 }
0x1650   :  { %6565 = vmatprep.subr.bf16.mxu0 %v8037_v56 }
0x1652   :  { %6213 = vmatmul.mubr.msk.f32.vlgmr.msra.gmra.mrb[78].mxu0 %vm239_vm0, %v8227_v37  ;;  %v8723_v37 = vld [vmem:[#allocation10_spill] sm:$0xff] }
0x1653   :  { %6567 = vmatpush3.bf16.msra.mxu0 %v8037_v56 }
0x1654   :  { %6569 = vmatprep.subr.bf16.mxu0 %v8047_v0 }
0x1657   :  { %6571 = vmatpush3.bf16.msra.mxu0 %v8047_v0 }
0x1658   :  { %6573 = vmatprep.subr.bf16.mxu0 %v8059_v36 }
0x165b   :  { %6575 = vmatpush3.bf16.msra.mxu0 %v8059_v36 }
0x165c   :  { %6577 = vmatprep.subr.bf16.mxu0 %v8069_v16 }
0x165f   :  { %6579 = vmatpush3.bf16.msra.mxu0 %v8069_v16 }
0x1660   :  { %6581 = vmatprep.subr.bf16.mxu0 %v8079_v51 }
0x1663   :  { %6583 = vmatpush3.bf16.msra.mxu0 %v8079_v51 }
0x1664   :  { %6585 = vmatprep.subr.bf16.mxu0 %v8089_v46 }
0x1667   :  { %6587 = vmatpush3.bf16.msra.mxu0 %v8089_v46 }
0x1668   :  { %6589 = vmatprep.subr.bf16.mxu0 %v8723_v37 }
0x166b   :  { %6591 = vmatpush3.bf16.msra.mxu0 %v8723_v37 }
0x166c   :  { %6593 = vmatprep.subr.bf16.mxu0 %v8724_v5 }
0x166f   :  { %6595 = vmatpush3.bf16.msra.mxu0 %v8724_v5 }
0x1670   :  { %6621 = vmatprep.subr.bf16.mxu0 %v8725_v39 }
0x171d   :  { %v6203_v62 = vpop.f32.mrb[76].mxu0 }
0x171e   :  { %v4084_v17 = vpop.f32.mrb[77].mxu0  ;;  %v4090_v42 = vadd.f32 %v6203_v62, %v8123_v19 }
0x171f   :  { %v4085_v9 = vadd.f32 %v8123_v19, %v4084_v17 }
0x1725   :  { %v6214_v53 = vpop.f32.mrb[78].mxu0 }
0x1726   :  { %v4169_v43 = vadd.f32 %v8366_v40, %v6214_v53  ;;  %v4163_v45 = vpop.f32.mrb[79].mxu0 }
0x1727   :  { %v4164_v20 = vadd.f32 %v8366_v40, %v4163_v45 }
0x1728   :  { %4190 = vrot.lane.b32.xlu1 %v4169_v43, %s7014_s7  ;;  %v4173_v38 = vadd.f32 %v4169_v43, %v4090_v42 }
0x1729   :  { %4188 = vrot.lane.b32.xlu0 %v4164_v20, %s7014_s7  ;;  %v4172_v49 = vadd.f32 %v4164_v20, %v4085_v9 }
0x172a   :  { %v5960_v2 = vmul.f32 -1.442695, %v4173_v38 }
0x172b   :  { %v5959_v52 = vmul.f32 -1.442695, %v4172_v49 }
0x172c   :  { %6876 = vpow2.f32 %v5960_v2 }
0x172d   :  { %6878 = vpow2.f32 %v5959_v52 }
0x1736   :  { %v6877_v25 = vpop.eup %6876 }
0x1737   :  { %v6879_v41 = vpop.eup %6878  ;;  %v4181_v23 = vadd.f32 1.0, %v6877_v25 }
0x1738   :  { %v4180_v33 = vadd.f32 1.0, %v6879_v41 }
0x1739   :  { %6880 = vrcp.f32 %v4181_v23 }
0x173a   :  { %6882 = vrcp.f32 %v4180_v33 }
0x1743   :  { %v6881_v7 = vpop.eup %6880 }
0x1744   :  { %v6883_v55 = vpop.eup %6882  ;;  %v4209_v15 = vsub.f32 1.0, %v6881_v7  ;;  %v4221_v39 = vmul.f32 %v6881_v7, %v8218_v6 }
0x1745   :  { %v4208_v18 = vsub.f32 1.0, %v6883_v55  ;;  %v4220_v53 = vmul.f32 %v6883_v55, %v8221_v8 }
0x179a   :  { %v4191_v60 = vpop.permute.xlu1 %4190 }
0x179b   :  { %v4195_v21 = vmul.f32 %v6881_v7, %v4191_v60  ;;  %v4189_v61 = vpop.permute.xlu0 %4188 }
0x179c   :  { %v4194_v48 = vmul.f32 %v6883_v55, %v4189_v61 }
0x179d   :  { %4200 = vrot.lane.b32.xlu0 %v4195_v21, %s7014_s7 }
0x179e   :  { %4198 = vrot.lane.b32.xlu1 %v4194_v48, %s7014_s7 }
0x180f   :  { %v4201_v19 = vpop.permute.xlu0 %4200 }
0x1810   :  { %v4205_v57 = vadd.f32 %v4201_v19, %v4090_v42  ;;  %v4199_v63 = vpop.permute.xlu1 %4198 }
0x1811   :  { %v4204_v31 = vadd.f32 %v4199_v63, %v4085_v9 }
0x1812   :  { %6884 = vtanh.f32 %v4205_v57 }
0x1813   :  { %6886 = vtanh.f32 %v4204_v31 }
0x181c   :  { %v6885_v58 = vpop.eup %6884 }
0x181d   :  { %v6887_v54 = vpop.eup %6886  ;;  %4214 = vrot.lane.b32.xlu0 %v6885_v58, %s7016_s18 }
0x181e   :  { %4212 = vrot.lane.b32.xlu1 %v6887_v54, %s7016_s18 }
0x188f   :  { %v4215_v32 = vpop.permute.xlu0 %4214 }
0x1890   :  { %v4219_v62 = vmul.f32 %v4215_v32, %v4209_v15  ;;  %v4213_v17 = vpop.permute.xlu1 %4212 }
0x1891   :  { %v4218_v43 = vmul.f32 %v4213_v17, %v4208_v18 }
0x1892   :  { %v8380_v45 = vadd.f32 %v4221_v39, %v4219_v62 }
0x1893   :  { %v8382_v20 = vadd.f32 %v4220_v53, %v4218_v43 }
0x1894   :  { %4228 = vrot.lane.b32.xlu0 %v8380_v45, %s7016_s18 }
0x1895   :  { %4226 = vrot.lane.b32.xlu1 %v8382_v20, %s7016_s18 }
0x1906   :  { %v4229_v42 = vpop.permute.xlu0 %4228 }
0x1907   :  { %v4227_v9 = vpop.permute.xlu1 %4226  ;;  %v4235_v38 = vsel %vm239_vm0, %v4229_v42, 0.0  ;;  %v8726_v42 = vld [vmem:[#allocation12_spill] sm:$0xff] }
0x1908   :  { %4236 = vadd.xlane.f32.xlu0 %v4235_v38  ;;  %v4232_v6 = vsel %vm239_vm0, %v4227_v9, 0.0  ;;  %v8727_v9 = vld [vmem:[#allocation13_spill] sm:$0xff] }
0x1909   :  { %4233 = vadd.xlane.f32.xlu1 %v4232_v6  ;;  %v8728_v6 = vld [vmem:[#allocation37_spill] sm:$0xff] }
0x1995   :  { %v4237_v8 = vpop.xlane.xlu0 %4236 }
0x1996   :  { %v4239_v49 = vmul.f32 0.03125, %v4237_v8  ;;  %v4234_v2 = vpop.xlane.xlu1 %4233 }
0x1997   :  { %v4238_v52 = vmul.f32 0.03125, %v4234_v2 }
0x1998   :  { %v4241_v25 = vsub.f32 %v8380_v45, %v4239_v49 }
0x1999   :  { %v4240_v41 = vsub.f32 %v8382_v20, %v4238_v52 }
0x199a   :  { %v4243_v23 = vmul.f32 %v4241_v25, %v4241_v25 }
0x199b   :  { %v4242_v33 = vmul.f32 %v4240_v41, %v4240_v41 }
0x199c   :  { %4248 = vrot.lane.b32.xlu1 %v4243_v23, %s7016_s18  ;;  %v8731_v23 = vld [vmem:[#allocation20_spill] sm:$0xff] }
0x199d   :  { %4246 = vrot.lane.b32.xlu0 %v4242_v33, %s7016_s18  ;;  %v8732_v33 = vld [vmem:[#allocation26_spill] sm:$0xff] }
0x1a0e   :  { %v4249_v7 = vpop.permute.xlu1 %4248 }
0x1a0f   :  { %v4247_v60 = vpop.permute.xlu0 %4246  ;;  %v4255_v55 = vsel %vm239_vm0, %v4249_v7, 0.0 }
0x1a10   :  { %4256 = vadd.xlane.f32.xlu0 %v4255_v55  ;;  %v4252_v21 = vsel %vm239_vm0, %v4247_v60, 0.0  ;;  %v8733_v60 = vld [vmem:[#allocation38_spill] sm:$0xff] }
0x1a11   :  { %4253 = vadd.xlane.f32.xlu1 %v4252_v21 }
0x1a9d   :  { %v4257_v61 = vpop.xlane.xlu0 %4256 }
0x1a9e   :  { %v4259_v48 = vmul.f32 0.03125, %v4257_v61  ;;  %v4254_v19 = vpop.xlane.xlu1 %4253 }
0x1a9f   :  { %v4258_v57 = vmul.f32 0.03125, %v4254_v19 }
0x1aa0   :  { %v4261_v63 = vadd.f32 1e-05, %v4259_v48 }
0x1aa1   :  { %v4260_v31 = vadd.f32 1e-05, %v4258_v57 }
0x1aa2   :  { %6888 = vrsqrt.f32 %v4261_v63 }
0x1aa3   :  { %6890 = vrsqrt.f32 %v4260_v31 }
0x1aac   :  { %v6889_v58 = vpop.eup %6888 }
0x1aad   :  { %v6891_v54 = vpop.eup %6890  ;;  %v4265_v15 = vmul.f32 %v6889_v58, %v4241_v25 }
0x1aae   :  { %v4264_v32 = vmul.f32 %v6891_v54, %v4240_v41  ;;  %v8729_v41 = vld [vmem:[#allocation16_spill] sm:$0xff] }
0x1aaf   :  { %v4267_v18 = vmul.f32 %v4265_v15, %v8180_v59 }
0x1ab0   :  { %v4266_v39 = vmul.f32 %v4264_v32, %v8180_v59 }
0x1ab1   :  { %v4269_v62 = vadd.f32 %v4267_v18, %v8182_v50 }
0x1ab2   :  { %v4268_v17 = vadd.f32 %v4266_v39, %v8182_v50 }
0x1ab3   :  { %4274 = vrot.lane.b32.xlu1 %v4269_v62, %s7016_s18 }
0x1ab4   :  { %4272 = vrot.lane.b32.xlu0 %v4268_v17, %s7016_s18 }
0x1b25   :  { %v4275_v43 = vpop.permute.xlu1 %4274 }
0x1b26   :  { %v4273_v53 = vpop.permute.xlu0 %4272 }
0x1b27   :  { %6223 = vmatprep.mubr.msk.f32.mxu1 %vm239_vm0, %v4273_v53 }
0x1b28   :  { %6224 = vmatmul.mubr.msk.f32.vlgmr.msra.gmra.mrb[96].mxu1 %vm239_vm0, %v4275_v43 }
0x1b29   :  { %6599 = vmatpush3.bf16.msra.mxu1 %v7759_v11  ;;  %v8730_v11 = vld [vmem:[#allocation22_spill] sm:$0xff] }
0x1b2a   :  { %6601 = vmatprep.subr.bf16.mxu1 %v8726_v42 }
0x1b2d   :  { %6603 = vmatpush3.bf16.msra.mxu1 %v8726_v42 }
0x1b2e   :  { %6605 = vmatprep.subr.bf16.mxu1 %v8727_v9 }
0x1bfb   :  { %v6225_v38 = vpop.f32.mrb[96].mxu1 }
0x1bfc   :  { %v4352_v8 = vadd.f32 %v6225_v38, %v8728_v6  ;;  %v4346_v49 = vpop.f32.mrb[97].mxu1 }
0x1bfd   :  { %v4347_v2 = vadd.f32 %v8728_v6, %v4346_v49 }
0x1bfe   :  { %v4356_v25 = vmax.f32 %v4352_v8, 0.0 }
0x1bff   :  { %v4355_v52 = vmax.f32 %v4347_v2, 0.0 }
0x1c01   :  { %6258 = vmatprep.mubr.f32.mxu0 %v4355_v52 }
0x1c02   :  { %6259 = vmatmul.mubr.f32.vlgmr.msra.gmra.mrb[80].mxu0 %v4356_v25 }
0x1c03   :  { %6623 = vmatpush1.bf16.msra.mxu0 %v8729_v41  ;;  %4864 = vmatprep.mubr.f32.mxu0 %v8710_v22 }
0x1c04   :  { %6625 = vmatprep.subr.bf16.mxu0 %v8730_v11 }
0x1c07   :  { %6627 = vmatpush1.bf16.msra.mxu0 %v8731_v23 }
0x1c08   :  { %6637 = vmatprep.subr.bf16.mxu0 %v8732_v33 }
0x1cd5   :  { %v6260_v7 = vpop.f32.mrb[80].mxu0 }
0x1cd6   :  { %v4429_v55 = vadd.f32 %v6260_v7, %v8733_v60  ;;  %v4423_v21 = vpop.f32.mrb[81].mxu0  ;;  %v8735_v7 = vld [vmem:[#allocation39_spill] sm:$0xff] }
0x1cd7   :  { %v4424_v61 = vadd.f32 %v8733_v60, %v4423_v21  ;;  %v8736_v21 = vld [vmem:[#allocation40_spill] sm:$0xff] }
0x1cd8   :  { %4436 = vrot.lane.b32.xlu0 %v4429_v55, %s7015_s17 }
0x1cd9   :  { %4434 = vrot.lane.b32.xlu1 %v4424_v61, %s7015_s17 }
0x1d4a   :  { %v4437_v48 = vpop.permute.xlu0 %4436 }
0x1d4b   :  { %v8420_v19 = vadd.f32 %v4437_v48, %v8380_v45  ;;  %v4435_v57 = vpop.permute.xlu1 %4434 }
0x1d4c   :  { %v8423_v63 = vadd.f32 %v4435_v57, %v8382_v20 }
0x1d4d   :  { %4446 = vrot.lane.b32.xlu0 %v8420_v19, %s7016_s18 }
0x1d4e   :  { %8734 = vst [vmem:[#allocation30_spill] sm:$0xff] %v8423_v63  ;;  %4444 = vrot.lane.b32.xlu1 %v8423_v63, %s7016_s18 }
0x1dbf   :  { %v8429_v31 = vpop.permute.xlu0 %4446 }
0x1dc0   :  { %v8431_v58 = vpop.permute.xlu1 %4444  ;;  %v4453_v54 = vsel %vm239_vm0, %v8429_v31, 0.0 }
0x1dc1   :  { %4454 = vadd.xlane.f32.xlu0 %v4453_v54  ;;  %v4450_v45 = vsel %vm239_vm0, %v8431_v58, 0.0 }
0x1dc2   :  { %4451 = vadd.xlane.f32.xlu1 %v4450_v45  ;;  %v8737_v45 = vld [vmem:[#allocation11_spill] sm:$0xff] }
0x1e4e   :  { %v4455_v20 = vpop.xlane.xlu0 %4454 }
0x1e4f   :  { %v4457_v15 = vmul.f32 0.03125, %v4455_v20  ;;  %v4452_v32 = vpop.xlane.xlu1 %4451  ;;  %v8738_v20 = vld [vmem:[#allocation15_spill] sm:$0xff] }
0x1e50   :  { %v4456_v18 = vmul.f32 0.03125, %v4452_v32  ;;  %v8740_v32 = vld [vmem:[#allocation19_spill] sm:$0xff] }
0x1e51   :  { %v4459_v39 = vsub.f32 %v8420_v19, %v4457_v15  ;;  %v8739_v15 = vld [vmem:[#allocation14_spill] sm:$0xff] }
0x1e52   :  { %v4458_v62 = vsub.f32 %v8423_v63, %v4456_v18 }
0x1e53   :  { %v4461_v17 = vmul.f32 %v4459_v39, %v4459_v39 }
0x1e54   :  { %v4460_v53 = vmul.f32 %v4458_v62, %v4458_v62 }
0x1e55   :  { %4466 = vrot.lane.b32.xlu1 %v4461_v17, %s7016_s18  ;;  %v8741_v17 = vld [vmem:[#allocation17_spill] sm:$0xff] }
0x1e56   :  { %4464 = vrot.lane.b32.xlu0 %v4460_v53, %s7016_s18  ;;  %v8742_v53 = vld [vmem:[#allocation23_spill] sm:$0xff] }
0x1ec7   :  { %v4467_v43 = vpop.permute.xlu1 %4466 }
0x1ec8   :  { %v4465_v42 = vpop.permute.xlu0 %4464  ;;  %v4473_v9 = vsel %vm239_vm0, %v4467_v43, 0.0  ;;  %v8743_v43 = vld [vmem:[#allocation24_spill] sm:$0xff] }
0x1ec9   :  { %4474 = vadd.xlane.f32.xlu0 %v4473_v9  ;;  %v4470_v38 = vsel %vm239_vm0, %v4465_v42, 0.0  ;;  %v8744_v42 = vld [vmem:[#allocation28_spill] sm:$0xff]  ;;  %v8745_v9 = vld [vmem:[#allocation27_spill] sm:$0xff] }
0x1eca   :  { %4471 = vadd.xlane.f32.xlu1 %v4470_v38  ;;  %v8746_v38 = vld [vmem:[#allocation31_spill] sm:$0xff] }
0x1f56   :  { %v4475_v6 = vpop.xlane.xlu0 %4474 }
0x1f57   :  { %v4477_v8 = vmul.f32 0.03125, %v4475_v6  ;;  %v4472_v49 = vpop.xlane.xlu1 %4471  ;;  %v8747_v6 = vld [vmem:[#allocation21_spill] sm:$0xff] }
0x1f58   :  { %v4476_v2 = vmul.f32 0.03125, %v4472_v49  ;;  %v8749_v49 = vld [vmem:[#allocation29_spill] sm:$0xff] }
0x1f59   :  { %v4479_v52 = vadd.f32 1e-05, %v4477_v8  ;;  %v8748_v8 = vld [vmem:[#allocation25_spill] sm:$0xff] }
0x1f5a   :  { %v4478_v25 = vadd.f32 1e-05, %v4476_v2  ;;  %v8750_v2 = vld [vmem:[#allocation33_spill] sm:$0xff] }
0x1f5b   :  { %6892 = vrsqrt.f32 %v4479_v52  ;;  %v8751_v52 = vld [vmem:[#allocation32_spill] sm:$0xff] }
0x1f5c   :  { %6894 = vrsqrt.f32 %v4478_v25 }
0x1f65   :  { %v6893_v41 = vpop.eup %6892 }
0x1f66   :  { %v6895_v11 = vpop.eup %6894  ;;  %v4483_v23 = vmul.f32 %v6893_v41, %v4459_v39 }
0x1f67   :  { %v4482_v33 = vmul.f32 %v6895_v11, %v4458_v62 }
0x1f68   :  { %v4485_v60 = vmul.f32 %v4483_v23, %v8735_v7 }
0x1f69   :  { %v4484_v55 = vmul.f32 %v4482_v33, %v8735_v7 }
0x1f6a   :  { %v4487_v61 = vadd.f32 %v4485_v60, %v8736_v21 }
0x1f6b   :  { %v4486_v48 = vadd.f32 %v4484_v55, %v8736_v21 }
0x1f6c   :  { %4492 = vrot.lane.b32.xlu1 %v4487_v61, %s7016_s18 }
0x1f6d   :  { %4490 = vrot.lane.b32.xlu0 %v4486_v48, %s7016_s18 }
0x1fde   :  { %v4493_v54 = vpop.permute.xlu1 %4492 }
0x1fdf   :  { %v4491_v57 = vpop.permute.xlu0 %4490 }
0x1fe0   :  { %6269 = vmatprep.mubr.msk.f32.mxu1 %vm239_vm0, %v4491_v57 }
0x1fe1   :  { %6270 = vmatmul.mubr.msk.f32.vlgmr.msra.gmra.mrb[98].mxu1 %vm239_vm0, %v4493_v54 }
0x1fe2   :  { %6607 = vmatpush1.bf16.msra.mxu1 %v8737_v45  ;;  %4656 = vmatprep.mubr.f32.mxu1 %v8710_v22 }
0x1fe3   :  { %6609 = vmatprep.subr.bf16.mxu1 %v8738_v20 }
0x1fe6   :  { %6611 = vmatpush1.bf16.msra.mxu1 %v8739_v15 }
0x1fe7   :  { %6613 = vmatprep.subr.bf16.mxu1 %v8740_v32 }
0x20b4   :  { %v8456_v18 = vpop.f32.mrb[98].mxu1 }
0x20b5   :  { %v4564_v39 = vpop.f32.mrb[99].mxu1 }
0x20b6   :  { %v4797_v62 = vrot.slane %v4564_v39, 4  ;;  %5965 = vmatmul.mubr.msk.f32.vlgmr.msra.gmra.mrb[100].mxu1 %vm239_vm0, %v4564_v39 }
0x20b7   :  { %6615 = vmatpush1.bf16.xpose.msra.mxu1 %v8741_v17 }
0x20b8   :  { %6617 = vmatprep.subr.bf16.mxu1 %v8742_v53  ;;  %5966 = vmatmul.mubr.msk.f32.vlgmr.msra.gmra.mrb[82].mxu0 %vm239_vm0, %v4797_v62 }
0x20b9   :  { %6639 = vmatpush1.bf16.msra.mxu0 %v8743_v43  ;;  %5072 = vmatprep.mubr.f32.mxu0 %v8710_v22 }
0x20ba   :  { %6641 = vmatprep.subr.bf16.mxu0 %v8744_v42 }
0x20bd   :  { %6643 = vmatpush1.bf16.msra.mxu0 %v8745_v9 }
0x20be   :  { %6645 = vmatprep.subr.bf16.mxu0 %v8746_v38 }
0x20bf   :  { %6619 = vmatpush1.bf16.xpose.msra.mxu1 %v8747_v6 }
0x20c0   :  { %6629 = vmatprep.subr.bf16.mxu1 %v8748_v8  ;;  %5967 = vmatmul.mubr.msk.f32.vlgmr.msra.gmra.mrb[84].mxu0 %vm239_vm0, %v8456_v18 }
0x20c6   :  { %6647 = vmatpush1.bf16.xpose.msra.mxu0 %v8749_v49 }
0x20c7   :  { %6649 = vmatprep.subr.bf16.mxu0 %v8750_v2 }
0x20ce   :  { %6651 = vmatpush1.bf16.xpose.msra.mxu0 %v8751_v52 }
0x20cf   :  { %6669 = vmatprep.subr.bf16.mxu0 %v7997_v27 }
0x2189   :  { %v4658_v25 = vpop.f32.mrb[100].mxu1 }
0x218a   :  { %v4663_v41 = vsel %vm1812_vm3, %v4658_v25, -inf  ;;  %v4660_v11 = vpop.f32.mrb[101].mxu1 }
0x218b   :  { %v4664_v23 = vrot.slane %v4663_v41, 4  ;;  %v4670_v33 = vsel %vm1812_vm3, %v4660_v11, -inf  ;;  %v4866_v7 = vpop.f32.mrb[82].mxu0 }
0x218c   :  { %v4671_v60 = vrot.slane %v4670_v33, 4  ;;  %v4871_v55 = vsel %vm1812_vm3, %v4866_v7, -inf  ;;  %v4868_v21 = vpop.f32.mrb[83].mxu0 }
0x218d   :  { %v4665_v61 = vmax.f32 %v4663_v41, %v4664_v23  ;;  %v4872_v48 = vrot.slane %v4871_v55, 4  ;;  %v4878_v57 = vsel %vm1812_vm3, %v4868_v21, -inf }
0x218e   :  { %v4672_v54 = vmax.f32 %v4670_v33, %v4671_v60  ;;  %v4879_v45 = vrot.slane %v4878_v57, 4 }
0x218f   :  { %v4666_v20 = vrot.slane %v4665_v61, 2  ;;  %v4873_v15 = vmax.f32 %v4871_v55, %v4872_v48 }
0x2190   :  { %v4673_v32 = vrot.slane %v4672_v54, 2  ;;  %v4880_v39 = vmax.f32 %v4878_v57, %v4879_v45 }
0x2191   :  { %v4667_v62 = vmax.f32 %v4665_v61, %v4666_v20  ;;  %v4874_v17 = vrot.slane %v4873_v15, 2 }
0x2192   :  { %v4674_v53 = vmax.f32 %v4672_v54, %v4673_v32  ;;  %v4881_v43 = vrot.slane %v4880_v39, 2 }
0x2193   :  { %v4668_v42 = vrot.slane %v4667_v62, 1  ;;  %v4875_v9 = vmax.f32 %v4873_v15, %v4874_v17  ;;  %v5074_v38 = vpop.f32.mrb[84].mxu0 }
0x2194   :  { %v4675_v6 = vrot.slane %v4674_v53, 1  ;;  %v4882_v8 = vmax.f32 %v4880_v39, %v4881_v43  ;;  %v5079_v49 = vsel %vm1812_vm3, %v5074_v38, -inf  ;;  %v5076_v2 = vpop.f32.mrb[85].mxu0 }
0x2195   :  { %v4669_v52 = vmax.f32 %v4667_v62, %v4668_v42  ;;  %v4876_v41 = vrot.slane %v4875_v9, 1  ;;  %v5080_v23 = vrot.slane %v5079_v49, 4  ;;  %v5086_v33 = vsel %vm1812_vm3, %v5076_v2, -inf }
0x2196   :  { %v4676_v60 = vmax.f32 %v4674_v53, %v4675_v6  ;;  %v4883_v55 = vrot.slane %v4882_v8, 1  ;;  %v5087_v48 = vrot.slane %v5086_v33, 4 }
0x2197   :  { %v4677_v61 = vsub.f32 %v4658_v25, %v4669_v52  ;;  %v4877_v57 = vmax.f32 %v4875_v9, %v4876_v41  ;;  %v5081_v54 = vmax.f32 %v5079_v49, %v5080_v23 }
0x2198   :  { %v4678_v45 = vsub.f32 %v4660_v11, %v4676_v60  ;;  %v4884_v20 = vmax.f32 %v4882_v8, %v4883_v55  ;;  %v5088_v15 = vmax.f32 %v5086_v33, %v5087_v48 }
0x2199   :  { %v4679_v32 = vmul.f32 1.442695, %v4677_v61  ;;  %v4885_v17 = vsub.f32 %v4866_v7, %v4877_v57  ;;  %v5082_v39 = vrot.slane %v5081_v54, 2 }
0x219a   :  { %v4681_v43 = vmul.f32 1.442695, %v4678_v45  ;;  %v4886_v50 = vsub.f32 %v4868_v21, %v4884_v20  ;;  %v5089_v59 = vrot.slane %v5088_v15, 2 }
0x219b   :  { %6896 = vpow2.f32 %v4679_v32  ;;  %v4887_v62 = vmul.f32 1.442695, %v4885_v17  ;;  %v5083_v42 = vmax.f32 %v5081_v54, %v5082_v39 }
0x219c   :  { %6898 = vpow2.f32 %v4681_v43  ;;  %v4889_v63 = vmul.f32 1.442695, %v4886_v50  ;;  %v5090_v53 = vmax.f32 %v5088_v15, %v5089_v59 }
0x219d   :  { %6900 = vpow2.f32 %v4887_v62  ;;  %v5084_v6 = vrot.slane %v5083_v42, 1 }
0x219e   :  { %6902 = vpow2.f32 %v4889_v63  ;;  %v5091_v25 = vrot.slane %v5090_v53, 1 }
0x219f   :  { %v5085_v9 = vmax.f32 %v5083_v42, %v5084_v6 }
0x21a0   :  { %v5092_v11 = vmax.f32 %v5090_v53, %v5091_v25 }
0x21a1   :  { %v5093_v8 = vsub.f32 %v5074_v38, %v5085_v9 }
0x21a2   :  { %v5094_v49 = vsub.f32 %v5076_v2, %v5092_v11 }
0x21a3   :  { %v5095_v52 = vmul.f32 1.442695, %v5093_v8 }
0x21a4   :  { %v5097_v7 = vmul.f32 1.442695, %v5094_v49 }
0x21a5   :  { %v6897_v41 = vpop.eup %6896  ;;  %6904 = vpow2.f32 %v5095_v52 }
0x21a6   :  { %v6899_v21 = vpop.eup %6898  ;;  %v4683_v23 = vsel %vm1812_vm3, %v6897_v41, 0.0  ;;  %6906 = vpow2.f32 %v5097_v7 }
0x21a7   :  { %v6901_v33 = vpop.eup %6900  ;;  %v4684_v60 = vrot.slane %v4683_v23, 4  ;;  %v4690_v59 = vsel %vm1812_vm3, %v6899_v21, 0.0 }
0x21a8   :  { %v6903_v50 = vpop.eup %6902  ;;  %v4691_v55 = vrot.slane %v4690_v59, 4  ;;  %v4891_v63 = vsel %vm1812_vm3, %v6901_v33, 0.0 }
0x21a9   :  { %v4685_v48 = vadd.f32 %v4684_v60, %v4683_v23  ;;  %v4892_v61 = vrot.slane %v4891_v63, 4  ;;  %v4898_v38 = vsel %vm1812_vm3, %v6903_v50, 0.0 }
0x21aa   :  { %v4692_v2 = vadd.f32 %v4691_v55, %v4690_v59  ;;  %v4899_v57 = vrot.slane %v4898_v38, 4 }
0x21ab   :  { %v4686_v54 = vrot.slane %v4685_v48, 2  ;;  %v4893_v45 = vadd.f32 %v4892_v61, %v4891_v63 }
0x21ac   :  { %v4693_v20 = vrot.slane %v4692_v2, 2  ;;  %v4900_v15 = vadd.f32 %v4899_v57, %v4898_v38 }
0x21ad   :  { %v4687_v32 = vadd.f32 %v4686_v54, %v4685_v48  ;;  %v4894_v17 = vrot.slane %v4893_v45, 2 }
0x21ae   :  { %v4694_v39 = vadd.f32 %v4693_v20, %v4692_v2  ;;  %v4901_v43 = vrot.slane %v4900_v15, 2 }
0x21af   :  { %v6905_v62 = vpop.eup %6904  ;;  %v4895_v42 = vadd.f32 %v4894_v17, %v4893_v45  ;;  %v4688_v53 = vrot.slane %v4687_v32, 1 }
0x21b0   :  { %v6907_v6 = vpop.eup %6906  ;;  %v4902_v25 = vadd.f32 %v4901_v43, %v4900_v15  ;;  %v5099_v9 = vsel %vm1812_vm3, %v6905_v62, 0.0  ;;  %v4695_v11 = vrot.slane %v4694_v39, 1 }
0x21b1   :  { %v5100_v8 = vrot.slane %v5099_v9, 4  ;;  %v5106_v49 = vsel %vm1812_vm3, %v6907_v6, 0.0  ;;  %v4689_v52 = vadd.f32 %v4688_v53, %v4687_v32  ;;  %v4896_v7 = vrot.slane %v4895_v42, 1 }
0x21b2   :  { %v5107_v23 = vrot.slane %v5106_v49, 4  ;;  %v4696_v60 = vadd.f32 %v4695_v11, %v4694_v39  ;;  %v4903_v59 = vrot.slane %v4902_v25, 1 }
0x21b3   :  { %v5101_v55 = vadd.f32 %v5100_v8, %v5099_v9  ;;  %6908 = vrcp.f32 %v4689_v52  ;;  %v4897_v63 = vadd.f32 %v4896_v7, %v4895_v42 }
0x21b4   :  { %v5108_v48 = vadd.f32 %v5107_v23, %v5106_v49  ;;  %6910 = vrcp.f32 %v4696_v60  ;;  %v4904_v61 = vadd.f32 %v4903_v59, %v4902_v25 }
0x21b5   :  { %v5102_v38 = vrot.slane %v5101_v55, 2  ;;  %6912 = vrcp.f32 %v4897_v63 }
0x21b6   :  { %v5109_v2 = vrot.slane %v5108_v48, 2  ;;  %6914 = vrcp.f32 %v4904_v61 }
0x21b7   :  { %v5103_v57 = vadd.f32 %v5102_v38, %v5101_v55 }
0x21b8   :  { %v5110_v54 = vadd.f32 %v5109_v2, %v5108_v48 }
0x21b9   :  { %v5104_v45 = vrot.slane %v5103_v57, 1 }
0x21ba   :  { %v5111_v20 = vrot.slane %v5110_v54, 1 }
0x21bb   :  { %v5105_v15 = vadd.f32 %v5104_v45, %v5103_v57 }
0x21bc   :  { %v5112_v32 = vadd.f32 %v5111_v20, %v5110_v54 }
0x21bd   :  { %v6909_v17 = vpop.eup %6908  ;;  %6916 = vrcp.f32 %v5105_v15 }
0x21be   :  { %v6911_v39 = vpop.eup %6910  ;;  %v4699_v43 = vmul.f32 %v6909_v17, %v6897_v41  ;;  %6918 = vrcp.f32 %v5112_v32 }
0x21bf   :  { %v6913_v53 = vpop.eup %6912  ;;  %v4700_v42 = vmul.f32 %v6911_v39, %v6899_v21 }
0x21c0   :  { %v6915_v9 = vpop.eup %6914  ;;  %v4701_v11 = vadd.f32 1e-08, %v4699_v43  ;;  %v4907_v25 = vmul.f32 %v6913_v53, %v6901_v33 }
0x21c1   :  { %v4702_v8 = vadd.f32 1e-08, %v4700_v42  ;;  %v4908_v49 = vmul.f32 %v6915_v9, %v6903_v50 }
0x21c2   :  { %v4703_v52 = vsel %vm1812_vm3, %v4701_v11, 0.0  ;;  %v4909_v7 = vadd.f32 1e-08, %v4907_v25 }
0x21c3   :  { %v4704_v23 = vsel %vm1812_vm3, %v4702_v8, 0.0  ;;  %v4910_v60 = vadd.f32 1e-08, %v4908_v49 }
0x21c4   :  { %v4705_v59 = vadd.f32 %v4704_v23, %v4703_v52  ;;  %v4911_v55 = vsel %vm1812_vm3, %v4909_v7, 0.0 }
0x21c5   :  { %v4912_v63 = vsel %vm1812_vm3, %v4910_v60, 0.0 }
0x21c6   :  { %4706 = vadd.xlane.f32.xlu1 %v4705_v59  ;;  %v4913_v41 = vadd.f32 %v4912_v63, %v4911_v55 }
0x21c7   :  { %v6917_v48 = vpop.eup %6916 }
0x21c8   :  { %v6919_v21 = vpop.eup %6918  ;;  %4914 = vadd.xlane.f32.xlu0 %v4913_v41  ;;  %v5115_v61 = vmul.f32 %v6917_v48, %v6905_v62 }
0x21c9   :  { %v5116_v33 = vmul.f32 %v6919_v21, %v6907_v6 }
0x21ca   :  { %v5117_v38 = vadd.f32 1e-08, %v5115_v61 }
0x21cb   :  { %v5118_v50 = vadd.f32 1e-08, %v5116_v33 }
0x21cc   :  { %v5119_v2 = vsel %vm1812_vm3, %v5117_v38, 0.0 }
0x21cd   :  { %v5120_v57 = vsel %vm1812_vm3, %v5118_v50, 0.0 }
0x21ce   :  { %v5121_v54 = vadd.f32 %v5120_v57, %v5119_v2 }
0x21d0   :  { %5122 = vadd.xlane.f32.xlu1 %v5121_v54 }
0x2253   :  { %v4707_v45 = vpop.xlane.xlu1 %4706 }
0x2254   :  { %6920 = vrcp.f32 %v4707_v45 }
0x2255   :  { %v4915_v20 = vpop.xlane.xlu0 %4914 }
0x2256   :  { %6922 = vrcp.f32 %v4915_v20 }
0x225d   :  { %v5123_v15 = vpop.xlane.xlu1 %5122 }
0x225e   :  { %v6921_v32 = vpop.eup %6920  ;;  %6924 = vrcp.f32 %v5123_v15 }
0x225f   :  { %v4710_v17 = vmul.f32 %v6921_v32, %v4702_v8  ;;  %v4709_v39 = vmul.f32 %v6921_v32, %v4701_v11 }
0x2260   :  { %v6923_v43 = vpop.eup %6922 }
0x2261   :  { %4775 = vmatprep.mubr.f32.mxu1 %v4710_v17  ;;  %v4918_v62 = vmul.f32 %v6923_v43, %v4910_v60  ;;  %v4917_v9 = vmul.f32 %v6923_v43, %v4909_v7 }
0x2262   :  { %4776 = vmatmul.mubr.f32.vlgmr.msra.gmra.mrb[102].mxu1 %v4709_v39 }
0x2263   :  { %6631 = vmatpush1.bf16.xpose.msra.mxu1 %v7885_v28  ;;  %4983 = vmatprep.mubr.f32.mxu1 %v4918_v62  ;;  %v5213_v28 = vrot.slane %v8456_v18, 4 }
0x2264   :  { %6633 = vmatprep.subr.bf16.mxu1 %v7898_v1 }
0x2268   :  { %v6925_v6 = vpop.eup %6924 }
0x2269   :  { %v5126_v53 = vmul.f32 %v6925_v6, %v5118_v50  ;;  %v5125_v42 = vmul.f32 %v6925_v6, %v5117_v38 }
0x226b   :  { %6635 = vmatpush1.bf16.xpose.msra.mxu1 %v7894_v13  ;;  %5191 = vmatprep.mubr.f32.mxu0 %v5126_v53 }
0x226c   :  { %5192 = vmatmul.mubr.f32.vlgmr.msra.gmra.mrb[86].mxu0 %v5125_v42  ;;  %6653 = vmatprep.subr.bf16.mxu1 %v8721_v29 }
0x226d   :  { %6671 = vmatpush3.bf16.msra.mxu0 %v7997_v27 }
0x226e   :  { %6673 = vmatprep.subr.bf16.mxu0 %v8002_v44 }
0x2271   :  { %6675 = vmatpush3.bf16.msra.mxu0 %v8002_v44 }
0x2272   :  { %4984 = vmatmul.mubr.f32.vlgmr.msra.gmra.mrb[104].mxu1 %v4917_v9  ;;  %6677 = vmatprep.subr.bf16.mxu0 %v8014_v3 }
0x2273   :  { %6655 = vmatpush1.bf16.msra.mxu1 %v7902_v26  ;;  %5280 = vmatprep.mubr.f32.mxu1 %v8710_v22 }
0x2274   :  { %6657 = vmatprep.subr.bf16.mxu1 %v7914_v24 }
0x2277   :  { %6659 = vmatpush1.bf16.msra.mxu1 %v7910_v47 }
0x2278   :  { %6661 = vmatprep.subr.bf16.mxu1 %v7925_v12 }
0x227a   :  { %5968 = vmatmul.mubr.msk.f32.vlgmr.msra.gmra.mrb[106].mxu1 %vm239_vm0, %v5213_v28 }
0x2280   :  { %6663 = vmatpush1.bf16.xpose.msra.mxu1 %v7921_v4 }
0x2281   :  { %6665 = vmatprep.subr.bf16.mxu1 %v7933_v30 }
0x2288   :  { %6667 = vmatpush1.bf16.xpose.msra.mxu1 %v8722_v34 }
0x2289   :  { %6685 = vmatprep.subr.bf16.mxu1 %v8168_v35 }
0x2335   :  { %v4777_v13 = vpop.f32.mrb[102].mxu1 }
0x2336   :  { %v4779_v1 = vpop.f32.mrb[103].mxu1 }
0x233f   :  { %v8512_v26 = vpop.f32.mrb[86].mxu0 }
0x2340   :  { %v5195_v24 = vpop.f32.mrb[87].mxu0 }
0x2345   :  { %v4985_v47 = vpop.f32.mrb[104].mxu1 }
0x2346   :  { %v5406_v22 = vrot.slane %v4985_v47, 4  ;;  %v4987_v27 = vpop.f32.mrb[105].mxu1 }
0x2348   :  { %v5411_v12 = vsel %vm1812_vm3, %v4777_v13, %v5406_v22 }
0x2349   :  { %6280 = vmatprep.mubr.msk.f32.mxu0 %vm239_vm0, %v5411_v12 }
0x234d   :  { %v5282_v44 = vpop.f32.mrb[106].mxu1 }
0x234e   :  { %v5287_v4 = vsel %vm1812_vm3, %v5282_v44, -inf  ;;  %v5284_v30 = vpop.f32.mrb[107].mxu1 }
0x234f   :  { %v5288_v29 = vrot.slane %v5287_v4, 4  ;;  %v5294_v34 = vsel %vm1812_vm3, %v5284_v30, -inf }
0x2350   :  { %v5295_v18 = vrot.slane %v5294_v34, 4 }
0x2351   :  { %v5289_v11 = vmax.f32 %v5287_v4, %v5288_v29 }
0x2352   :  { %v5296_v25 = vmax.f32 %v5294_v34, %v5295_v18 }
0x2353   :  { %v5290_v8 = vrot.slane %v5289_v11, 2 }
0x2354   :  { %v5297_v49 = vrot.slane %v5296_v25, 2 }
0x2355   :  { %v5291_v52 = vmax.f32 %v5289_v11, %v5290_v8 }
0x2356   :  { %v5298_v7 = vmax.f32 %v5296_v25, %v5297_v49 }
0x2357   :  { %v5292_v23 = vrot.slane %v5291_v52, 1 }
0x2358   :  { %v5299_v60 = vrot.slane %v5298_v7, 1 }
0x2359   :  { %v5293_v59 = vmax.f32 %v5291_v52, %v5292_v23 }
0x235a   :  { %v5300_v55 = vmax.f32 %v5298_v7, %v5299_v60 }
0x235b   :  { %v5301_v63 = vsub.f32 %v5282_v44, %v5293_v59 }
0x235c   :  { %v5302_v41 = vsub.f32 %v5284_v30, %v5300_v55 }
0x235d   :  { %v5303_v48 = vmul.f32 1.442695, %v5301_v63 }
0x235e   :  { %v5305_v21 = vmul.f32 1.442695, %v5302_v41 }
0x235f   :  { %6926 = vpow2.f32 %v5303_v48 }
0x2360   :  { %6928 = vpow2.f32 %v5305_v21 }
0x2369   :  { %v6927_v61 = vpop.eup %6926 }
0x236a   :  { %v6929_v33 = vpop.eup %6928  ;;  %v5307_v38 = vsel %vm1812_vm3, %v6927_v61, 0.0 }
0x236b   :  { %v5308_v50 = vrot.slane %v5307_v38, 4  ;;  %v5314_v2 = vsel %vm1812_vm3, %v6929_v33, 0.0 }
0x236c   :  { %v5315_v57 = vrot.slane %v5314_v2, 4 }
0x236d   :  { %v5309_v54 = vadd.f32 %v5308_v50, %v5307_v38 }
0x236e   :  { %v5316_v45 = vadd.f32 %v5315_v57, %v5314_v2  ;;  %v8752_v57 = vld [vmem:[#allocation30_spill] sm:$0xff] }
0x236f   :  { %v5310_v20 = vrot.slane %v5309_v54, 2 }
0x2370   :  { %v5317_v15 = vrot.slane %v5316_v45, 2 }
0x2371   :  { %v5311_v32 = vadd.f32 %v5310_v20, %v5309_v54 }
0x2372   :  { %v5318_v17 = vadd.f32 %v5317_v15, %v5316_v45 }
0x2373   :  { %v5312_v39 = vrot.slane %v5311_v32, 1 }
0x2374   :  { %v5319_v43 = vrot.slane %v5318_v17, 1 }
0x2375   :  { %v5313_v62 = vadd.f32 %v5312_v39, %v5311_v32 }
0x2376   :  { %v5320_v6 = vadd.f32 %v5319_v43, %v5318_v17 }
0x2377   :  { %6930 = vrcp.f32 %v5313_v62 }
0x2378   :  { %6932 = vrcp.f32 %v5320_v6 }
0x2381   :  { %v6931_v53 = vpop.eup %6930 }
0x2382   :  { %v6933_v42 = vpop.eup %6932  ;;  %v5323_v9 = vmul.f32 %v6931_v53, %v6927_v61 }
0x2383   :  { %v5324_v28 = vmul.f32 %v6933_v42, %v6929_v33 }
0x2384   :  { %v5325_v13 = vadd.f32 1e-08, %v5323_v9 }
0x2385   :  { %v5326_v1 = vadd.f32 1e-08, %v5324_v28 }
0x2386   :  { %v5327_v24 = vsel %vm1812_vm3, %v5325_v13, 0.0 }
0x2387   :  { %v5328_v47 = vsel %vm1812_vm3, %v5326_v1, 0.0 }
0x2388   :  { %v5329_v22 = vadd.f32 %v5328_v47, %v5327_v24 }
0x238a   :  { %5330 = vadd.xlane.f32.xlu0 %v5329_v22 }
0x2417   :  { %v5331_v27 = vpop.xlane.xlu0 %5330 }
0x2418   :  { %6934 = vrcp.f32 %v5331_v27 }
0x2422   :  { %v6935_v12 = vpop.eup %6934 }
0x2423   :  { %v5334_v44 = vmul.f32 %v6935_v12, %v5326_v1  ;;  %v5333_v4 = vmul.f32 %v6935_v12, %v5325_v13 }
0x2425   :  { %5399 = vmatprep.mubr.f32.mxu1 %v5334_v44 }
0x2426   :  { %5400 = vmatmul.mubr.f32.vlgmr.msra.gmra.mrb[108].mxu1 %v5333_v4 }
0x2427   :  { %6687 = vmatpush3.bf16.msra.mxu1 %v8168_v35 }
0x2428   :  { %6689 = vmatprep.subr.bf16.mxu1 %v8173_v10 }
0x242b   :  { %6691 = vmatpush3.bf16.msra.mxu1 %v8173_v10 }
0x24f9   :  { %v5401_v30 = vpop.f32.mrb[108].mxu1 }
0x24fa   :  { %v5409_v29 = vrot.slane %v5401_v30, 4  ;;  %v5403_v34 = vpop.f32.mrb[109].mxu1 }
0x24fc   :  { %v5412_v18 = vsel %vm1812_vm3, %v8512_v26, %v5409_v29 }
0x24fd   :  { %6281 = vmatmul.mubr.msk.f32.vlgmr.msra.gmra.mrb[88].mxu0 %vm239_vm0, %v5412_v18 }
0x24fe   :  { %6679 = vmatpush3.bf16.msra.mxu0 %v8014_v3  ;;  %6291 = vmatprep.mubr.msk.f32.mxu0 %vm239_vm0, %v8431_v58 }
0x24ff   :  { %6681 = vmatprep.subr.bf16.mxu0 %v8023_v14 }
0x2502   :  { %6683 = vmatpush3.bf16.msra.mxu0 %v8023_v14 }
0x2503   :  { %6693 = vmatprep.subr.bf16.mxu0 %v8037_v56 }
0x2505   :  { %6292 = vmatmul.mubr.msk.f32.vlgmr.msra.gmra.mrb[90].mxu0 %vm239_vm0, %v8429_v31 }
0x2506   :  { %6695 = vmatpush3.bf16.msra.mxu0 %v8037_v56 }
0x2507   :  { %6697 = vmatprep.subr.bf16.mxu0 %v8047_v0 }
0x250a   :  { %6699 = vmatpush3.bf16.msra.mxu0 %v8047_v0 }
0x250b   :  { %6701 = vmatprep.subr.bf16.mxu0 %v8059_v36 }
0x250e   :  { %6703 = vmatpush3.bf16.msra.mxu0 %v8059_v36 }
0x250f   :  { %6705 = vmatprep.subr.bf16.mxu0 %v8069_v16 }
0x2512   :  { %6707 = vmatpush3.bf16.msra.mxu0 %v8069_v16 }
0x2513   :  { %6709 = vmatprep.subr.bf16.mxu0 %v8079_v51 }
0x2516   :  { %6711 = vmatpush3.bf16.msra.mxu0 %v8079_v51  ;;  %v6955_v51 = vld [vmem:[%s8625_s8 + $0x4] ss:$0 sm:$0xff] }
0x2517   :  { %6713 = vmatprep.subr.bf16.mxu0 %v8089_v46 }
0x251a   :  { %6715 = vmatpush3.bf16.msra.mxu0 %v8089_v46 }
0x251b   :  { %6717 = vmatprep.subr.bf16.mxu0 %v8723_v37 }
0x251e   :  { %6719 = vmatpush3.bf16.msra.mxu0 %v8723_v37 }
0x251f   :  { %6721 = vmatprep.subr.bf16.mxu0 %v8724_v5 }
0x2522   :  { %6723 = vmatpush3.bf16.msra.mxu0 %v8724_v5 }
0x25d0   :  { %v6282_v3 = vpop.f32.mrb[88].mxu0 }
0x25d1   :  { %v5485_v14 = vpop.f32.mrb[89].mxu0  ;;  %v5491_v46 = vadd.f32 %v6955_v51, %v6282_v3 }
0x25d2   :  { %v5486_v35 = vadd.f32 %v6955_v51, %v5485_v14 }
0x25d8   :  { %v6293_v56 = vpop.f32.mrb[90].mxu0 }
0x25d9   :  { %v5570_v0 = vadd.f32 %v8366_v40, %v6293_v56  ;;  %v5564_v36 = vpop.f32.mrb[91].mxu0  ;;  %v8753_v56 = vld [vmem:[#allocation35_spill] sm:$0xff] }
0x25da   :  { %v5565_v16 = vadd.f32 %v8366_v40, %v5564_v36 }
0x25db   :  { %5591 = vrot.lane.b32.xlu1 %v5570_v0, %s7014_s7  ;;  %v5574_v10 = vadd.f32 %v5570_v0, %v5491_v46 }
0x25dc   :  { %5589 = vrot.lane.b32.xlu0 %v5565_v16, %s7014_s7  ;;  %v5573_v37 = vadd.f32 %v5565_v16, %v5486_v35  ;;  %v8754_v16 = vld [vmem:[#allocation36_spill] sm:$0xff] }
0x25dd   :  { %v5974_v5 = vmul.f32 -1.442695, %v5574_v10 }
0x25de   :  { %v5973_v31 = vmul.f32 -1.442695, %v5573_v37 }
0x25df   :  { %6936 = vpow2.f32 %v5974_v5  ;;  %v6956_v5 = vld [vmem:[%s8625_s8 + $0x6] ss:$0 sm:$0xff] }
0x25e0   :  { %6938 = vpow2.f32 %v5973_v31 }
0x25e9   :  { %v6937_v58 = vpop.eup %6936 }
0x25ea   :  { %v6939_v26 = vpop.eup %6938  ;;  %v5582_v11 = vadd.f32 1.0, %v6937_v58 }
0x25eb   :  { %v5581_v40 = vadd.f32 1.0, %v6939_v26 }
0x25ec   :  { %6940 = vrcp.f32 %v5582_v11 }
0x25ed   :  { %6942 = vrcp.f32 %v5581_v40 }
0x25f6   :  { %v6941_v25 = vpop.eup %6940 }
0x25f7   :  { %v6943_v49 = vpop.eup %6942  ;;  %v5610_v21 = vsub.f32 1.0, %v6941_v25  ;;  %v5622_v38 = vmul.f32 %v6941_v25, %v8420_v19 }
0x25f8   :  { %v5609_v33 = vsub.f32 1.0, %v6943_v49  ;;  %v5621_v54 = vmul.f32 %v6943_v49, %v8752_v57 }
0x264d   :  { %v5592_v8 = vpop.permute.xlu1 %5591 }
0x264e   :  { %v5596_v52 = vmul.f32 %v6941_v25, %v5592_v8  ;;  %v5590_v7 = vpop.permute.xlu0 %5589  ;;  %v6957_v8 = vld [vmem:[%s8625_s8 + $0x7] ss:$0 sm:$0xff]  ;;  %s6980_s8 = scalar_lea.vmem %s5859_s25, 256 }
0x264f   :  { %v5595_v23 = vmul.f32 %v6943_v49, %v5590_v7  ;;  %p6981_p8 = scmp.ne.s32.totalorder %s5859_s25, %s6980_s8  ;;  %p6986_p10 = scmp.lt.s32.totalorder %s6980_s8, %s6980_s8 }
0x2650   :  { %5601 = vrot.lane.b32.xlu0 %v5596_v52, %s7014_s7 }
0x2651   :  { %5599 = vrot.lane.b32.xlu1 %v5595_v23, %s7014_s7  ;;  %p6987_p11 = por %p6986_p10, %p6985_p9 }
0x2653   :  { %p6988_p12 = pnand %p6987_p11, %p6981_p8 }
0x26c2   :  { %v5602_v60 = vpop.permute.xlu0 %5601 }
0x26c3   :  { %v5606_v59 = vadd.f32 %v5602_v60, %v5491_v46  ;;  %v5600_v55 = vpop.permute.xlu1 %5599 }
0x26c4   :  { %v5605_v63 = vadd.f32 %v5600_v55, %v5486_v35 }
0x26c5   :  { %6944 = vtanh.f32 %v5606_v59 }
0x26c6   :  { %6946 = vtanh.f32 %v5605_v63 }
0x26cf   :  { %v6945_v41 = vpop.eup %6944 }
0x26d0   :  { %v6947_v48 = vpop.eup %6946  ;;  %5615 = vrot.lane.b32.xlu0 %v6945_v41, %s7016_s18 }
0x26d1   :  { %5613 = vrot.lane.b32.xlu1 %v6947_v48, %s7016_s18 }
0x2742   :  { %v5616_v61 = vpop.permute.xlu0 %5615 }
0x2743   :  { %v5620_v50 = vmul.f32 %v5616_v61, %v5610_v21  ;;  %v5614_v2 = vpop.permute.xlu1 %5613 }
0x2744   :  { %v5619_v45 = vmul.f32 %v5614_v2, %v5609_v33 }
0x2745   :  { %v8564_v20 = vadd.f32 %v5622_v38, %v5620_v50 }
0x2746   :  { %v8566_v15 = vadd.f32 %v5621_v54, %v5619_v45 }
0x2747   :  { %5629 = vrot.lane.b32.xlu0 %v8564_v20, %s7016_s18 }
0x2748   :  { %5627 = vrot.lane.b32.xlu1 %v8566_v15, %s7016_s18 }
0x27b9   :  { %v5630_v32 = vpop.permute.xlu0 %5629 }
0x27ba   :  { %v5628_v17 = vpop.permute.xlu1 %5627  ;;  %v5636_v39 = vsel %vm239_vm0, %v5630_v32, 0.0 }
0x27bb   :  { %v5633_v19 = vsel %vm239_vm0, %v5628_v17, 0.0  ;;  %5637 = vadd.xlane.f32.xlu0 %v5636_v39 }
0x27bc   :  { %5634 = vadd.xlane.f32.xlu1 %v5633_v19 }
0x2848   :  { %v5638_v43 = vpop.xlane.xlu0 %5637 }
0x2849   :  { %v5640_v62 = vmul.f32 0.03125, %v5638_v43  ;;  %v5635_v6 = vpop.xlane.xlu1 %5634 }
0x284a   :  { %v5639_v53 = vmul.f32 0.03125, %v5635_v6 }
0x284b   :  { %v5642_v42 = vsub.f32 %v8564_v20, %v5640_v62 }
0x284c   :  { %v5641_v9 = vsub.f32 %v8566_v15, %v5639_v53 }
0x284d   :  { %v5644_v28 = vmul.f32 %v5642_v42, %v5642_v42 }
0x284e   :  { %v5643_v13 = vmul.f32 %v5641_v9, %v5641_v9 }
0x284f   :  { %5649 = vrot.lane.b32.xlu1 %v5644_v28, %s7016_s18 }
0x2850   :  { %5647 = vrot.lane.b32.xlu0 %v5643_v13, %s7016_s18 }
0x28c1   :  { %v5650_v1 = vpop.permute.xlu1 %5649 }
0x28c2   :  { %v5656_v24 = vsel %vm239_vm0, %v5650_v1, 0.0  ;;  %v5648_v47 = vpop.permute.xlu0 %5647 }
0x28c3   :  { %v5653_v22 = vsel %vm239_vm0, %v5648_v47, 0.0  ;;  %5657 = vadd.xlane.f32.xlu0 %v5656_v24 }
0x28c4   :  { %5654 = vadd.xlane.f32.xlu1 %v5653_v22 }
0x2950   :  { %v5658_v27 = vpop.xlane.xlu0 %5657 }
0x2951   :  { %v5660_v12 = vmul.f32 0.03125, %v5658_v27  ;;  %v5655_v44 = vpop.xlane.xlu1 %5654 }
0x2952   :  { %v5659_v4 = vmul.f32 0.03125, %v5655_v44 }
0x2953   :  { %v5662_v30 = vadd.f32 1e-05, %v5660_v12 }
0x2954   :  { %v5661_v29 = vadd.f32 1e-05, %v5659_v4 }
0x2955   :  { %6948 = vrsqrt.f32 %v5662_v30 }
0x2956   :  { %6950 = vrsqrt.f32 %v5661_v29 }
0x295f   :  { %v6949_v34 = vpop.eup %6948 }
0x2960   :  { %v6951_v18 = vpop.eup %6950  ;;  %v5666_v3 = vmul.f32 %v6949_v34, %v5642_v42 }
0x2961   :  { %v5665_v14 = vmul.f32 %v6951_v18, %v5641_v9 }
0x2962   :  { %v5668_v0 = vmul.f32 %v5666_v3, %v8753_v56 }
0x2963   :  { %v5667_v36 = vmul.f32 %v5665_v14, %v8753_v56 }
0x2964   :  { %v5670_v51 = vadd.f32 %v5668_v0, %v8754_v16 }
0x2965   :  { %v5669_v46 = vadd.f32 %v5667_v36, %v8754_v16 }
0x2966   :  { %5675 = vrot.lane.b32.xlu1 %v5670_v51, %s7016_s18 }
0x2967   :  { %5673 = vrot.lane.b32.xlu0 %v5669_v46, %s7016_s18 }
0x29d8   :  { %v5676_v10 = vpop.permute.xlu1 %5675 }
0x29d9   :  { %v5674_v35 = vpop.permute.xlu0 %5673 }
0x29da   :  { %6302 = vmatprep.mubr.msk.f32.mxu1 %vm239_vm0, %v5674_v35 }
0x29db   :  { %6303 = vmatmul.mubr.msk.f32.vlgmr.msra.gmra.mrb[110].mxu1 %vm239_vm0, %v5676_v10 }
0x2aae   :  { %v6304_v37 = vpop.f32.mrb[110].mxu1 }
0x2aaf   :  { %v5753_v31 = vadd.f32 %v6956_v5, %v6304_v37  ;;  %v5747_v58 = vpop.f32.mrb[111].mxu1 }
0x2ab0   :  { %v5748_v26 = vadd.f32 %v6956_v5, %v5747_v58 }
0x2ab1   :  { %v5757_v40 = vmax.f32 %v5753_v31, 0.0 }
0x2ab2   :  { %v5756_v11 = vmax.f32 %v5748_v26, 0.0 }
0x2ab4   :  { %6337 = vmatprep.mubr.f32.mxu0 %v5756_v11 }
0x2ab5   :  { %6338 = vmatmul.mubr.f32.vlgmr.msra.gmra.mrb[92].mxu0 %v5757_v40 }
0x2b88   :  { %v6339_v25 = vpop.f32.mrb[92].mxu0 }
0x2b89   :  { %v5830_v49 = vadd.f32 %v6957_v8, %v6339_v25  ;;  %v5824_v52 = vpop.f32.mrb[93].mxu0 }
0x2b8a   :  { %v5825_v7 = vadd.f32 %v6957_v8, %v5824_v52 }
0x2b8b   :  { %5837 = vrot.lane.b32.xlu0 %v5830_v49, %s7015_s17 }
0x2b8c   :  { %5835 = vrot.lane.b32.xlu1 %v5825_v7, %s7015_s17 }
0x2bfd   :  { %v5838_v23 = vpop.permute.xlu0 %5837 }
0x2bfe   :  { %v5842_v60 = vadd.f32 %v5838_v23, %v8564_v20  ;;  %v5836_v59 = vpop.permute.xlu1 %5835 }
0x2bff   :  { %v5841_v55 = vadd.f32 %v5836_v59, %v8566_v15 }
0x2c00   :  { %5847 = vrot.lane.b32.xlu0 %v5842_v60, %s7016_s18 }
0x2c01   :  { %5845 = vrot.lane.b32.xlu1 %v5841_v55, %s7016_s18 }
0x2c72   :  { %v5848_v63 = vpop.permute.xlu0 %5847 }
0x2c73   :  { %5852 = vst.msk [vmem:[#allocation6 + $0x8] sm:$0xff] %vm239_vm0, %v5848_v63  ;;  %v5846_v41 = vpop.permute.xlu1 %5845 }
0x2c74   :  { %5851 = vst.msk [vmem:[#allocation6] sm:$0xff] %vm239_vm0, %v5846_v41 }
0x2c75   :  { %6991 = shalt.err (!%p6988_p12)
}
0x2c76   :  { %s6992_s18 = scalar_lea.hbm %s8627_s10, 256 }
0x2c77   :  { %p6993_p13 = scmp.ne.s32.totalorder %s8627_s10, %s6992_s18  ;;  %p6996_p0 = scmp.lt.u32.totalorder %s6992_s18, %s8627_s10 }
0x2c79   :  { %p6998_p1 = pnand %p6996_p0, %p6993_p13 }
0x2c7b   :  { %7001 = shalt.err (!%p6998_p1)
}
0x2c7c   :  { %5864 = dma.vmem_to_hbm [thread:$0]  %s5859_s25, 256, %s8627_s10, [#allocation5], %s7007_s23, %s7007_s23, %s7008_s24  }
0x2c7d   :  { %7004 = dma.done.wait [#allocation5], 256  }
0x2c7e   :  { %7005 = vsyncadd [#allocation5], 4294967040 }
0x2c7f   :  { %5868 = vsyncpa [#allocation4], 1 }
0x2c80   :  { %5869 = vsyncpa [#allocation5], 1 }

</bundles_post_ra>
